<compile_context>
chip_gen: v7x
topology: tpu7x:2x2x1
jax: 0.10.0
libtpu: 0.0.40
codegen_flags: <defaults>
</compile_context>

<pallas_src>
import functools

import jax
import jax.numpy as jnp
from jax import lax
from jax.experimental import pallas as pl
from jax.experimental.pallas import tpu as pltpu

NUM_SAMPLES = 16                       # samples per ray (power of two)
SAMPLE_SHIFT = NUM_SAMPLES.bit_length() - 1
NUM_FREQS = 4                          # positional-encoding frequencies
HIDDEN = 32                            # MLP hidden width
TILE_RAYS = 64                         # rays per grid step
PE_DIM = 3 + 6 * NUM_FREQS

assert (1 << SAMPLE_SHIFT) == NUM_SAMPLES, "NUM_SAMPLES must be a power of two"


def _nerf_kernel(near, far,
                 od_ref,                                  # (1, 6, TB)  [origin | direction] transposed
                 ft_ref,                                  # (12, 3)  PE frequency matrix (transposed)
                 w1p_ref, w1s_ref, w1c_ref, b1_ref,       # first layer, split p/sin/cos (transposed)
                 w2_ref, b2_ref,                          # second layer (transposed)
                 w3_ref, b3_ref,                          # fused rgb+sigma head (4, 32)
                 rgb_ref):                                # (TB, 3) out
    f32 = jnp.float32
    S = NUM_SAMPLES
    TB = od_ref.shape[2]
    N = TB * S
    delta = (far - near) / S                              # scalar segment length

    # ---- flat sample bookkeeping: k = ray*S + samp, k lives on lanes --------
    k_lane = lax.broadcasted_iota(jnp.int32, (1, N), 1)   # (1, N)
    samp = jnp.bitwise_and(k_lane, S - 1)                 # sample id = k & (S-1)
    ray_of_k = jnp.right_shift(k_lane, SAMPLE_SHIFT)      # ray id    = k >> log2(S)

    # ray-membership mask (rays on sublanes, samples on lanes); the ONLY mask.
    b_ids = lax.broadcasted_iota(jnp.int32, (TB, 1), 0)   # (TB, 1)
    QT = (ray_of_k == b_ids).astype(f32)                  # (TB, N)

    # ---- sample locations along each ray (uniform segment midpoints) --------
    t_mid = (samp.astype(f32) + 0.5) * (1.0 / S)
    z_mid = near * (1.0 - t_mid) + far * t_mid            # (1, N)

    od_t = od_ref[0]                                      # (6, TB)
    o_t = od_t[0:3, :]                                    # (3, TB)
    d_t = od_t[3:6, :]                                    # (3, TB)
    o_f = jnp.dot(o_t, QT, preferred_element_type=f32)    # (3, N) per-sample origins
    d_f = jnp.dot(d_t, QT, preferred_element_type=f32)    # (3, N) per-sample directions
    p = o_f + d_f * z_mid                                 # (3, N) sample points

    # ---- neural field: lane-dense positional encoding + MLP -----------------
    # phase[3l+c, k] = 2**l * p[c, k]
    phase = jnp.dot(ft_ref[...], p, preferred_element_type=f32)   # (12, N)
    sin_pe = jnp.sin(phase)
    cos_pe = jnp.cos(phase)

    h = (jnp.dot(w1p_ref[...], p, preferred_element_type=f32)
         + jnp.dot(w1s_ref[...], sin_pe, preferred_element_type=f32)
         + jnp.dot(w1c_ref[...], cos_pe, preferred_element_type=f32)
         + b1_ref[...])
    h = jnp.maximum(h, 0.0)                               # (32, N)

    h2 = jnp.dot(w2_ref[...], h, preferred_element_type=f32) + b2_ref[...]
    h2 = jnp.maximum(h2, 0.0)                             # (32, N)

    out4 = jnp.dot(w3_ref[...], h2, preferred_element_type=f32) + b3_ref[...]  # (4, N)
    color = jax.nn.sigmoid(out4[0:3, :])                  # (3, N) emitted radiance
    sigma = jnp.maximum(out4[3:4, :], 0.0)                # (1, N) density (relu)

    # ---- alpha compositing ---------------------------------------------------
    # log(1 - alpha) = -sigma * delta directly (no exp/log round trip).
    nsd = sigma * (-delta)                                # (1, N)
    alpha = 1.0 - jnp.exp(nsd)                            # (1, N)

    # Exclusive within-ray prefix sum of nsd along lanes (segments of S):
    # log2(S) masked Hillis-Steele steps on the XLU (no mask matmuls).
    inc = nsd
    for shift in (1 << j for j in range(SAMPLE_SHIFT)):
        rolled = pltpu.roll(inc, shift=shift, axis=1)     # rolled[k] = inc[k - shift]
        inc = inc + jnp.where(samp >= shift, rolled, 0.0)
    trans = jnp.exp(inc - nsd)                            # transmittance T (1, N)
    w = alpha * trans                                     # (1, N) weights

    # per-ray reduction: rgb[b, c] = sum_k QT[b, k] * w[k] * color[c, k]
    cw = color * w                                        # (3, N)
    rgb = lax.dot_general(QT, cw, (((1,), (1,)), ((), ())),
                          preferred_element_type=f32)     # (TB, 3)
    rgb_ref[...] = rgb.astype(rgb_ref.dtype)


def _const_spec(arr):
    nd = arr.ndim
    return pl.BlockSpec(arr.shape, lambda i, _n=nd: (0,) * _n)


def nerf_forward(origins, directions, near, far, params):
    W1, b1, W2, b2, W3, b3 = params
    B = origins.shape[0]
    assert B % TILE_RAYS == 0, "batch must be a multiple of TILE_RAYS"
    n_tiles = B // TILE_RAYS
    grid = (n_tiles,)

    # pack origins + directions as (tiles, 6, TILE_RAYS): one DMA per step,
    # already in the transposed (feature-on-sublane) kernel layout.
    od = jnp.concatenate([origins, directions], axis=1)                    # (B, 6)
    od_tiles = od.reshape(n_tiles, TILE_RAYS, 6).transpose(0, 2, 1)        # (tiles, 6, TILE)

    # PE frequency matrix F[c, 3l+c] = 2**l ; kernel uses its transpose.
    freqs = jnp.repeat(2.0 ** jnp.arange(NUM_FREQS, dtype=jnp.float32), 3)
    F = jnp.tile(jnp.eye(3, dtype=jnp.float32), (1, NUM_FREQS)) * freqs[None, :]

    # repack first layer for the lane-dense PE: p / sin / cos row groups.
    W1p = W1[0:3]
    W1s = jnp.concatenate([W1[3 + 6 * l: 6 + 6 * l] for l in range(NUM_FREQS)], axis=0)
    W1c = jnp.concatenate([W1[6 + 6 * l: 9 + 6 * l] for l in range(NUM_FREQS)], axis=0)

    weight_args = (F.T,                     # (12, 3)
                   W1p.T, W1s.T, W1c.T,     # (32, 3), (32, 12), (32, 12)
                   b1[:, None],             # (32, 1)
                   W2.T, b2[:, None],       # (32, 32), (32, 1)
                   W3.T, b3[:, None])       # (4, 32), (4, 1)

    kernel = functools.partial(_nerf_kernel, float(near), float(far))

    return pl.pallas_call(
        kernel,
        out_shape=jax.ShapeDtypeStruct((B, 3), jnp.float32),
        grid_spec=pltpu.PrefetchScalarGridSpec(
            num_scalar_prefetch=0,
            grid=grid,
            in_specs=[
                pl.BlockSpec((1, 6, TILE_RAYS), lambda i: (i, 0, 0)),      # packed o|d (transposed)
            ] + [_const_spec(a) for a in weight_args],
            out_specs=pl.BlockSpec((TILE_RAYS, 3), lambda i: (i, 0)),
        ),
        compiler_params=pltpu.CompilerParams(dimension_semantics=("parallel",)),
    )(od_tiles, *weight_args)


# ----------------------------- reference (pure JAX) ---------------------------
def nerf_reference(origins, directions, near, far, params):
    W1, b1, W2, b2, W3, b3 = params
    B = origins.shape[0]
    S = NUM_SAMPLES
    t_vals = jnp.linspace(0.0, 1.0, S + 1)
    z_vals = near * (1.0 - t_vals) + far * t_vals
    z_vals = jnp.broadcast_to(z_vals, (B, S + 1))
    z_mid = 0.5 * (z_vals[:, :-1] + z_vals[:, 1:])
    pts = origins[:, None, :] + directions[:, None, :] * z_mid[:, :, None]
    p = pts.reshape(-1, 3)
    feats = [p]
    for l in range(NUM_FREQS):
        fr = float(2 ** l)
        feats += [jnp.sin(p * fr), jnp.cos(p * fr)]
    pe = jnp.concatenate(feats, axis=-1)
    h = jax.nn.relu(pe @ W1 + b1)
    h = jax.nn.relu(h @ W2 + b2)
    out = (h @ W3 + b3).reshape(B, S, 4)
    color = jax.nn.sigmoid(out[..., :3])
    sigma = jax.nn.relu(out[..., 3])
    deltas = z_vals[:, 1:] - z_vals[:, :-1]
    alphas = 1.0 - jnp.exp(-sigma * deltas)
    trans = jnp.concatenate([jnp.ones_like(alphas[:, :1]), 1.0 - alphas + 1e-10], axis=-1)
    T = jnp.cumprod(trans, axis=-1)[:, :-1]
    weights = alphas * T
    return jnp.sum(weights[..., None] * color, axis=1)


def init_field_params(key):
    k1, k2, k3, k4, k5, k6 = jax.random.split(key, 6)
    W1 = jax.random.normal(k1, (PE_DIM, HIDDEN), jnp.float32) * (0.5 / jnp.sqrt(PE_DIM))
    b1 = jax.random.normal(k2, (HIDDEN,), jnp.float32) * 0.01
    W2 = jax.random.normal(k3, (HIDDEN, HIDDEN), jnp.float32) * (0.5 / jnp.sqrt(HIDDEN))
    b2 = jax.random.normal(k4, (HIDDEN,), jnp.float32) * 0.01
    W3 = jax.random.normal(k5, (HIDDEN, 4), jnp.float32) * (0.5 / jnp.sqrt(HIDDEN))
    b3 = jax.random.normal(k6, (4,), jnp.float32) * 0.01
    return W1, b1, W2, b2, W3, b3


if __name__ == "__main__":
    key = jax.random.PRNGKey(0)
    kp, ko, kd = jax.random.split(key, 3)
    params = init_field_params(kp)

    B = 128                                                  # 2 grid steps of 64 rays
    origins = jax.random.normal(ko, (B, 3), jnp.float32)
    directions = jax.random.normal(kd, (B, 3), jnp.float32)
    directions = directions / jnp.linalg.norm(directions, axis=-1, keepdims=True)
    near, far = 1.0, 5.0

    rgb = nerf_forward(origins, directions, near, far, params)
    rgb = jax.block_until_ready(rgb)

    ref = nerf_reference(origins, directions, near, far, params)
    assert rgb.shape == (B, 3)
    assert jnp.allclose(rgb, ref, atol=1e-4, rtol=1e-4), (rgb, ref)
    print("KERNEL_OK")
</pallas_src>

<mosaic_0001>
module attributes {stable_mosaic.version = 11 : i64} {
  func.func @_nerf_kernel(%arg0: i32, %arg1: memref<1x6x64xf32, #tpu.memory_space<vmem>>, %arg2: memref<12x3xf32, #tpu.memory_space<vmem>>, %arg3: memref<32x3xf32, #tpu.memory_space<vmem>>, %arg4: memref<32x12xf32, #tpu.memory_space<vmem>>, %arg5: memref<32x12xf32, #tpu.memory_space<vmem>>, %arg6: memref<32x1xf32, #tpu.memory_space<vmem>>, %arg7: memref<32x32xf32, #tpu.memory_space<vmem>>, %arg8: memref<32x1xf32, #tpu.memory_space<vmem>>, %arg9: memref<4x32xf32, #tpu.memory_space<vmem>>, %arg10: memref<4x1xf32, #tpu.memory_space<vmem>>, %arg11: memref<64x3xf32, #tpu.memory_space<vmem>>) attributes {dimension_semantics = [#tpu.dimension_semantics<parallel>], iteration_bounds = array<i64: 2>, scalar_prefetch = 0 : i64, scratch_operands = 0 : i64, tpu.core_type = #tpu.core_type<tc>, window_params = [{transform_indices = @transform_0, window_bounds = array<i64: 1, 6, 64>}, {pipeline_mode = #tpu.pipeline_mode<synchronous>, transform_indices = @transform_1, window_bounds = array<i64: 12, 3>}, {pipeline_mode = #tpu.pipeline_mode<synchronous>, transform_indices = @transform_2, window_bounds = array<i64: 32, 3>}, {pipeline_mode = #tpu.pipeline_mode<synchronous>, transform_indices = @transform_3, window_bounds = array<i64: 32, 12>}, {pipeline_mode = #tpu.pipeline_mode<synchronous>, transform_indices = @transform_4, window_bounds = array<i64: 32, 12>}, {pipeline_mode = #tpu.pipeline_mode<synchronous>, transform_indices = @transform_5, window_bounds = array<i64: 32, 1>}, {pipeline_mode = #tpu.pipeline_mode<synchronous>, transform_indices = @transform_6, window_bounds = array<i64: 32, 32>}, {pipeline_mode = #tpu.pipeline_mode<synchronous>, transform_indices = @transform_7, window_bounds = array<i64: 32, 1>}, {pipeline_mode = #tpu.pipeline_mode<synchronous>, transform_indices = @transform_8, window_bounds = array<i64: 4, 32>}, {pipeline_mode = #tpu.pipeline_mode<synchronous>, transform_indices = @transform_9, window_bounds = array<i64: 4, 1>}, {transform_indices = @transform_10, window_bounds = array<i64: 64, 3>}]} {
    %0 = tpu.iota {dimensions = array<i32: 1>} : vector<1x1024xi32>
    %c15_i32 = arith.constant 15 : i32
    %1 = vector.broadcast %c15_i32 : i32 to vector<1x1024xi32>
    %2 = arith.andi %0, %1 : vector<1x1024xi32>
    %c4_i32 = arith.constant 4 : i32
    %3 = vector.broadcast %c4_i32 : i32 to vector<1x1024xi32>
    %4 = arith.shrsi %0, %3 : vector<1x1024xi32>
    %5 = tpu.iota {dimensions = array<i32: 0>} : vector<64x1xi32>
    %6 = vector.broadcast %4 : vector<1x1024xi32> to vector<64x1024xi32>
    %7 = vector.broadcast %5 : vector<64x1xi32> to vector<64x1024xi32>
    %8 = arith.cmpi eq, %6, %7 : vector<64x1024xi32>
    %9 = arith.extui %8 : vector<64x1024xi1> to vector<64x1024xi32>
    %10 = arith.sitofp %9 : vector<64x1024xi32> to vector<64x1024xf32>
    %11 = arith.sitofp %2 : vector<1x1024xi32> to vector<1x1024xf32>
    %cst = arith.constant 5.000000e-01 : f32
    %12 = vector.broadcast %cst : f32 to vector<1x1024xf32>
    %13 = arith.addf %11, %12 : vector<1x1024xf32>
    %cst_0 = arith.constant 6.250000e-02 : f32
    %14 = vector.broadcast %cst_0 : f32 to vector<1x1024xf32>
    %15 = arith.mulf %13, %14 : vector<1x1024xf32>
    %cst_1 = arith.constant 1.000000e+00 : f32
    %16 = vector.broadcast %cst_1 : f32 to vector<1x1024xf32>
    %17 = arith.subf %16, %15 : vector<1x1024xf32>
    %cst_2 = arith.constant 1.000000e+00 : f32
    %18 = vector.broadcast %cst_2 : f32 to vector<1x1024xf32>
    %19 = arith.mulf %18, %17 : vector<1x1024xf32>
    %cst_3 = arith.constant 5.000000e+00 : f32
    %20 = vector.broadcast %cst_3 : f32 to vector<1x1024xf32>
    %21 = arith.mulf %20, %15 : vector<1x1024xf32>
    %22 = arith.addf %19, %21 : vector<1x1024xf32>
    %c0 = arith.constant 0 : index
    %c0_4 = arith.constant 0 : index
    %c0_5 = arith.constant 0 : index
    %23 = vector.load %arg1[%c0, %c0_4, %c0_5] : memref<1x6x64xf32, #tpu.memory_space<vmem>>, vector<1x6x64xf32>
    %24 = vector.shape_cast %23 : vector<1x6x64xf32> to vector<6x64xf32>
    %25 = vector.extract_strided_slice %24 {offsets = [0, 0], sizes = [3, 64], strides = [1, 1]} : vector<6x64xf32> to vector<3x64xf32>
    %26 = vector.extract_strided_slice %24 {offsets = [3, 0], sizes = [3, 64], strides = [1, 1]} : vector<6x64xf32> to vector<3x64xf32>
    %cst_6 = arith.constant dense<0.000000e+00> : vector<3x1024xf32>
    %27 = tpu.matmul %25, %10, %cst_6 {dimension_numbers = #tpu.dot_dimension_numbers<[1], [0], [0], [1], [0, 0, 1, 1], [], []>} : vector<3x64xf32>, vector<64x1024xf32>, vector<3x1024xf32> -> vector<3x1024xf32>
    %cst_7 = arith.constant dense<0.000000e+00> : vector<3x1024xf32>
    %28 = tpu.matmul %26, %10, %cst_7 {dimension_numbers = #tpu.dot_dimension_numbers<[1], [0], [0], [1], [0, 0, 1, 1], [], []>} : vector<3x64xf32>, vector<64x1024xf32>, vector<3x1024xf32> -> vector<3x1024xf32>
    %29 = vector.broadcast %22 : vector<1x1024xf32> to vector<3x1024xf32>
    %30 = arith.mulf %28, %29 : vector<3x1024xf32>
    %31 = arith.addf %27, %30 : vector<3x1024xf32>
    %c0_8 = arith.constant 0 : index
    %c0_9 = arith.constant 0 : index
    %32 = vector.load %arg2[%c0_8, %c0_9] : memref<12x3xf32, #tpu.memory_space<vmem>>, vector<12x3xf32>
    %cst_10 = arith.constant dense<0.000000e+00> : vector<12x1024xf32>
    %33 = tpu.matmul %32, %31, %cst_10 {dimension_numbers = #tpu.dot_dimension_numbers<[1], [0], [0], [1], [0, 0, 1, 1], [], []>} : vector<12x3xf32>, vector<3x1024xf32>, vector<12x1024xf32> -> vector<12x1024xf32>
    %34 = math.sin %33 : vector<12x1024xf32>
    %35 = math.cos %33 : vector<12x1024xf32>
    %c0_11 = arith.constant 0 : index
    %c0_12 = arith.constant 0 : index
    %36 = vector.load %arg3[%c0_11, %c0_12] : memref<32x3xf32, #tpu.memory_space<vmem>>, vector<32x3xf32>
    %cst_13 = arith.constant dense<0.000000e+00> : vector<32x1024xf32>
    %37 = tpu.matmul %36, %31, %cst_13 {dimension_numbers = #tpu.dot_dimension_numbers<[1], [0], [0], [1], [0, 0, 1, 1], [], []>} : vector<32x3xf32>, vector<3x1024xf32>, vector<32x1024xf32> -> vector<32x1024xf32>
    %c0_14 = arith.constant 0 : index
    %c0_15 = arith.constant 0 : index
    %38 = vector.load %arg4[%c0_14, %c0_15] : memref<32x12xf32, #tpu.memory_space<vmem>>, vector<32x12xf32>
    %cst_16 = arith.constant dense<0.000000e+00> : vector<32x1024xf32>
    %39 = tpu.matmul %38, %34, %cst_16 {dimension_numbers = #tpu.dot_dimension_numbers<[1], [0], [0], [1], [0, 0, 1, 1], [], []>} : vector<32x12xf32>, vector<12x1024xf32>, vector<32x1024xf32> -> vector<32x1024xf32>
    %40 = arith.addf %37, %39 : vector<32x1024xf32>
    %c0_17 = arith.constant 0 : index
    %c0_18 = arith.constant 0 : index
    %41 = vector.load %arg5[%c0_17, %c0_18] : memref<32x12xf32, #tpu.memory_space<vmem>>, vector<32x12xf32>
    %cst_19 = arith.constant dense<0.000000e+00> : vector<32x1024xf32>
    %42 = tpu.matmul %41, %35, %cst_19 {dimension_numbers = #tpu.dot_dimension_numbers<[1], [0], [0], [1], [0, 0, 1, 1], [], []>} : vector<32x12xf32>, vector<12x1024xf32>, vector<32x1024xf32> -> vector<32x1024xf32>
    %43 = arith.addf %40, %42 : vector<32x1024xf32>
    %c0_20 = arith.constant 0 : index
    %c0_21 = arith.constant 0 : index
    %44 = vector.load %arg6[%c0_20, %c0_21] : memref<32x1xf32, #tpu.memory_space<vmem>>, vector<32x1xf32>
    %45 = vector.broadcast %44 : vector<32x1xf32> to vector<32x1024xf32>
    %46 = arith.addf %43, %45 : vector<32x1024xf32>
    %cst_22 = arith.constant 0.000000e+00 : f32
    %47 = vector.broadcast %cst_22 : f32 to vector<32x1024xf32>
    %48 = arith.maximumf %46, %47 : vector<32x1024xf32>
    %c0_23 = arith.constant 0 : index
    %c0_24 = arith.constant 0 : index
    %49 = vector.load %arg7[%c0_23, %c0_24] : memref<32x32xf32, #tpu.memory_space<vmem>>, vector<32x32xf32>
    %cst_25 = arith.constant dense<0.000000e+00> : vector<32x1024xf32>
    %50 = tpu.matmul %49, %48, %cst_25 {dimension_numbers = #tpu.dot_dimension_numbers<[1], [0], [0], [1], [0, 0, 1, 1], [], []>} : vector<32x32xf32>, vector<32x1024xf32>, vector<32x1024xf32> -> vector<32x1024xf32>
    %c0_26 = arith.constant 0 : index
    %c0_27 = arith.constant 0 : index
    %51 = vector.load %arg8[%c0_26, %c0_27] : memref<32x1xf32, #tpu.memory_space<vmem>>, vector<32x1xf32>
    %52 = vector.broadcast %51 : vector<32x1xf32> to vector<32x1024xf32>
    %53 = arith.addf %50, %52 : vector<32x1024xf32>
    %cst_28 = arith.constant 0.000000e+00 : f32
    %54 = vector.broadcast %cst_28 : f32 to vector<32x1024xf32>
    %55 = arith.maximumf %53, %54 : vector<32x1024xf32>
    %c0_29 = arith.constant 0 : index
    %c0_30 = arith.constant 0 : index
    %56 = vector.load %arg9[%c0_29, %c0_30] : memref<4x32xf32, #tpu.memory_space<vmem>>, vector<4x32xf32>
    %cst_31 = arith.constant dense<0.000000e+00> : vector<4x1024xf32>
    %57 = tpu.matmul %56, %55, %cst_31 {dimension_numbers = #tpu.dot_dimension_numbers<[1], [0], [0], [1], [0, 0, 1, 1], [], []>} : vector<4x32xf32>, vector<32x1024xf32>, vector<4x1024xf32> -> vector<4x1024xf32>
    %c0_32 = arith.constant 0 : index
    %c0_33 = arith.constant 0 : index
    %58 = vector.load %arg10[%c0_32, %c0_33] : memref<4x1xf32, #tpu.memory_space<vmem>>, vector<4x1xf32>
    %59 = vector.broadcast %58 : vector<4x1xf32> to vector<4x1024xf32>
    %60 = arith.addf %57, %59 : vector<4x1024xf32>
    %61 = vector.extract_strided_slice %60 {offsets = [0, 0], sizes = [3, 1024], strides = [1, 1]} : vector<4x1024xf32> to vector<3x1024xf32>
    %62 = arith.negf %61 : vector<3x1024xf32>
    %63 = math.exp %62 : vector<3x1024xf32>
    %cst_34 = arith.constant 1.000000e+00 : f32
    %64 = vector.broadcast %cst_34 : f32 to vector<3x1024xf32>
    %65 = arith.addf %64, %63 : vector<3x1024xf32>
    %66 = arith.divf %64, %65 : vector<3x1024xf32>
    %67 = vector.extract_strided_slice %60 {offsets = [3, 0], sizes = [1, 1024], strides = [1, 1]} : vector<4x1024xf32> to vector<1x1024xf32>
    %cst_35 = arith.constant 0.000000e+00 : f32
    %68 = vector.broadcast %cst_35 : f32 to vector<1x1024xf32>
    %69 = arith.maximumf %67, %68 : vector<1x1024xf32>
    %cst_36 = arith.constant -2.500000e-01 : f32
    %70 = vector.broadcast %cst_36 : f32 to vector<1x1024xf32>
    %71 = arith.mulf %69, %70 : vector<1x1024xf32>
    %72 = math.exp %71 : vector<1x1024xf32>
    %cst_37 = arith.constant 1.000000e+00 : f32
    %73 = vector.broadcast %cst_37 : f32 to vector<1x1024xf32>
    %74 = arith.subf %73, %72 : vector<1x1024xf32>
    %c1_i32 = arith.constant 1 : i32
    %75 = tpu.dynamic_rotate %71 by %c1_i32 dim 1 : vector<1x1024xf32>, i32 -> vector<1x1024xf32>
    %c1_i32_38 = arith.constant 1 : i32
    %76 = vector.broadcast %c1_i32_38 : i32 to vector<1x1024xi32>
    %77 = arith.cmpi sge, %2, %76 : vector<1x1024xi32>
    %cst_39 = arith.constant 0.000000e+00 : f32
    %78 = vector.broadcast %cst_39 : f32 to vector<1x1024xf32>
    %79 = arith.select %77, %75, %78 : vector<1x1024xi1>, vector<1x1024xf32>
    %80 = arith.addf %71, %79 : vector<1x1024xf32>
    %c2_i32 = arith.constant 2 : i32
    %81 = tpu.dynamic_rotate %80 by %c2_i32 dim 1 : vector<1x1024xf32>, i32 -> vector<1x1024xf32>
    %c2_i32_40 = arith.constant 2 : i32
    %82 = vector.broadcast %c2_i32_40 : i32 to vector<1x1024xi32>
    %83 = arith.cmpi sge, %2, %82 : vector<1x1024xi32>
    %cst_41 = arith.constant 0.000000e+00 : f32
    %84 = vector.broadcast %cst_41 : f32 to vector<1x1024xf32>
    %85 = arith.select %83, %81, %84 : vector<1x1024xi1>, vector<1x1024xf32>
    %86 = arith.addf %80, %85 : vector<1x1024xf32>
    %c4_i32_42 = arith.constant 4 : i32
    %87 = tpu.dynamic_rotate %86 by %c4_i32_42 dim 1 : vector<1x1024xf32>, i32 -> vector<1x1024xf32>
    %c4_i32_43 = arith.constant 4 : i32
    %88 = vector.broadcast %c4_i32_43 : i32 to vector<1x1024xi32>
    %89 = arith.cmpi sge, %2, %88 : vector<1x1024xi32>
    %cst_44 = arith.constant 0.000000e+00 : f32
    %90 = vector.broadcast %cst_44 : f32 to vector<1x1024xf32>
    %91 = arith.select %89, %87, %90 : vector<1x1024xi1>, vector<1x1024xf32>
    %92 = arith.addf %86, %91 : vector<1x1024xf32>
    %c8_i32 = arith.constant 8 : i32
    %93 = tpu.dynamic_rotate %92 by %c8_i32 dim 1 : vector<1x1024xf32>, i32 -> vector<1x1024xf32>
    %c8_i32_45 = arith.constant 8 : i32
    %94 = vector.broadcast %c8_i32_45 : i32 to vector<1x1024xi32>
    %95 = arith.cmpi sge, %2, %94 : vector<1x1024xi32>
    %cst_46 = arith.constant 0.000000e+00 : f32
    %96 = vector.broadcast %cst_46 : f32 to vector<1x1024xf32>
    %97 = arith.select %95, %93, %96 : vector<1x1024xi1>, vector<1x1024xf32>
    %98 = arith.addf %92, %97 : vector<1x1024xf32>
    %99 = arith.subf %98, %71 : vector<1x1024xf32>
    %100 = math.exp %99 : vector<1x1024xf32>
    %101 = arith.mulf %74, %100 : vector<1x1024xf32>
    %102 = vector.broadcast %101 : vector<1x1024xf32> to vector<3x1024xf32>
    %103 = arith.mulf %66, %102 : vector<3x1024xf32>
    %cst_47 = arith.constant dense<0.000000e+00> : vector<64x3xf32>
    %104 = tpu.matmul %10, %103, %cst_47 {dimension_numbers = #tpu.dot_dimension_numbers<[1], [1], [0], [0], [0, 0, 1, 0], [], []>} : vector<64x1024xf32>, vector<3x1024xf32>, vector<64x3xf32> -> vector<64x3xf32>
    %c0_48 = arith.constant 0 : index
    %c0_49 = arith.constant 0 : index
    %105 = vector.load %arg11[%c0_48, %c0_49] : memref<64x3xf32, #tpu.memory_space<vmem>>, vector<64x3xf32>
    tpu.vector_store %arg11[%c0_48, %c0_49], %104 {strides = array<i32>} : memref<64x3xf32, #tpu.memory_space<vmem>>, vector<64x3xf32>,
    return
  }
  func.func @transform_0(%arg0: i32) -> (i32, i32, i32) {
    %c0_i32 = arith.constant 0 : i32
    %c0_i32_0 = arith.constant 0 : i32
    %c0_i32_1 = arith.constant 0 : i32
    return %arg0, %c0_i32, %c0_i32_0 : i32, i32, i32
  }
  func.func @transform_1(%arg0: i32) -> (i32, i32) {
    %c0_i32 = arith.constant 0 : i32
    %c0_i32_0 = arith.constant 0 : i32
    %c0_i32_1 = arith.constant 0 : i32
    return %c0_i32, %c0_i32_0 : i32, i32
  }
  func.func @transform_2(%arg0: i32) -> (i32, i32) {
    %c0_i32 = arith.constant 0 : i32
    %c0_i32_0 = arith.constant 0 : i32
    %c0_i32_1 = arith.constant 0 : i32
    return %c0_i32, %c0_i32_0 : i32, i32
  }
  func.func @transform_3(%arg0: i32) -> (i32, i32) {
    %c0_i32 = arith.constant 0 : i32
    %c0_i32_0 = arith.constant 0 : i32
    %c0_i32_1 = arith.constant 0 : i32
    return %c0_i32, %c0_i32_0 : i32, i32
  }
  func.func @transform_4(%arg0: i32) -> (i32, i32) {
    %c0_i32 = arith.constant 0 : i32
    %c0_i32_0 = arith.constant 0 : i32
    %c0_i32_1 = arith.constant 0 : i32
    return %c0_i32, %c0_i32_0 : i32, i32
  }
  func.func @transform_5(%arg0: i32) -> (i32, i32) {
    %c0_i32 = arith.constant 0 : i32
    %c0_i32_0 = arith.constant 0 : i32
    %c0_i32_1 = arith.constant 0 : i32
    return %c0_i32, %c0_i32_0 : i32, i32
  }
  func.func @transform_6(%arg0: i32) -> (i32, i32) {
    %c0_i32 = arith.constant 0 : i32
    %c0_i32_0 = arith.constant 0 : i32
    %c0_i32_1 = arith.constant 0 : i32
    return %c0_i32, %c0_i32_0 : i32, i32
  }
  func.func @transform_7(%arg0: i32) -> (i32, i32) {
    %c0_i32 = arith.constant 0 : i32
    %c0_i32_0 = arith.constant 0 : i32
    %c0_i32_1 = arith.constant 0 : i32
    return %c0_i32, %c0_i32_0 : i32, i32
  }
  func.func @transform_8(%arg0: i32) -> (i32, i32) {
    %c0_i32 = arith.constant 0 : i32
    %c0_i32_0 = arith.constant 0 : i32
    %c0_i32_1 = arith.constant 0 : i32
    return %c0_i32, %c0_i32_0 : i32, i32
  }
  func.func @transform_9(%arg0: i32) -> (i32, i32) {
    %c0_i32 = arith.constant 0 : i32
    %c0_i32_0 = arith.constant 0 : i32
    %c0_i32_1 = arith.constant 0 : i32
    return %c0_i32, %c0_i32_0 : i32, i32
  }
  func.func @transform_10(%arg0: i32) -> (i32, i32) {
    %c0_i32 = arith.constant 0 : i32
    %c0_i32_0 = arith.constant 0 : i32
    return %arg0, %c0_i32 : i32, i32
  }
}

</mosaic_0001>

<bundles_post_ra>
// kernel: tpu_custom_call.1
= control target key start
LH: loop header
LB: loop body
LE: loop exit
PB: predicated region body
PF: predicated region fallthrough
CT: control target
= control target key end

     0   :  { %s9068_s13 = smov 0   ;;  %s12818_s0 = inlined_call_operand.vmem [shape: f32[2,6,64], index: 0, kind: input, shape index: {}]   ;;  %s12819_s1 = inlined_call_operand.vmem [shape: f32[12,3], index: 1, kind: input, shape index: {}]   ;;  %s12820_s2 = inlined_call_operand.vmem [shape: f32[32,3], index: 2, kind: input, shape index: {}]   ;;  %s12821_s3 = inlined_call_operand.vmem [shape: f32[32,12], index: 3, kind: input, shape index: {}]   ;;  %s12822_s4 = inlined_call_operand.vmem [shape: f32[32,12], index: 4, kind: input, shape index: {}]   ;;  %s12823_s5 = inlined_call_operand.vmem [shape: f32[32,1], index: 5, kind: input, shape index: {}]   ;;  %s12824_s6 = inlined_call_operand.vmem [shape: f32[32,32], index: 6, kind: input, shape index: {}]   ;;  %s12825_s7 = inlined_call_operand.vmem [shape: f32[32,1], index: 7, kind: input, shape index: {}]   ;;  %s12826_s8 = inlined_call_operand.vmem [shape: f32[4,32], index: 8, kind: input, shape index: {}]   ;;  %s12827_s9 = inlined_call_operand.vmem [shape: f32[4,1], index: 9, kind: input, shape index: {}]   ;;  %s12828_s10 = inlined_call_operand.vmem [shape: f32[128,3], index: 10, kind: output, shape index: {}]  }
   0x1 LB: > { %s9074_s14 = sadd.s32 4294967295, %s8996_s13   ;;  %p7915_p0 = scmp.ge.s32.totalorder %s8996_s13, 1  ;;  %s8996_s13 = sphi %s9068_s13, %s20_s13  }
   0x2   : > { %p311_p1 = scmp.lt.s32.totalorder %s8996_s13, 3 }
   0x4   : > { %p312_p2 = pnand %p7915_p0, %p311_p1 }
   0x6   : > { %315 = sbr.rel (%p312_p2) target bundleno = 2510 (0x9ce), region = 60 }
   0xd   : > { %v358_v0 = vlaneseq  ;;  %v12873_v1 = vmov 0.0   ;;  %p348_p3 = scmp.lt.s32.totalorder %s9074_s14, 1  ;;  %v8999_v19 = vmov 1.0|1.0   ;;  %v13023_v26 = vmov 0  ;;  %s9008_s22 = smov 1  }
   0xe   : > { %702 = vmatprep.mubr.f32.mxu0 %v12873_v1  ;;  %773 = vmatprep.mubr.f32.mxu1 %v12873_v1  ;;  %v13025_v28 = vmov 0  ;;  %v13028_v29 = vmov 0  ;;  %v13033_v34 = vmov 0  ;;  %v13036_v35 = vmov 0  ;;  %s9009_s23 = smov 2   ;;  %s9010_s24 = smov 4  }
   0xf   : > { %v9080_v2 = vand.u32 127, %v358_v0  ;;  %v9082_v3 = vshrl.u32 %v358_v0, 7  ;;  %s9178_s15 = scalar_select %p348_p3, %s9074_s14, 1  ;;  %v13042_v38 = vmov 0  ;;  %v13046_v41 = vmov 0 }
  0x10   : > { %v13050_v42 = vmov 0  ;;  %v13054_v43 = vmov 0  ;;  %v13058_v45 = vmov 0  ;;  %v13062_v46 = vmov 0  ;;  %s9011_s25 = smov 8   ;;  %s7917_s26 = sshll.u32 %s9074_s14, 3 }
  0x11   : > { %12996 = vst [vmem:[#allocation2_spill] sm:$0xff] %v9080_v2  ;;  %12997 = vst [vmem:[#allocation3_spill] sm:$0xff] %v9082_v3  ;;  %v9085_v4 = vadd.s32 128, %v9080_v2  ;;  %v9088_v5 = vadd.s32 8, %v9082_v3  ;;  %v9091_v6 = vadd.s32 384, %v9080_v2  ;;  %v9094_v7 = vshra.s32 %v9080_v2, 4 }
  0x12   : > { %v9097_v8 = vadd.s32 256, %v9080_v2  ;;  %v9100_v9 = vadd.s32 16, %v9082_v3  ;;  %v9103_v10 = vadd.s32 24, %v9082_v3  ;;  %v9106_v11 = vadd.s32 32, %v9082_v3  ;;  %s7916_s16 = sshll.u32 %s9178_s15, 3  ;;  %p353_p4 = scmp.lt.s32.totalorder %s7917_s26, 15 }
  0x13   : > { %12998 = vst [vmem:[#allocation4_spill] sm:$0xff] %v9088_v5  ;;  %12999 = vst [vmem:[#allocation5_spill] sm:$0xff] %v9094_v7  ;;  %v9110_v12 = vshra.s32 %v9085_v4, 4  ;;  %v9113_v13 = vshra.s32 %v9091_v6, 4  ;;  %vm12839_vm0 = vcmp.eq.s32.totalorder %v9094_v7, %v9082_v3  ;;  %vm12833_vm1 = vcmp.eq.s32.totalorder %v9094_v7, %v9088_v5  ;;  %s351_s19 = scalar_lea.vmem %s12818_s0, %s7916_s16 }
  0x14   : > { %13000 = vst [vmem:[#allocation6_spill] sm:$0xff] %v9100_v9  ;;  %13001 = vst [vmem:[#allocation7_spill] sm:$0xff] %v9103_v10  ;;  %v9130_v15 = vshra.s32 %v9097_v8, 4  ;;  %vm12830_vm3 = vcmp.eq.s32.totalorder %v9094_v7, %v9100_v9  ;;  %vm12829_vm4 = vcmp.eq.s32.totalorder %v9094_v7, %v9103_v10  ;;  %v9137_v16 = vadd.s32 40, %v9082_v3  ;;  %v9384_v39 = vld [vmem:[%s351_s19] sm:$0x3f] }
  0x15   : > { %13002 = vst [vmem:[#allocation8_spill] sm:$0xff] %v9106_v11  ;;  %13003 = vst [vmem:[#allocation9_spill] sm:$0xff] %v9110_v12  ;;  %vm12842_vm5 = vcmp.eq.s32.totalorder %v9110_v12, %v9082_v3  ;;  %vm12836_vm6 = vcmp.eq.s32.totalorder %v9110_v12, %v9088_v5  ;;  %vm12832_vm7 = vcmp.eq.s32.totalorder %v9113_v13, %v9082_v3  ;;  %v9218_v22 = vadd.s32 48, %v9082_v3  ;;  %s13413_s26 = smov (!%p353_p4, %s7917_s26), 15 }
  0x16   : > { %13004 = vst [vmem:[#allocation10_spill] sm:$0xff] %v9113_v13  ;;  %vm9125_vm2 = vmpackc.low %vm12833_vm1, %vm12839_vm0  ;;  %vm12831_vm8 = vcmp.eq.s32.totalorder %v9113_v13, %v9088_v5  ;;  %vm12835_vm11 = vcmp.eq.s32.totalorder %v9130_v15, %v9082_v3  ;;  %vm12834_vm12 = vcmp.eq.s32.totalorder %v9130_v15, %v9088_v5  ;;  %vm12838_vm13 = vcmp.eq.s32.totalorder %v9110_v12, %v9100_v9  ;;  %s7918_s27 = sshll.u32 %s13413_s26, 3 }
  0x17   : > { %13007 = vst [vmem:[#allocation11_spill] sm:$0xff] %v9130_v15  ;;  %13008 = vst [vmem:[#allocation12_spill] sm:$0xff] %v9137_v16  ;;  %vm12837_vm14 = vcmp.eq.s32.totalorder %v9110_v12, %v9103_v10  ;;  %vm12843_vm1 = vcmp.eq.s32.totalorder %v9130_v15, %v9103_v10  ;;  %v9255_v25 = vadd.s32 56, %v9082_v3  ;;  %v9276_v27 = vadd.s32 640, %v9080_v2  ;;  %s12797_s30 = scalar_lea.vmem %s12828_s10, %s7918_s27 }
  0x18   : > { %vm9153_vm9 = vmpackc.low %vm12829_vm4, %vm12830_vm3  ;;  %vm12841_vm4 = vcmp.eq.s32.totalorder %v9113_v13, %v9100_v9  ;;  %vm12840_vm3 = vcmp.eq.s32.totalorder %v9113_v13, %v9103_v10  ;;  %13017 = vst [vmem:[#allocation13_spill] sm:$0xff] %v9218_v22  ;;  %v9322_v31 = vadd.s32 896, %v9080_v2  ;;  %v9325_v32 = vadd.s32 512, %v9080_v2 }
  0x19   : > { %vm9163_vm10 = vmpackc.low %vm12836_vm6, %vm12842_vm5  ;;  %vm12845_vm6 = vcmp.eq.s32.totalorder %v9110_v12, %v9137_v16  ;;  %13022 = vst [vmem:[#allocation14_spill] sm:$0xff] %v9255_v25  ;;  %v9319_v30 = vshra.s32 %v9276_v27, 4  ;;  %v9328_v33 = vadd.s32 768, %v9080_v2  ;;  %vm13052_vm5 = vcmp.eq.s32.totalorder %v9130_v15, %v9218_v22 }
  0x1a   : > { %8430 = vmatprep.subr.msk.bf16.mxu0 %vm9163_vm10, %v8999_v19  ;;  %vm9189_vm15 = vmpackc.low %vm12831_vm8, %vm12832_vm7  ;;  %vm12844_vm7 = vcmp.eq.s32.totalorder %v9130_v15, %v9100_v9  ;;  %v9362_v36 = vshra.s32 %v9322_v31, 4  ;;  %v9365_v37 = vshra.s32 %v9325_v32, 4  ;;  %v9437_v44 = vrot.slane %v9384_v39, 3 }
  0x1b   : > { %8446 = vmatprep.subr.msk.bf16.mxu1 %vm9189_vm15, %v8999_v19  ;;  %8432 = vmatpush1.bf16.msk.msra.mxu0 %vm9125_vm2, %v8999_v19  ;;  %vm9209_vm8 = vmpackc.low %vm12834_vm12, %vm12835_vm11  ;;  %vm12846_vm11 = vcmp.eq.s32.totalorder %v9110_v12, %v9106_v11  ;;  %13030 = vst [vmem:[#allocation15_spill] sm:$0xff] %v9319_v30  ;;  %v9387_v40 = vshra.s32 %v9328_v33, 4  ;;  %v13071_v48 = vmov 0  ;;  %v13076_v49 = vmov 0 }
  0x1c   : > { %8448 = vmatpush1.bf16.msk.msra.mxu1 %vm9209_vm8, %v8999_v19  ;;  %vm9229_vm12 = vmpackc.low %vm12837_vm14, %vm12838_vm13  ;;  %vm12847_vm13 = vcmp.eq.s32.totalorder %v9113_v13, %v9106_v11  ;;  %13038 = vst [vmem:[#allocation16_spill] sm:$0xff] %v9362_v36  ;;  %v13079_v50 = vmov 0  ;;  %v13082_v51 = vmov 0  ;;  %v13086_v52 = vmov 0 }
  0x1d   : > { %8434 = vmatprep.subr.msk.bf16.mxu0 %vm9229_vm12, %v8999_v19  ;;  %vm9246_vm14 = vmpackc.low %vm12840_vm3, %vm12841_vm4  ;;  %vm12853_vm4 = vcmp.eq.s32.totalorder %v9113_v13, %v9218_v22  ;;  %13039 = vst [vmem:[#allocation17_spill] sm:$0xff] %v9365_v37  ;;  %v13090_v53 = vmov 0  ;;  %v13093_v54 = vmov 0  ;;  %v13101_v56 = vmov 0 }
  0x1e   : > { %8450 = vmatprep.subr.msk.bf16.mxu1 %vm9246_vm14, %v8999_v19  ;;  %vm9267_vm3 = vmpackc.low %vm12843_vm1, %vm12844_vm7  ;;  %vm12850_vm7 = vcmp.eq.s32.totalorder %v9130_v15, %v9106_v11  ;;  %13044 = vst [vmem:[#allocation18_spill] sm:$0xff] %v9387_v40  ;;  %v13105_v57 = vmov 0  ;;  %v9830_v14 = vand.u32 15, %v9080_v2  ;;  %v9833_v17 = vand.u32 15, %v9085_v4 }
  0x1f   : > { %v13024_v26 = vsel %vm9267_vm3, 4294967295, %v13023_v26  ;;  %8436 = vmatpush1.bf16.msk.msra.mxu0 %vm9153_vm9, %v8999_v19  ;;  %vm9287_vm1 = vmpackc.low %vm12845_vm6, %vm12846_vm11  ;;  %vm13027_vm6 = vcmp.eq.s32.totalorder %v9113_v13, %v9137_v16  ;;  %v9836_v18 = vand.u32 15, %v9097_v8  ;;  %v9854_v47 = vand.u32 15, %v9325_v32 }
  0x20   : > { %v13026_v28 = vsel %vm9287_vm1, 4294967295, %v13025_v28  ;;  %8452 = vmatpush1.bf16.msk.msra.mxu1 %vm9267_vm3, %v8999_v19  ;;  %8438 = vmatprep.subr.msk.bf16.mxu0 %vm9287_vm1, %v8999_v19  ;;  %vm9311_vm11 = vmpackc.low %vm13027_vm6, %vm12847_vm13  ;;  %vm13031_vm6 = vcmp.eq.s32.totalorder %v9094_v7, %v9106_v11  ;;  %vm13032_vm13 = vcmp.eq.s32.totalorder %v9094_v7, %v9137_v16  ;;  %13145 = vst [vmem:[#allocation19_spill] sm:$0xff] %v9830_v14  ;;  %v584_v20 = vcvt.s32.f32 %v9830_v14 }
  0x21   : > { %v13029_v29 = vsel %vm9311_vm11, 4294967295, %v13028_v29  ;;  %8454 = vmatprep.subr.msk.bf16.mxu1 %vm9311_vm11, %v8999_v19  ;;  %vm9339_vm0 = vmpackc.low %vm13032_vm13, %vm13031_vm6  ;;  %vm13035_vm11 = vcmp.eq.s32.totalorder %v9130_v15, %v9137_v16  ;;  %13146 = vst [vmem:[#allocation20_spill] sm:$0xff] %v9833_v17  ;;  %v585_v21 = vcvt.s32.f32 %v9833_v17  ;;  %v586_v23 = vcvt.s32.f32 %v9836_v18 }
  0x22   : > { %v13034_v34 = vsel %vm9339_vm0, 4294967295, %v13033_v34  ;;  %vm9353_vm1 = vmpackc.low %vm13035_vm11, %vm12850_vm7  ;;  %vm13040_vm11 = vcmp.eq.s32.totalorder %v9110_v12, %v9218_v22  ;;  %vm13041_vm7 = vcmp.eq.s32.totalorder %v9110_v12, %v9255_v25  ;;  %13147 = vst [vmem:[#allocation21_spill] sm:$0xff] %v9836_v18 }
  0x23   : > { %v13037_v35 = vsel %vm9353_vm1, 4294967295, %v13036_v35  ;;  %8440 = vmatpush1.bf16.msk.msra.mxu0 %vm9339_vm0, %v8999_v19  ;;  %vm9376_vm13 = vmpackc.low %vm13041_vm7, %vm13040_vm11  ;;  %vm13045_vm7 = vcmp.eq.s32.totalorder %v9113_v13, %v9255_v25  ;;  %13149 = vst [vmem:[#allocation23_spill] sm:$0xff] %v9854_v47 }
  0x24   : > { %v13043_v38 = vsel %vm9376_vm13, 4294967295, %v13042_v38  ;;  %8456 = vmatpush1.bf16.msk.msra.mxu1 %vm9353_vm1, %v8999_v19  ;;  %8442 = vmatprep.subr.msk.bf16.mxu0 %vm9376_vm13, %v8999_v19  ;;  %vm9401_vm11 = vmpackc.low %vm13045_vm7, %vm12853_vm4  ;;  %vm13048_vm13 = vcmp.eq.s32.totalorder %v9094_v7, %v9218_v22  ;;  %vm13049_vm1 = vcmp.eq.s32.totalorder %v9094_v7, %v9255_v25 }
  0x25   : > { %v13047_v41 = vsel %vm9401_vm11, 4294967295, %v13046_v41  ;;  %8458 = vmatprep.subr.msk.bf16.mxu1 %vm9401_vm11, %v8999_v19  ;;  %vm9418_vm7 = vmpackc.low %vm13049_vm1, %vm13048_vm13  ;;  %vm13053_vm11 = vcmp.eq.s32.totalorder %v9130_v15, %v9255_v25  ;;  %vm13068_vm13 = vcmask 523264  }
  0x26   : > { %v13051_v42 = vsel %vm9418_vm7, 4294967295, %v13050_v42  ;;  %vm9432_vm0 = vmpackc.low %vm13053_vm11, %vm13052_vm5  ;;  %vm13056_vm5 = vcmp.eq.s32.totalorder %v9319_v30, %v9082_v3  ;;  %vm13057_vm11 = vcmp.eq.s32.totalorder %v9319_v30, %v9088_v5 }
  0x27   : > { %v13055_v43 = vsel %vm9432_vm0, 4294967295, %v13054_v43  ;;  %8444 = vmatpush1.bf16.msk.msra.mxu0 %vm9418_vm7, %v8999_v19  ;;  %vm9452_vm4 = vmpackc.low %vm13057_vm11, %vm13056_vm5  ;;  %vm13060_vm5 = vcmp.eq.s32.totalorder %v9362_v36, %v9082_v3  ;;  %vm13061_vm11 = vcmp.eq.s32.totalorder %v9362_v36, %v9088_v5  ;;  %vm13070_vm7 = vcmp.eq.s32.totalorder %v9387_v40, %v9088_v5 }
  0x28   : > { %v13059_v45 = vsel %vm9452_vm4, 4294967295, %v13058_v45  ;;  %8460 = vmatpush1.bf16.msk.msra.mxu1 %vm9432_vm0, %v8999_v19  ;;  %8462 = vmatprep.subr.msk.bf16.mxu0 %vm9452_vm4, %v8999_v19  ;;  %vm9472_vm6 = vmpackc.low %vm13061_vm11, %vm13060_vm5  ;;  %vm13064_vm4 = vcmp.eq.s32.totalorder %v9365_v37, %v9082_v3  ;;  %vm13065_vm0 = vcmp.eq.s32.totalorder %v9365_v37, %v9088_v5  ;;  %vm12862_vm11 = vcmp.eq.s32.totalorder %v9362_v36, %v9100_v9 }
  0x29   : > { %v13063_v46 = vsel %vm9472_vm6, 4294967295, %v13062_v46  ;;  %8478 = vmatprep.subr.msk.bf16.mxu1 %vm9472_vm6, %v8999_v19  ;;  %vm9489_vm5 = vmpackc.low %vm13065_vm0, %vm13064_vm4  ;;  %vm13069_vm6 = vcmp.eq.s32.totalorder %v9387_v40, %v9082_v3  ;;  %vm12865_vm0 = vcmp.eq.s32.totalorder %v9365_v37, %v9100_v9  ;;  %vm13088_vm4 = vcmp.eq.s32.totalorder %v9319_v30, %v9106_v11 }
  0x2a   : > { %7999 = vmatmul.mubr.msk.f32.vlgmr.msra.gmra.mrb[0].mxu0 %vm13068_vm13, %v9437_v44  ;;  %vm9505_vm3 = vmpackc.low %vm13070_vm7, %vm13069_vm6  ;;  %vm13075_vm6 = vcmp.eq.s32.totalorder %v9319_v30, %v9103_v10 }
  0x2b   : > { %v13072_v48 = vsel %vm9505_vm3, 4294967295, %v13071_v48  ;;  %vm13073_vm1 = vmmov %vm13068_vm13  ;;  %8464 = vmatpush1.bf16.msk.msra.mxu0 %vm9489_vm5, %v8999_v19  ;;  %vm13074_vm13 = vcmp.eq.s32.totalorder %v9319_v30, %v9100_v9  ;;  %844 = vmatprep.mubr.f32.mxu0 %v12873_v1 }
  0x2c   : > { %8016 = vmatmul.mubr.msk.f32.vlgmr.msra.gmra.mrb[0].mxu1 %vm13073_vm1, %v9437_v44  ;;  %vm9524_vm7 = vmpackc.low %vm13075_vm6, %vm13074_vm13  ;;  %vm13078_vm13 = vcmp.eq.s32.totalorder %v9362_v36, %v9103_v10  ;;  %vm13084_vm1 = vcmp.eq.s32.totalorder %v9387_v40, %v9100_v9 }
  0x2d   : > { %v13077_v49 = vsel %vm9524_vm7, 4294967295, %v13076_v49  ;;  %8480 = vmatpush1.bf16.msk.msra.mxu1 %vm9505_vm3, %v8999_v19  ;;  %8466 = vmatprep.subr.msk.bf16.mxu0 %vm9524_vm7, %v8999_v19  ;;  %vm9544_vm6 = vmpackc.low %vm13078_vm13, %vm12862_vm11  ;;  %vm13081_vm7 = vcmp.eq.s32.totalorder %v9365_v37, %v9103_v10  ;;  %vm12868_vm11 = vcmp.eq.s32.totalorder %v9362_v36, %v9106_v11 }
  0x2e   : > { %v13080_v50 = vsel %vm9544_vm6, 4294967295, %v13079_v50  ;;  %8482 = vmatprep.subr.msk.bf16.mxu1 %vm9544_vm6, %v8999_v19  ;;  %vm9561_vm13 = vmpackc.low %vm13081_vm7, %vm12865_vm0  ;;  %vm13085_vm6 = vcmp.eq.s32.totalorder %v9387_v40, %v9103_v10  ;;  %915 = vmatprep.mubr.f32.mxu1 %v12873_v1  ;;  %vm13099_vm0 = vcmp.eq.s32.totalorder %v9387_v40, %v9106_v11  ;;  %vm13103_vm7 = vcmp.eq.s32.totalorder %v9319_v30, %v9218_v22 }
  0x2f   : > { %v13083_v51 = vsel %vm9561_vm13, 4294967295, %v13082_v51  ;;  %vm9576_vm3 = vmpackc.low %vm13085_vm6, %vm13084_vm1  ;;  %8468 = vmatpush1.bf16.msk.msra.mxu0 %vm9561_vm13, %v8999_v19  ;;  %vm13089_vm1 = vcmp.eq.s32.totalorder %v9319_v30, %v9137_v16 }
  0x30   : > { %v13087_v52 = vsel %vm9576_vm3, 4294967295, %v13086_v52  ;;  %vm9594_vm6 = vmpackc.low %vm13089_vm1, %vm13088_vm4  ;;  %vm13092_vm4 = vcmp.eq.s32.totalorder %v9362_v36, %v9137_v16 }
  0x31   : > { %v13091_v53 = vsel %vm9594_vm6, 4294967295, %v13090_v53  ;;  %8484 = vmatpush1.bf16.msk.msra.mxu1 %vm9576_vm3, %v8999_v19  ;;  %8470 = vmatprep.subr.msk.bf16.mxu0 %vm9594_vm6, %v8999_v19  ;;  %vm9614_vm1 = vmpackc.low %vm13092_vm4, %vm12868_vm11  ;;  %vm13095_vm6 = vcmp.eq.s32.totalorder %v9365_v37, %v9106_v11  ;;  %vm13096_vm3 = vcmp.eq.s32.totalorder %v9365_v37, %v9137_v16  ;;  %vm13104_vm11 = vcmp.eq.s32.totalorder %v9319_v30, %v9255_v25 }
  0x32   : > { %v13094_v54 = vsel %vm9614_vm1, 4294967295, %v13093_v54  ;;  %8486 = vmatprep.subr.msk.bf16.mxu1 %vm9614_vm1, %v8999_v19  ;;  %vm9631_vm4 = vmpackc.low %vm13096_vm3, %vm13095_vm6  ;;  %vm13100_vm1 = vcmp.eq.s32.totalorder %v9387_v40, %v9137_v16  ;;  %vm13111_vm6 = vcmp.eq.s32.totalorder %v9365_v37, %v9218_v22 }
  0x33   : > { %vm9645_vm13 = vmpackc.low %vm13100_vm1, %vm13099_vm0  ;;  %8472 = vmatpush1.bf16.msk.msra.mxu0 %vm9631_vm4, %v8999_v19  ;;  %vm13112_vm1 = vcmp.eq.s32.totalorder %v9365_v37, %v9255_v25 }
  0x34   : > { %v13102_v56 = vsel %vm9645_vm13, 4294967295, %v13101_v56  ;;  %vm9662_vm0 = vmpackc.low %vm13104_vm11, %vm13103_vm7  ;;  %vm13107_vm11 = vcmp.eq.s32.totalorder %v9362_v36, %v9218_v22  ;;  %vm13108_vm7 = vcmp.eq.s32.totalorder %v9362_v36, %v9255_v25 }
  0x35   : > { %v13106_v57 = vsel %vm9662_vm0, 4294967295, %v13105_v57  ;;  %8488 = vmatpush1.bf16.msk.msra.mxu1 %vm9645_vm13, %v8999_v19  ;;  %8474 = vmatprep.subr.msk.bf16.mxu0 %vm9662_vm0, %v8999_v19  ;;  %vm9682_vm3 = vmpackc.low %vm13108_vm7, %vm13107_vm11  ;;  %vm13115_vm11 = vcmp.eq.s32.totalorder %v9387_v40, %v9218_v22  ;;  %vm13116_vm7 = vcmp.eq.s32.totalorder %v9387_v40, %v9255_v25  ;;  %v12903_v40 = vmov 1326507024  }
  0x36   : > { %8490 = vmatprep.subr.msk.bf16.mxu1 %vm9682_vm3, %v8999_v19  ;;  %vm9695_vm0 = vmpackc.low %vm13112_vm1, %vm13111_vm6  ;;  %vm13119_vm6 = vcmask 523264  }
  0x37   : > { %vm9705_vm13 = vmpackc.low %vm13116_vm7, %vm13115_vm11  ;;  %8476 = vmatpush1.bf16.msk.msra.mxu0 %vm9695_vm0, %v8999_v19  ;;  %vm13128_vm11 = vnez %v13051_v42  ;;  %vm13129_vm7 = vnez %v13055_v43 }
  0x38   : > { %8494 = vmatprep.subr.msk.bf16.mxu0 %vm9163_vm10, %v8999_v19  ;;  %vm13120_vm1 = vmmov %vm13119_vm6  ;;  %vm13123_vm10 = vnez %v13029_v29  ;;  %v594_v29 = vadd.f32 0.5, %v586_v23 }
  0x39   : > { %8492 = vmatpush1.bf16.msk.msra.mxu1 %vm9705_vm13, %v8999_v19 }
  0x3a   : > { %8510 = vmatprep.subr.msk.bf16.mxu1 %vm9189_vm15, %v8999_v19  ;;  %8033 = vmatmul.mubr.msk.f32.vlgmr.msra.gmra.mrb[2].mxu0 %vm13119_vm6, %v9437_v44  ;;  %vm13127_vm15 = vnez %v13047_v41  ;;  %vm13130_vm6 = vnez %v13059_v45  ;;  %v602_v41 = vmul.f32 0.0625, %v594_v29 }
  0x3b   : > { %8496 = vmatpush1.bf16.msk.msra.mxu0 %vm9125_vm2, %v8999_v19  ;;  %996 = vmatprep.mubr.f32.mxu0 %v12873_v1  ;;  %vm13121_vm2 = vnez %v13024_v26  ;;  %v592_v26 = vadd.f32 0.5, %v584_v20 }
  0x3c   : > { %8050 = vmatmul.mubr.msk.f32.vlgmr.msra.gmra.mrb[2].mxu1 %vm13120_vm1, %v9437_v44  ;;  %8498 = vmatprep.subr.msk.bf16.mxu0 %vm9229_vm12, %v8999_v19  ;;  %vm13124_vm12 = vnez %v13034_v34  ;;  %vm13131_vm1 = vnez %v13063_v46 }
  0x3d   : > { %8512 = vmatpush1.bf16.msk.msra.mxu1 %vm9209_vm8, %v8999_v19  ;;  %1067 = vmatprep.mubr.f32.mxu1 %v12873_v1  ;;  %vm13122_vm8 = vnez %v13026_v28  ;;  %v593_v28 = vadd.f32 0.5, %v585_v21 }
  0x3e   : > { %8514 = vmatprep.subr.msk.bf16.mxu1 %vm9246_vm14, %v8999_v19  ;;  %vm13125_vm14 = vnez %v13037_v35 }
  0x3f   : > { %8500 = vmatpush1.bf16.msk.msra.mxu0 %vm9153_vm9, %v8999_v19  ;;  %vm13126_vm9 = vnez %v13043_v38 }
  0x40   : > { %8502 = vmatprep.subr.msk.bf16.mxu0 %vm13122_vm8, %v8999_v19 }
  0x41   : > { %8516 = vmatpush1.bf16.msk.msra.mxu1 %vm13121_vm2, %v8999_v19  ;;  %vm13132_vm2 = vcmask 523264  }
  0x42   : > { %8518 = vmatprep.subr.msk.bf16.mxu1 %vm13123_vm10, %v8999_v19  ;;  %vm13133_vm8 = vmmov %vm13132_vm2  ;;  %vm13134_vm10 = vnez %v13072_v48  ;;  %v610_v48 = vsub.f32 1.0, %v602_v41 }
  0x43   : > { %8504 = vmatpush1.bf16.msk.msra.mxu0 %vm13124_vm12, %v8999_v19  ;;  %vm13135_vm12 = vnez %v13077_v49  ;;  %v618_v49 = vmul.f32 5.0, %v602_v41 }
  0x44   : > { %8506 = vmatprep.subr.msk.bf16.mxu0 %vm13126_vm9, %v8999_v19  ;;  %vm13137_vm9 = vnez %v13083_v51  ;;  %v9860_v51 = vand.u32 15, %v9328_v33 }
  0x45   : > { %8520 = vmatpush1.bf16.msk.msra.mxu1 %vm13125_vm14, %v8999_v19  ;;  %vm13136_vm14 = vnez %v13080_v50  ;;  %v9857_v50 = vand.u32 15, %v9276_v27  ;;  %v626_v58 = vadd.f32 %v618_v49, %v610_v48  ;;  %v1217_v49 = vld [vmem:[%s12819_s1 + $0x8] sm:$0xf] }
  0x46   : > { %8522 = vmatprep.subr.msk.bf16.mxu1 %vm13127_vm15, %v8999_v19  ;;  %vm13139_vm15 = vnez %v13091_v53  ;;  %13151 = vst [vmem:[#allocation25_spill] sm:$0xff] %v9860_v51  ;;  %v590_v59 = vcvt.s32.f32 %v9860_v51 }
  0x47   : > { %8508 = vmatpush1.bf16.msk.msra.mxu0 %vm13128_vm11, %v8999_v19  ;;  %vm13140_vm11 = vnez %v13094_v54  ;;  %13150 = vst [vmem:[#allocation24_spill] sm:$0xff] %v9857_v50  ;;  %v9863_v54 = vand.u32 15, %v9322_v31  ;;  %v589_v32 = vcvt.s32.f32 %v9857_v50 }
  0x48   : > { %8526 = vmatprep.subr.msk.bf16.mxu0 %vm13130_vm6, %v8999_v19  ;;  %vm13142_vm6 = vnez %v13106_v57 }
  0x49   : > { %8524 = vmatpush1.bf16.msk.msra.mxu1 %vm13129_vm7, %v8999_v19  ;;  %vm13141_vm7 = vnez %v13102_v56  ;;  %13152 = vst [vmem:[#allocation26_spill] sm:$0xff] %v9863_v54  ;;  %v588_v56 = vcvt.s32.f32 %v9854_v47  ;;  %v591_v27 = vcvt.s32.f32 %v9863_v54 }
  0x4a   : > { %8542 = vmatprep.subr.msk.bf16.mxu1 %vm13131_vm1, %v8999_v19  ;;  %8067 = vmatmul.mubr.msk.f32.vlgmr.msra.gmra.mrb[4].mxu0 %vm13132_vm2, %v9384_v39  ;;  %vm13144_vm1 = vmmov %vm13132_vm2 }
  0x4b   : > { %8528 = vmatpush1.bf16.msk.msra.mxu0 %vm9489_vm5, %v8999_v19  ;;  %1138 = vmatprep.mubr.f32.mxu0 %v12873_v1  ;;  %vm13138_vm5 = vnez %v13087_v52  ;;  %v596_v33 = vadd.f32 0.5, %v588_v56  ;;  %v599_v29 = vadd.f32 0.5, %v591_v27 }
  0x4c   : > { %8084 = vmatmul.mubr.msk.f32.vlgmr.msra.gmra.mrb[4].mxu1 %vm13133_vm8, %v9384_v39  ;;  %8530 = vmatprep.subr.msk.bf16.mxu0 %vm13135_vm12, %v8999_v19 }
  0x4d   : > { %8544 = vmatpush1.bf16.msk.msra.mxu1 %vm13134_vm10, %v8999_v19  ;;  %1209 = vmatprep.mubr.f32.mxu1 %v12873_v1 }
  0x4e   : > { %8546 = vmatprep.subr.msk.bf16.mxu1 %vm13136_vm14, %v8999_v19 }
  0x4f   : > { %8532 = vmatpush1.bf16.msk.msra.mxu0 %vm13137_vm9, %v8999_v19 }
  0x50   : > { %8534 = vmatprep.subr.msk.bf16.mxu0 %vm13139_vm15, %v8999_v19 }
  0x51   : > { %8548 = vmatpush1.bf16.msk.msra.mxu1 %vm13138_vm5, %v8999_v19 }
  0x52   : > { %8550 = vmatprep.subr.msk.bf16.mxu1 %vm13140_vm11, %v8999_v19 }
  0x53   : > { %8536 = vmatpush1.bf16.msk.msra.mxu0 %vm9631_vm4, %v8999_v19  ;;  %vm13143_vm4 = vmmov %vm13132_vm2 }
  0x54   : > { %8538 = vmatprep.subr.msk.bf16.mxu0 %vm13142_vm6, %v8999_v19 }
  0x55   : > { %8552 = vmatpush1.bf16.msk.msra.mxu1 %vm13141_vm7, %v8999_v19 }
  0x56   : > { %8554 = vmatprep.subr.msk.bf16.mxu1 %vm9682_vm3, %v8999_v19  ;;  %vm12991_vm3 = vcmask 23552  }
  0x57   : > { %8540 = vmatpush1.bf16.msk.msra.mxu0 %vm9695_vm0, %v8999_v19 }
  0x59   : > { %8556 = vmatpush1.bf16.msk.msra.mxu1 %vm9705_vm13, %v8999_v19  ;;  %v9839_v19 = vand.u32 15, %v9091_v6  ;;  %v600_v6 = vmul.f32 0.0625, %v592_v26  ;;  %v598_v26 = vadd.f32 0.5, %v590_v59  ;;  %vm12992_vm13 = vcmask 1042432  }
  0x5a   : > { %8101 = vmatmul.mubr.msk.f32.vlgmr.msra.gmra.mrb[6].mxu0 %vm13143_vm4, %v9384_v39 }
  0x5b   : > { %1314 = vmatprep.mubr.f32.mxu0 %v12873_v1  ;;  %13148 = vst [vmem:[#allocation22_spill] sm:$0xff] %v9839_v19  ;;  %v587_v24 = vcvt.s32.f32 %v9839_v19  ;;  %v608_v43 = vsub.f32 1.0, %v600_v6  ;;  %v616_v44 = vmul.f32 5.0, %v600_v6 }
  0x5c   : > { %8118 = vmatmul.mubr.msk.f32.vlgmr.msra.gmra.mrb[6].mxu1 %vm13144_vm1, %v9384_v39  ;;  %v601_v39 = vmul.f32 0.0625, %v593_v28 }
  0x5d   : > { %1391 = vmatprep.mubr.f32.mxu1 %v12873_v1  ;;  %v595_v4 = vadd.f32 0.5, %v587_v24  ;;  %v624_v55 = vadd.f32 %v616_v44, %v608_v43  ;;  %v597_v24 = vadd.f32 0.5, %v589_v32  ;;  %v604_v44 = vmul.f32 0.0625, %v596_v33 }
  0x5e   : > { %v609_v45 = vsub.f32 1.0, %v601_v39  ;;  %v617_v46 = vmul.f32 5.0, %v601_v39 }
  0x5f   : > { %v603_v42 = vmul.f32 0.0625, %v595_v4  ;;  %v620_v48 = vmul.f32 5.0, %v604_v44 }
  0x60   : > { %v625_v57 = vadd.f32 %v617_v46, %v609_v45  ;;  %v607_v45 = vmul.f32 0.0625, %v599_v29  ;;  %v612_v46 = vsub.f32 1.0, %v604_v44 }
  0x61   : > { %v611_v52 = vsub.f32 1.0, %v603_v42  ;;  %v619_v53 = vmul.f32 5.0, %v603_v42 }
  0x62   : > { %v628_v32 = vadd.f32 %v620_v48, %v612_v46 }
  0x63   : > { %v627_v60 = vadd.f32 %v619_v53, %v611_v52 }
  0xfd   : > { %v704_v61 = vpop.f32.mrb[0].mxu0 }
  0xfe   : > { %v706_v62 = vpop.f32.mrb[1].mxu0  ;;  %v922_v20 = vmul.f32 %v704_v61, %v624_v55 }
  0xff   : > { %v775_v63 = vpop.f32.mrb[0].mxu1  ;;  %v923_v21 = vmul.f32 %v706_v62, %v625_v57  ;;  %v1216_v62 = vld [vmem:[%s12819_s1] sm:$0xff]  ;;  %v615_v57 = vsub.f32 1.0, %v607_v45 }
 0x100   : > { %v777_v0 = vpop.f32.mrb[1].mxu1  ;;  %v924_v23 = vmul.f32 %v775_v63, %v626_v58  ;;  %v605_v63 = vmul.f32 0.0625, %v597_v24  ;;  %v623_v58 = vmul.f32 5.0, %v607_v45 }
 0x101   : > { %v925_v28 = vmul.f32 %v777_v0, %v627_v60  ;;  %v606_v0 = vmul.f32 0.0625, %v598_v26 }
 0x102   : > { %v613_v52 = vsub.f32 1.0, %v605_v63  ;;  %v621_v53 = vmul.f32 5.0, %v605_v63  ;;  %v631_v27 = vadd.f32 %v623_v58, %v615_v57 }
 0x103   : > { %v614_v55 = vsub.f32 1.0, %v606_v0  ;;  %v622_v56 = vmul.f32 5.0, %v606_v0 }
 0x104   : > { %v629_v59 = vadd.f32 %v621_v53, %v613_v52 }
 0x105   : > { %v630_v60 = vadd.f32 %v622_v56, %v614_v55 }
 0x10d   : > { %v9845_v34 = vpop.f32.mrb[2].mxu0 }
 0x10e   : > { %v9847_v35 = vpop.f32.mrb[3].mxu0 }
 0x10f   : > { %v9849_v8 = vpop.f32.mrb[2].mxu1  ;;  %v927_v33 = vmul.f32 %v9847_v35, %v629_v59 }
 0x110   : > { %v9851_v38 = vpop.f32.mrb[3].mxu1 }
 0x111   : > { %v929_v24 = vmul.f32 %v9851_v38, %v631_v27 }
 0x11d   : > { %v998_v31 = vpop.f32.mrb[4].mxu0 }
 0x11e   : > { %v9869_v4 = vadd.f32 %v998_v31, %v922_v20  ;;  %v1000_v39 = vpop.f32.mrb[5].mxu0  ;;  %v926_v20 = vmul.f32 %v9845_v34, %v628_v32 }
 0x11f   : > { %v1069_v6 = vpop.f32.mrb[4].mxu1  ;;  %v9873_v42 = vadd.f32 %v1000_v39, %v923_v21  ;;  %v928_v21 = vmul.f32 %v9849_v8, %v630_v60 }
 0x120   : > { %13153 = vst [vmem:[#allocation27_spill] sm:$0xff] %v9869_v4  ;;  %v9871_v41 = vadd.f32 %v1069_v6, %v924_v23  ;;  %v1071_v43 = vpop.f32.mrb[5].mxu1 }
 0x121   : > { %13155 = vst [vmem:[#allocation29_spill] sm:$0xff] %v9873_v42  ;;  %v9875_v61 = vadd.f32 %v1071_v43, %v925_v28  ;;  %8119 = vmatprep.subr.msk.mxu0 %vm12992_vm13, %v9873_v42 }
 0x122   : > { %13154 = vst [vmem:[#allocation28_spill] sm:$0xff] %v9871_v41  ;;  %8120 = vmatpush1.msk.msra.mxu0 %vm12992_vm13, %v9869_v4 }
 0x123   : > { %13156 = vst [vmem:[#allocation30_spill] sm:$0xff] %v9875_v61  ;;  %8123 = vmatprep.subr.msk.mxu1 %vm12992_vm13, %v9875_v61  ;;  %8121 = vmatmul.mubr.msk.f32.vlgmr.msra.gmra.mrb[8].mxu0 %vm12991_vm3, %v1216_v62 }
 0x124   : > { %8124 = vmatpush1.msk.msra.mxu1 %vm12992_vm13, %v9871_v41  ;;  %1320 = vmatprep.mubr.f32.mxu0 %v12873_v1 }
 0x125   : > { %8125 = vmatmul.mubr.msk.f32.vlgmr.msra.gmra.mrb[8].mxu1 %vm12991_vm3, %v1216_v62 }
 0x126   : > { %1397 = vmatprep.mubr.f32.mxu1 %v12873_v1 }
 0x127   : > { %8122 = vmatmul.mubr.msk.f32.gmra.mrb[10].mxu0 %vm12991_vm3, %v1217_v49 }
 0x128   : > { %1468 = vmatprep.mubr.f32.mxu0 %v12873_v1 }
 0x129   : > { %8126 = vmatmul.mubr.msk.f32.gmra.mrb[10].mxu1 %vm12991_vm3, %v1217_v49 }
 0x12a   : > { %1545 = vmatprep.mubr.f32.mxu1 %v12873_v1 }
 0x12d   : > { %v1140_v23 = vpop.f32.mrb[6].mxu0 }
 0x12e   : > { %v9903_v26 = vadd.f32 %v1140_v23, %v926_v20  ;;  %v1142_v28 = vpop.f32.mrb[7].mxu0 }
 0x12f   : > { %v1211_v31 = vpop.f32.mrb[6].mxu1  ;;  %v9907_v6 = vadd.f32 %v1142_v28, %v927_v33 }
 0x130   : > { %13157 = vst [vmem:[#allocation31_spill] sm:$0xff] %v9903_v26  ;;  %v9905_v29 = vadd.f32 %v1211_v31, %v928_v21  ;;  %v1213_v39 = vpop.f32.mrb[7].mxu1 }
 0x131   : > { %13159 = vst [vmem:[#allocation33_spill] sm:$0xff] %v9907_v6  ;;  %v9909_v43 = vadd.f32 %v1213_v39, %v929_v24  ;;  %8127 = vmatprep.subr.msk.mxu0 %vm12992_vm13, %v9907_v6 }
 0x132   : > { %13158 = vst [vmem:[#allocation32_spill] sm:$0xff] %v9905_v29  ;;  %8128 = vmatpush1.msk.msra.mxu0 %vm12992_vm13, %v9903_v26 }
 0x133   : > { %13160 = vst [vmem:[#allocation34_spill] sm:$0xff] %v9909_v43  ;;  %8131 = vmatprep.subr.msk.mxu1 %vm12992_vm13, %v9909_v43  ;;  %8129 = vmatmul.mubr.msk.f32.vlgmr.msra.gmra.mrb[12].mxu0 %vm12991_vm3, %v1216_v62 }
 0x134   : > { %8132 = vmatpush1.msk.msra.mxu1 %vm12992_vm13, %v9905_v29  ;;  %1474 = vmatprep.mubr.f32.mxu0 %v12873_v1  ;;  %vm4891_vm13 = vcmask 1043456  }
 0x135   : > { %8133 = vmatmul.mubr.msk.f32.vlgmr.msra.gmra.mrb[12].mxu1 %vm12991_vm3, %v1216_v62 }
 0x136   : > { %1551 = vmatprep.mubr.f32.mxu1 %v12873_v1 }
 0x137   : > { %8130 = vmatmul.mubr.msk.f32.gmra.mrb[14].mxu0 %vm12991_vm3, %v1217_v49 }
 0x138   : > { %4980 = vmatprep.mubr.f32.mxu0 %v12873_v1 }
 0x139   : > { %8134 = vmatmul.mubr.msk.f32.gmra.mrb[14].mxu1 %vm12991_vm3, %v1217_v49 }
 0x13a   : > { %5069 = vmatprep.mubr.f32.mxu1 %v12873_v1 }
 0x1f6   : > { %v9927_v34 = vpop.f32.mrb[8].mxu0 }
 0x1f7   : > { %v12876_v35 = vand.u32 2147483647, %v9927_v34  ;;  %v1561_v8 = vand.u32 2139095040, %v9927_v34  ;;  %v9933_v44 = vpop.f32.mrb[9].mxu0 }
 0x1f8   : > { %v9931_v38 = vpop.f32.mrb[8].mxu1  ;;  %v1665_v52 = vand.u32 2139095040, %v9933_v44 }
 0x1f9   : > { %v12875_v62 = vand.u32 2147483647, %v9931_v38  ;;  %v1769_v63 = vand.u32 2139095040, %v9931_v38  ;;  %v9937_v0 = vpop.f32.mrb[9].mxu1  ;;  %v1562_v45 = vshrl.u32 %v1561_v8, 23 }
 0x1fa   : > { %13161 = vst [vmem:[#allocation35_spill] sm:$0xff] %v9937_v0  ;;  %v1565_v46 = vand.u32 8388607, %v12876_v35  ;;  %v9944_v55 = vpop.f32.mrb[10].mxu0  ;;  %v1666_v58 = vshrl.u32 %v1665_v52, 23 }
 0x1fb   : > { %v1770_v48 = vshrl.u32 %v1769_v63, 23  ;;  %v1773_v49 = vand.u32 8388607, %v12875_v62  ;;  %v8135_v53 = vadd.s32 4294967169, %v1562_v45  ;;  %v9948_v32 = vpop.f32.mrb[11].mxu0 }
 0x1fc   : > { %v9946_v56 = vpop.f32.mrb[10].mxu1  ;;  %v1566_v60 = vor.u32 8388608, %v1565_v46  ;;  %v8139_v33 = vadd.s32 4294967169, %v1666_v58 }
 0x1fd   : > { %v8143_v57 = vadd.s32 4294967169, %v1770_v48  ;;  %v1568_v59 = vadd.s32 1, %v8135_v53  ;;  %v1774_v27 = vor.u32 8388608, %v1773_v49  ;;  %v9950_v21 = vpop.f32.mrb[11].mxu1  ;;  %v12905_v48 = vmov 683565275  }
 0x1fe   : > { %v9952_v39 = vshll.u32 %v1566_v60, 8  ;;  %v9957_v45 = vadd.s32 1, %v8139_v33 }
 0x1ff   : > { %v1776_v20 = vadd.s32 1, %v8143_v57  ;;  %vm1569_vm0 = vcmp.gt.s32.totalorder %v1568_v59, 0  ;;  %v9954_v8 = vshll.u32 %v1774_v27, 8  ;;  %v12895_v57 = vmov 2475754826  }
 0x200   : > { %v1570_v23 = vsel %vm1569_vm0, %v1568_v59, 0  ;;  %v12891_v59 = vmov 2131351028   ;;  %vm1673_vm9 = vcmp.gt.s32.totalorder %v9957_v45, 0 }
 0x201   : > { %vm1777_vm2 = vcmp.gt.s32.totalorder %v1776_v20, 0  ;;  %v1571_v24 = vshrl.u32 %v1570_v23, 5  ;;  %v1572_v31 = vand.u32 31, %v1570_v23  ;;  %v12899_v23 = vmov 920167782  }
 0x202   : > { %v1778_v28 = vsel %vm1777_vm2, %v1776_v20, 0  ;;  %v12893_v20 = vmov 2102212464  }
 0x203   : > { %v1573_v46 = vsub.s32 32, %v1572_v31  ;;  %v1575_v49 = vshll.u32 %v12905_v48, %v1572_v31  ;;  %v9960_v52 = vshrl.u32 %v1778_v28, 5  ;;  %v1780_v53 = vand.u32 31, %v1778_v28 }
 0x204   : > { %v1578_v58 = vshll.u32 %v12895_v57, %v1572_v31  ;;  %v1581_v60 = vshll.u32 %v12891_v59, %v1572_v31  ;;  %v1584_v27 = vshll.u32 %v12893_v20, %v1572_v31  ;;  %v1587_v33 = vshll.u32 %v12899_v23, %v1572_v31 }
 0x205   : > { %v1576_v1 = vshrl.u32 %v12895_v57, %v1573_v46  ;;  %v1579_v62 = vshrl.u32 %v12891_v59, %v1573_v46  ;;  %v1582_v35 = vshrl.u32 %v12893_v20, %v1573_v46  ;;  %vm1590_vm8 = vcmp.lt.s32.totalorder %v1571_v24, 1 }
 0x206   : > { %v1574_v28 = vshrl.u32 %v12905_v48, %v1573_v46  ;;  %v1585_v63 = vshrl.u32 %v12899_v23, %v1573_v46  ;;  %v1588_v15 = vshrl.u32 %v12903_v40, %v1573_v46  ;;  %vm1592_vm10 = vcmp.lt.s32.totalorder %v1571_v24, 3 }
 0x207   : > { %v1577_v36 = vor.u32 %v1576_v1, %v1575_v49  ;;  %v1580_v13 = vor.u32 %v1579_v62, %v1578_v58  ;;  %v1583_v25 = vor.u32 %v1582_v35, %v1581_v60  ;;  %v1781_v22 = vsub.s32 32, %v1780_v53 }
 0x208   : > { %v1586_v31 = vor.u32 %v1585_v63, %v1584_v27  ;;  %v1589_v16 = vor.u32 %v1588_v15, %v1587_v33  ;;  %vm1593_vm12 = vcmp.lt.s32.totalorder %v1571_v24, 4  ;;  %v1783_v59 = vshll.u32 %v12905_v48, %v1780_v53 }
 0x209   : > { %v1594_v20 = vsel %vm1590_vm8, %v1574_v28, %v1577_v36  ;;  %v1595_v57 = vsel %vm1593_vm12, %v1583_v25, 2102212464  ;;  %v1598_v11 = vsel %vm1590_vm8, %v1577_v36, %v1580_v13  ;;  %v1602_v23 = vsel %vm1590_vm8, %v1580_v13, %v1583_v25 }
 0x20a   : > { %v1596_v10 = vsel %vm1592_vm10, %v1580_v13, %v1595_v57  ;;  %v1599_v46 = vsel %vm1593_vm12, %v1586_v31, 920167782  ;;  %v1603_v40 = vsel %vm1593_vm12, %v1589_v16, 1326507024  ;;  %v13162_v1 = vmov 2475754826  }
 0x20b   : > { %v1786_v62 = vshll.u32 %v13162_v1, %v1780_v53  ;;  %vm1591_vm14 = vcmp.lt.s32.totalorder %v1571_v24, 2  ;;  %v1600_v35 = vsel %vm1592_vm10, %v1583_v25, %v1599_v46  ;;  %v1604_v15 = vsel %vm1592_vm10, %v1586_v31, %v1603_v40 }
 0x20c   : > { %v1784_v63 = vshrl.u32 %v13162_v1, %v1781_v22  ;;  %v1597_v49 = vsel %vm1591_vm14, %v1594_v20, %v1596_v10  ;;  %v1601_v58 = vsel %vm1591_vm14, %v1598_v11, %v1600_v35  ;;  %v1605_v60 = vsel %vm1591_vm14, %v1602_v23, %v1604_v15 }
 0x20d   : > { %v13163_v27 = vmov 2131351028   ;;  %v9983_v33 = vmul.u32.u64.low %v9952_v39, %v1605_v60  ;;  %v9984_v28 = vmul.u32.u64.high %v9952_v39, %v1605_v60, %v9983_v33  ;;  %v13164_v24 = vmov 2102212464  }
 0x20e   : > { %v1787_v36 = vshrl.u32 %v13163_v27, %v1781_v22  ;;  %v9987_v13 = vmul.u32.u64.low %v9952_v39, %v1601_v58  ;;  %v9988_v16 = vmul.u32.u64.high %v9952_v39, %v1601_v58, %v9987_v13  ;;  %v1785_v57 = vor.u32 %v1784_v63, %v1783_v59 }
 0x20f   : > { %v1789_v40 = vshll.u32 %v13163_v27, %v1780_v53  ;;  %v1790_v31 = vshrl.u32 %v13164_v24, %v1781_v22  ;;  %v1792_v10 = vshll.u32 %v13164_v24, %v1780_v53  ;;  %v13165_v11 = vmov 920167782  }
 0x210   : > { %v1788_v25 = vor.u32 %v1787_v36, %v1786_v62  ;;  %v1793_v20 = vshrl.u32 %v13165_v11, %v1781_v22  ;;  %v1795_v23 = vshll.u32 %v13165_v11, %v1780_v53  ;;  %v13166_v46 = vmov 1326507024  }
 0x211   : > { %v1796_v35 = vshrl.u32 %v13166_v46, %v1781_v22  ;;  %v1613_v15 = vmul.u32 %v9952_v39, %v1597_v49  ;;  %v1782_v58 = vshrl.u32 %v12905_v48, %v1781_v22  ;;  %v1791_v60 = vor.u32 %v1790_v31, %v1789_v40 }
 0x212   : > { %vm1615_vm5 = vc.u32 %v9984_v28, %v9987_v13  ;;  %v1616_v59 = vadd.s32 1, %v9988_v16  ;;  %v1794_v62 = vor.u32 %v1793_v20, %v1792_v10  ;;  %vm1798_vm15 = vcmp.lt.s32.totalorder %v9960_v52, 1 }
 0x213   : > { %v1797_v63 = vor.u32 %v1796_v35, %v1795_v23  ;;  %vm1800_vm11 = vcmp.lt.s32.totalorder %v9960_v52, 3  ;;  %vm1801_vm7 = vcmp.lt.s32.totalorder %v9960_v52, 4  ;;  %v1806_v53 = vsel %vm1798_vm15, %v1785_v57, %v1788_v25 }
 0x214   : > { %v1617_v39 = vsel %vm1615_vm5, %v1616_v59, %v9988_v16  ;;  %v1803_v22 = vsel %vm1801_vm7, %v1791_v60, 2102212464  ;;  %v1807_v49 = vsel %vm1801_vm7, %v1794_v62, 920167782  ;;  %v1810_v36 = vsel %vm1798_vm15, %v1788_v25, %v1791_v60 }
 0x215   : > { %v1618_v33 = vadd.s32 %v1617_v39, %v1613_v15  ;;  %vm1799_vm6 = vcmp.lt.s32.totalorder %v9960_v52, 2  ;;  %v1808_v40 = vsel %vm1800_vm11, %v1791_v60, %v1807_v49  ;;  %v1811_v31 = vsel %vm1801_vm7, %v1797_v63, 1326507024 }
 0x216   : > { %v1802_v48 = vsel %vm1798_vm15, %v1782_v58, %v1785_v57  ;;  %v1804_v10 = vsel %vm1800_vm11, %v1788_v25, %v1803_v22  ;;  %v1809_v20 = vsel %vm1799_vm6, %v1806_v53, %v1808_v40  ;;  %v1812_v9 = vsel %vm1800_vm11, %v1794_v62, %v1811_v31 }
 0x217   : > { %v1619_v23 = vadd.s32 536870912, %v1618_v33  ;;  %v1813_v35 = vsel %vm1799_vm6, %v1810_v36, %v1812_v9  ;;  %v10009_v5 = vmul.u32.u64.low %v9954_v8, %v1809_v20  ;;  %v10010_v37 = vmul.u32.u64.high %v9954_v8, %v1809_v20, %v10009_v5 }
 0x218   : > { %v10014_v16 = vmul.u32.u64.low %v9954_v8, %v1813_v35  ;;  %v10015_v59 = vmul.u32.u64.high %v9954_v8, %v1813_v35, %v10014_v16  ;;  %v1674_v52 = vsel %vm1673_vm9, %v9957_v45, 0  ;;  %v1805_v57 = vsel %vm1799_vm6, %v1802_v48, %v1804_v10 }
 0x219   : > { %v10020_v15 = vshrl.u32 %v1619_v23, 30  ;;  %v13167_v25 = vand.u32 2147483647, %v9933_v44  ;;  %v1824_v60 = vadd.s32 1, %v10010_v37  ;;  %v1676_v62 = vand.u32 31, %v1674_v52 }
 0x21a   : > { %v1821_v63 = vmul.u32 %v9954_v8, %v1805_v57  ;;  %vm1823_vm4 = vc.u32 %v10015_v59, %v10009_v5  ;;  %v1873_v36 = vand.u32 2139095040, %v9937_v0  ;;  %v10038_v16 = vshrl.u32 %v1674_v52, 5 }
 0x21b   : > { %v1669_v58 = vand.u32 8388607, %v13167_v25  ;;  %v1621_v9 = vshll.u32 %v10020_v15, 30  ;;  %v1825_v39 = vsel %vm1823_vm4, %v1824_v60, %v10010_v37  ;;  %v1677_v48 = vsub.s32 32, %v1676_v62 }
 0x21c   : > { %v1826_v45 = vadd.s32 %v1825_v39, %v1821_v63  ;;  %v13168_v57 = vmov 683565275   ;;  %v1682_v60 = vshll.u32 %v13162_v1, %v1676_v62  ;;  %v1688_v39 = vshll.u32 %v13164_v24, %v1676_v62 }
 0x21d   : > { %v1622_v53 = vsub.s32 %v1618_v33, %v1621_v9  ;;  %v1670_v22 = vor.u32 8388608, %v1669_v58  ;;  %v1680_v8 = vshrl.u32 %v13162_v1, %v1677_v48  ;;  %v1683_v35 = vshrl.u32 %v13163_v27, %v1677_v48 }
 0x21e   : > { %v1827_v40 = vadd.s32 536870912, %v1826_v45  ;;  %v1874_v33 = vshrl.u32 %v1873_v36, 23  ;;  %v1679_v25 = vshll.u32 %v13168_v57, %v1676_v62  ;;  %v1689_v58 = vshrl.u32 %v13165_v11, %v1677_v48 }
 0x21f   : > { %v1624_v49 = vsub.s32 0, %v1622_v53  ;;  %v10033_v20 = vshll.u32 %v1670_v22, 8  ;;  %v1686_v63 = vshrl.u32 %v13164_v24, %v1677_v48  ;;  %v1614_v22 = vadd.s32 %v9987_v13, %v9984_v28 }
 0x220   : > { %v10031_v10 = vshrl.u32 %v1827_v40, 30  ;;  %v1685_v36 = vshll.u32 %v13163_v27, %v1676_v62  ;;  %v1692_v52 = vshrl.u32 %v13166_v46, %v1677_v48  ;;  %v10051_v40 = vpop.f32.mrb[12].mxu0  ;;  %v1690_v7 = vor.u32 %v1689_v58, %v1688_v39 }
 0x221   : > { %v8136_v31 = vmin.u32 %v1624_v49, %v1622_v53  ;;  %v1691_v12 = vshll.u32 %v13165_v11, %v1676_v62  ;;  %v8147_v54 = vadd.s32 4294967169, %v1874_v33  ;;  %vm1694_vm0 = vcmp.lt.s32.totalorder %v10038_v16, 1 }
 0x222   : > { %v1829_v37 = vshll.u32 %v10031_v10, 30  ;;  %v1687_v13 = vor.u32 %v1686_v63, %v1685_v36  ;;  %vm1697_vm2 = vcmp.lt.s32.totalorder %v10038_v16, 4  ;;  %v1678_v58 = vshrl.u32 %v13168_v57, %v1677_v48 }
 0x223   : > { %v1626_v23 = vclz %v8136_v31  ;;  %v1681_v31 = vor.u32 %v1680_v8, %v1679_v25  ;;  %v1693_v51 = vor.u32 %v1692_v52, %v1691_v12  ;;  %v1703_v62 = vsel %vm1697_vm2, %v1690_v7, 920167782 }
 0x224   : > { %v10047_v49 = vsub.s32 %v1826_v45, %v1829_v37  ;;  %vm1695_vm8 = vcmp.lt.s32.totalorder %v10038_v16, 2  ;;  %vm1696_vm10 = vcmp.lt.s32.totalorder %v10038_v16, 3  ;;  %v1880_v36 = vadd.s32 1, %v8147_v54 }
 0x225   : > { %v8137_v9 = vadd.s32 4294967294, %v1626_v23  ;;  %v1684_v23 = vor.u32 %v1683_v35, %v1682_v60  ;;  %v1704_v12 = vsel %vm1696_vm10, %v1687_v13, %v1703_v62  ;;  %v1707_v48 = vsel %vm1697_vm2, %v1693_v51, 1326507024 }
 0x226   : > { %v1832_v3 = vsub.s32 0, %v10047_v49  ;;  %vm1881_vm14 = vcmp.gt.s32.totalorder %v1880_v36, 0  ;;  %v1698_v62 = vsel %vm1694_vm0, %v1678_v58, %v1681_v31  ;;  %vm1560_vm9 = vcmp.lt.s32.totalorder %v9927_v34, 0 }
 0x227   : > { %vm8138_vm1 = vcmp.lt.s32.totalorder %v8137_v9, 0  ;;  %v1702_v25 = vsel %vm1694_vm0, %v1681_v31, %v1684_v23  ;;  %v13170_v58 = vand.u32 2147483647, %v9927_v34  ;;  %vm1768_vm11 = vcmp.lt.s32.totalorder %v9931_v38, 0 }
 0x228   : > { %v1629_v30 = vsel %vm8138_vm1, 0, %v8137_v9  ;;  %v8144_v37 = vmin.u32 %v1832_v3, %v10047_v49  ;;  %v1699_v9 = vsel %vm1697_vm2, %v1687_v13, 2102212464  ;;  %v1705_v60 = vsel %vm1695_vm8, %v1702_v25, %v1704_v12 }
 0x229   : > { %v1630_v14 = vsub.s32 32, %v1629_v30  ;;  %v1634_v28 = vsub.s32 4294967266, %v1629_v30  ;;  %v1631_v45 = vshll.u32 %v1622_v53, %v1629_v30  ;;  %v1644_v12 = vsub.s32 4, %v10020_v15 }
 0x22a   : > { %v1834_v33 = vclz %v8144_v37  ;;  %vm10106_vm15 = vcmp.le.f32.partialorder %v13170_v58, 0.7853982  ;;  %v1852_v58 = vsub.s32 4, %v10031_v10 }
 0x22b   : > { %v1632_v8 = vshrl.u32 %v1614_v22, %v1630_v14  ;;  %v1635_v35 = vadd.s32 127, %v1634_v28  ;;  %v1706_v14 = vsel %vm1694_vm0, %v1684_v23, %v1687_v13  ;;  %v1708_v22 = vsel %vm1696_vm10, %v1690_v7, %v1707_v48 }
 0x22c   : > { %v8145_v53 = vadd.s32 4294967294, %v1834_v33  ;;  %v1709_v52 = vsel %vm1695_vm8, %v1706_v14, %v1708_v22  ;;  %v1700_v33 = vsel %vm1696_vm10, %v1684_v23, %v1699_v9  ;;  %v1645_v22 = vsel %vm1560_vm9, %v1644_v12, %v10020_v15 }
 0x22d   : > { %v1633_v30 = vor.u32 %v1632_v8, %v1631_v45  ;;  %v1636_v3 = vshll.u32 %v1635_v35, 23  ;;  %v10080_v28 = vmul.u32.u64.low %v10033_v20, %v1705_v60  ;;  %v10081_v45 = vmul.u32.u64.high %v10033_v20, %v1705_v60, %v10080_v28 }
 0x22e   : > { %vm8146_vm12 = vcmp.lt.s32.totalorder %v8145_v53, 0  ;;  %v10085_v8 = vmul.u32.u64.low %v10033_v20, %v1709_v52  ;;  %v10086_v51 = vmul.u32.u64.high %v10033_v20, %v1709_v52, %v10085_v8  ;;  %v1822_v35 = vadd.s32 %v10009_v5, %v10015_v59 }
 0x22f   : > { %v1637_v63 = vor.u32 4788187, %v1636_v3  ;;  %v1640_v39 = vcvt.s32.f32 %v1633_v30  ;;  %v1837_v37 = vsel %vm8146_vm12, 0, %v8145_v53  ;;  %v1882_v30 = vsel %vm1881_vm14, %v1880_v36, 0  ;;  %v10094_v3 = vpop.f32.mrb[12].mxu1 }
 0x230   : > { %v1838_v7 = vsub.s32 32, %v1837_v37  ;;  %v1842_v54 = vsub.s32 4294967266, %v1837_v37  ;;  %13169 = vst [vmem:[#allocation36_spill] sm:$0xff] %v10094_v3  ;;  %v1839_v14 = vshll.u32 %v10047_v49, %v1837_v37  ;;  %v1720_v59 = vadd.s32 1, %v10081_v45 }
 0x231   : > { %v1638_v13 = vand.u32 2147483647, %v1637_v63  ;;  %v1884_v48 = vand.u32 31, %v1882_v30  ;;  %v1701_v23 = vsel %vm1695_vm8, %v1698_v62, %v1700_v33  ;;  %vm1719_vm5 = vc.u32 %v10086_v51, %v10080_v28 }
 0x232   : > { %v1840_v53 = vshrl.u32 %v1822_v35, %v1838_v7  ;;  %v1843_v60 = vadd.s32 127, %v1842_v54  ;;  %v12927_v52 = vand.u32 2147483647, %v9937_v0  ;;  %v1721_v37 = vsel %vm1719_vm5, %v1720_v59, %v10081_v45 }
 0x233   : > { %v1641_v25 = vmul.f32 %v1640_v39, %v1638_v13  ;;  %v10110_v39 = vsub.s32 32, %v1884_v48  ;;  %v1717_v13 = vmul.u32 %v10033_v20, %v1701_v23  ;;  %v1887_v8 = vshll.u32 %v13168_v57, %v1884_v48 }
 0x234   : > { %v1841_v63 = vor.u32 %v1840_v53, %v1839_v14  ;;  %v1844_v31 = vshll.u32 %v1843_v60, 23  ;;  %v1890_v54 = vshll.u32 %v13162_v1, %v1884_v48  ;;  %v1893_v62 = vshll.u32 %v13163_v27, %v1884_v48 }
 0x235   : > { %v1642_v5 = vxor.u32 2147483648, %v1641_v25  ;;  %v1888_v15 = vshrl.u32 %v13162_v1, %v10110_v39  ;;  %v1896_v33 = vshll.u32 %v13164_v24, %v1884_v48  ;;  %v1894_v45 = vshrl.u32 %v13164_v24, %v10110_v39 }
 0x236   : > { %v1845_v16 = vor.u32 4788187, %v1844_v31  ;;  %v1848_v7 = vcvt.s32.f32 %v1841_v63  ;;  %v1897_v12 = vshrl.u32 %v13165_v11, %v10110_v39  ;;  %v1899_v14 = vshll.u32 %v13165_v11, %v1884_v48 }
 0x237   : > { %v1643_v9 = vsel %vm1560_vm9, %v1642_v5, %v1641_v25  ;;  %v1891_v25 = vshrl.u32 %v13163_v27, %v10110_v39  ;;  %v1722_v53 = vadd.s32 %v1721_v37, %v1717_v13  ;;  %v10132_v60 = vshrl.u32 %v1882_v30, 5 }
 0x238   : > { %v1646_v36 = vsel %vm10106_vm15, %v9927_v34, %v1643_v9  ;;  %v1846_v35 = vand.u32 2147483647, %v1845_v16  ;;  %v1900_v5 = vshrl.u32 %v13166_v46, %v10110_v39  ;;  %v10138_v59 = vsel %vm10106_vm15, 0, %v1645_v22 }
 0x239   : > { %8862 = vcosq.f32 %v1646_v36  ;;  %v1877_v31 = vand.u32 8388607, %v12927_v52  ;;  %v1898_v23 = vor.u32 %v1897_v12, %v1896_v33  ;;  %v1889_v48 = vor.u32 %v1888_v15, %v1887_v8 }
 0x23a   : > { %8864 = vsinq.f32 %v1646_v36  ;;  %v1849_v20 = vmul.f32 %v1848_v7, %v1846_v35  ;;  %v1892_v9 = vor.u32 %v1891_v25, %v1890_v54  ;;  %v13173_v30 = vand.u32 2147483647, %v9931_v38 }
 0x23b   : > { %v1895_v22 = vor.u32 %v1894_v45, %v1893_v62  ;;  %v1901_v16 = vor.u32 %v1900_v5, %v1899_v14  ;;  %v3315_v13 = vand.u32 3, %v10138_v59  ;;  %v1723_v35 = vadd.s32 536870912, %v1722_v53 }
 0x23c   : > { %v1850_v63 = vxor.u32 2147483648, %v1849_v20  ;;  %vm10146_vm7 = vcmp.le.f32.partialorder %v13173_v30, 0.7853982  ;;  %vm1905_vm6 = vcmp.lt.s32.totalorder %v10132_v60, 4  ;;  %v1878_v8 = vor.u32 8388608, %v1877_v31 }
 0x23d   : > { %vm1902_vm4 = vcmp.lt.s32.totalorder %v10132_v60, 1  ;;  %v1911_v7 = vsel %vm1905_vm6, %v1898_v23, 920167782  ;;  %v1853_v15 = vsel %vm1768_vm11, %v1852_v58, %v10031_v10  ;;  %vm1904_vm1 = vcmp.lt.s32.totalorder %v10132_v60, 3 }
 0x23e   : > { %v1851_v49 = vsel %vm1768_vm11, %v1850_v63, %v1849_v20  ;;  %v1910_v25 = vsel %vm1902_vm4, %v1889_v48, %v1892_v9  ;;  %v1912_v20 = vsel %vm1904_vm1, %v1895_v22, %v1911_v7  ;;  %v1914_v45 = vsel %vm1902_vm4, %v1892_v9, %v1895_v22 }
 0x23f   : > { %v1854_v37 = vsel %vm10146_vm7, %v9931_v38, %v1851_v49  ;;  %v1915_v12 = vsel %vm1905_vm6, %v1901_v16, 1326507024  ;;  %vm3320_vm0 = vcmp.eq.s32.totalorder %v3315_v13, 2  ;;  %v10178_v14 = vshrl.u32 %v1723_v35, 30 }
 0x240   : > { %8866 = vcosq.f32 %v1854_v37  ;;  %v1916_v5 = vsel %vm1904_vm1, %v1898_v23, %v1915_v12  ;;  %vm3317_vm2 = vcmp.eq.s32.totalorder %v3315_v13, 0  ;;  %v10187_v31 = vsel %vm10146_vm7, 0, %v1853_v15 }
 0x241   : > { %8868 = vsinq.f32 %v1854_v37  ;;  %vm1903_vm8 = vcmp.lt.s32.totalorder %v10132_v60, 2  ;;  %vm3316_vm10 = vcmp.lt.s32.totalorder %v3315_v13, 2  ;;  %vm1650_vm12 = vweird.f32 %v9927_v34 }
 0x242   : > { %v1913_v30 = vsel %vm1903_vm8, %v1910_v25, %v1912_v20  ;;  %v1917_v23 = vsel %vm1903_vm8, %v1914_v45, %v1916_v5  ;;  %v1918_v16 = vshll.u32 %v1878_v8, 8  ;;  %v3521_v13 = vand.u32 3, %v10187_v31  ;;  %v10212_v45 = vpop.f32.mrb[13].mxu0 }
 0x243   : > { %v10160_v54 = vpop.eup %8862  ;;  %v1725_v37 = vshll.u32 %v10178_v14, 30  ;;  %v2393_v20 = vand.u32 2139095040, %v9944_v55  ;;  %13177 = vst [vmem:[#allocation38_spill] sm:$0xff] %v10212_v45  ;;  %v1886_v12 = vshrl.u32 %v13168_v57, %v10110_v39  ;;  %vm1858_vm15 = vweird.f32 %v9931_v38 }
 0x244   : > { %v10168_v62 = vpop.eup %8864  ;;  %v12930_v33 = vxor.u32 2147483648, %v10160_v54  ;;  %v10204_v35 = vmul.u32.u64.low %v1918_v16, %v1917_v23  ;;  %v10205_v7 = vmul.u32.u64.high %v1918_v16, %v1917_v23, %v10204_v35  ;;  %vm3526_vm14 = vcmp.eq.s32.totalorder %v3521_v13, 2 }
 0x245   : > { %v12931_v10 = vxor.u32 2147483648, %v10168_v62  ;;  %v10207_v15 = vmul.u32.u64.low %v1918_v16, %v1913_v30  ;;  %v10208_v25 = vmul.u32.u64.high %v1918_v16, %v1913_v30, %v10207_v15  ;;  %v1907_v30 = vsel %vm1905_vm6, %v1895_v22, 2102212464 }
 0x246   : > { %v3322_v63 = vsel %vm3320_vm0, %v12930_v33, %v10168_v62  ;;  %v2394_v23 = vshrl.u32 %v2393_v20, 23  ;;  %vm3522_vm9 = vcmp.lt.s32.totalorder %v3521_v13, 2  ;;  %vm3523_vm5 = vcmp.eq.s32.totalorder %v3521_v13, 0 }
 0x247   : > { %v3319_v58 = vsel %vm3317_vm2, %v10160_v54, %v12931_v10  ;;  %v1908_v22 = vsel %vm1904_vm1, %v1892_v9, %v1907_v30  ;;  %v1928_v52 = vadd.s32 1, %v10208_v25  ;;  %vm1927_vm11 = vc.u32 %v10205_v7, %v10207_v15 }
 0x248   : > { %v3323_v49 = vsel %vm3316_vm10, %v3319_v58, %v3322_v63  ;;  %v10221_v58 = vsub.s32 %v1722_v53, %v1725_v37  ;;  %v1906_v53 = vsel %vm1902_vm4, %v1886_v12, %v1889_v48  ;;  %v8167_v37 = vadd.s32 4294967169, %v2394_v23 }
 0x249   : > { %v10200_v36 = vsel %vm1650_vm12, nan, %v3323_v49  ;;  %v12936_v48 = vand.u32 2147483647, %v9944_v55  ;;  %v1909_v9 = vsel %vm1903_vm8, %v1906_v53, %v1908_v22  ;;  %v1651_v30 = vadd.s32 3, %v10138_v59 }
 0x24a   : > { %13176 = vst [vmem:[#allocation37_spill] sm:$0xff] %v10200_v36  ;;  %v10214_v8 = vpop.eup %8866  ;;  %v1728_v13 = vsub.s32 0, %v10221_v58  ;;  %v2400_v12 = vadd.s32 1, %v8167_v37  ;;  %v1929_v23 = vsel %vm1927_vm11, %v1928_v52, %v10208_v25  ;;  %v2601_v53 = vand.u32 2139095040, %v9946_v56 }
 0x24b   : > { %v10218_v5 = vpop.eup %8868  ;;  %v12928_v63 = vxor.u32 2147483648, %v10214_v8  ;;  %v10253_v47 = vand.u32 3, %v1651_v30  ;;  %vm1664_vm10 = vcmp.lt.s32.totalorder %v9933_v44, 0 }
 0x24c   : > { %v12929_v49 = vxor.u32 2147483648, %v10218_v5  ;;  %vm2401_vm7 = vcmp.gt.s32.totalorder %v2400_v12, 0  ;;  %v2602_v29 = vshrl.u32 %v2601_v53, 23 }
 0x24d   : > { %v3528_v35 = vsel %vm3526_vm14, %v12928_v63, %v10218_v5  ;;  %vm1654_vm2 = vcmp.eq.s32.totalorder %v10253_v47, 0  ;;  %vm1657_vm11 = vcmp.eq.s32.totalorder %v10253_v47, 2 }
 0x24e   : > { %v3525_v39 = vsel %vm3523_vm5, %v10214_v8, %v12929_v49  ;;  %v1925_v49 = vmul.u32 %v1918_v16, %v1909_v9  ;;  %vm1653_vm5 = vcmp.lt.s32.totalorder %v10253_v47, 2 }
 0x24f   : > { %v3529_v20 = vsel %vm3522_vm9, %v3525_v39, %v3528_v35  ;;  %v2402_v35 = vsel %vm2401_vm7, %v2400_v12, 0  ;;  %v8140_v39 = vmin.u32 %v1728_v13, %v10221_v58 }
 0x250   : > { %v10241_v63 = vsel %vm1858_vm15, nan, %v3529_v20  ;;  %v2397_v20 = vand.u32 8388607, %v12936_v48  ;;  %v2404_v33 = vand.u32 31, %v2402_v35  ;;  %v1930_v10 = vadd.s32 %v1929_v23, %v1925_v49 }
 0x251   : > { %13178 = vst [vmem:[#allocation39_spill] sm:$0xff] %v10241_v63  ;;  %v1730_v37 = vclz %v8140_v39  ;;  %v2403_v13 = vshrl.u32 %v2402_v35, 5  ;;  %v1748_v48 = vsub.s32 4, %v10178_v14 }
 0x252   : > { %v2405_v50 = vsub.s32 32, %v2404_v33  ;;  %v2398_v60 = vor.u32 8388608, %v2397_v20  ;;  %v2407_v59 = vshll.u32 %v13168_v57, %v2404_v33  ;;  %v2410_v25 = vshll.u32 %v13162_v1, %v2404_v33 }
 0x253   : > { %v1931_v22 = vadd.s32 536870912, %v1930_v10  ;;  %v2413_v12 = vshll.u32 %v13163_v27, %v2404_v33  ;;  %v2416_v49 = vshll.u32 %v13164_v24, %v2404_v33  ;;  %v1859_v20 = vadd.s32 3, %v10187_v31 }
 0x254   : > { %v2408_v52 = vshrl.u32 %v13162_v1, %v2405_v50  ;;  %v2411_v16 = vshrl.u32 %v13163_v27, %v2405_v50  ;;  %v2414_v23 = vshrl.u32 %v13164_v24, %v2405_v50  ;;  %v2417_v39 = vshrl.u32 %v13165_v11, %v2405_v50 }
 0x255   : > { %v2419_v19 = vshll.u32 %v13165_v11, %v2404_v33  ;;  %v2420_v18 = vshrl.u32 %v13166_v46, %v2405_v50  ;;  %v8141_v17 = vadd.s32 4294967294, %v1730_v37  ;;  %v10268_v43 = vshrl.u32 %v1931_v22, 30 }
 0x256   : > { %v2409_v9 = vor.u32 %v2408_v52, %v2407_v59  ;;  %v2412_v30 = vor.u32 %v2411_v16, %v2410_v25  ;;  %v2415_v35 = vor.u32 %v2414_v23, %v2413_v12  ;;  %v2418_v2 = vor.u32 %v2417_v39, %v2416_v49  ;;  %v10271_v16 = vpop.f32.mrb[13].mxu1 }
 0x257   : > { %v2421_v59 = vor.u32 %v2420_v18, %v2419_v19  ;;  %vm2422_vm6 = vcmp.lt.s32.totalorder %v2403_v13, 1  ;;  %vm2425_vm4 = vcmp.lt.s32.totalorder %v2403_v13, 4  ;;  %vm2424_vm1 = vcmp.lt.s32.totalorder %v2403_v13, 3  ;;  %13179 = vst [vmem:[#allocation40_spill] sm:$0xff] %v10271_v16 }
 0x258   : > { %v2430_v52 = vsel %vm2422_vm6, %v2409_v9, %v2412_v30  ;;  %v2431_v25 = vsel %vm2425_vm4, %v2418_v2, 920167782  ;;  %v2438_v31 = vshll.u32 %v2398_v60, 8  ;;  %vm2423_vm0 = vcmp.lt.s32.totalorder %v2403_v13, 2 }
 0x259   : > { %v2427_v33 = vsel %vm2425_vm4, %v2415_v35, 2102212464  ;;  %v2432_v41 = vsel %vm2424_vm1, %v2415_v35, %v2431_v25  ;;  %v2434_v37 = vsel %vm2422_vm6, %v2412_v30, %v2415_v35  ;;  %v2406_v53 = vshrl.u32 %v13168_v57, %v2405_v50 }
 0x25a   : > { %v2433_v22 = vsel %vm2423_vm0, %v2430_v52, %v2432_v41  ;;  %v2435_v18 = vsel %vm2425_vm4, %v2421_v59, 1326507024  ;;  %v8175_v19 = vadd.s32 4294967169, %v2602_v29  ;;  %v1933_v12 = vshll.u32 %v10268_v43, 30  ;;  %v13205_v41 = vld [vmem:[#allocation36_spill] sm:$0xff] }
 0x25b   : > { %v2436_v49 = vsel %vm2424_vm1, %v2418_v2, %v2435_v18  ;;  %v10279_v23 = vmul.u32.u64.low %v2438_v31, %v2433_v22  ;;  %v10280_v60 = vmul.u32.u64.high %v2438_v31, %v2433_v22, %v10279_v23  ;;  %v2426_v39 = vsel %vm2422_vm6, %v2406_v53, %v2409_v9 }
 0x25c   : > { %v2428_v25 = vsel %vm2424_vm1, %v2412_v30, %v2427_v33  ;;  %v2437_v35 = vsel %vm2423_vm0, %v2434_v37, %v2436_v49  ;;  %v2608_v61 = vadd.s32 1, %v8175_v19  ;;  %v13180_v50 = vand.u32 2147483647, %v9933_v44 }
 0x25d   : > { %vm8142_vm14 = vcmp.lt.s32.totalorder %v8141_v17, 0  ;;  %v1749_v2 = vsel %vm1664_vm10, %v1748_v48, %v10178_v14  ;;  %v10297_v29 = vmul.u32.u64.low %v2438_v31, %v2437_v35  ;;  %v10298_v9 = vmul.u32.u64.high %v2438_v31, %v2437_v35, %v10297_v29 }
 0x25e   : > { %vm10289_vm8 = vcmp.le.f32.partialorder %v13180_v50, 0.7853982  ;;  %vm2609_vm9 = vcmp.gt.s32.totalorder %v2608_v61, 0  ;;  %v10300_v30 = vsub.s32 %v1930_v10, %v1933_v12  ;;  %v2429_v59 = vsel %vm2423_vm0, %v2426_v39, %v2428_v25 }
 0x25f   : > { %v2448_v52 = vadd.s32 1, %v10280_v60  ;;  %v2610_v33 = vsel %vm2609_vm9, %v2608_v61, 0  ;;  %v10306_v37 = vand.u32 3, %v1859_v20  ;;  %v1733_v53 = vsel %vm8142_vm14, 0, %v8141_v17 }
 0x260   : > { %v2612_v22 = vand.u32 31, %v2610_v33  ;;  %v13183_v14 = vxor.u32 2147483648, %v10168_v62  ;;  %v13184_v48 = vxor.u32 2147483648, %v10160_v54  ;;  %v1718_v61 = vadd.s32 %v10080_v28, %v10086_v51 }
 0x261   : > { %v10320_v18 = vsel %vm10289_vm8, 0, %v1749_v2  ;;  %v2445_v20 = vmul.u32 %v2438_v31, %v2429_v59  ;;  %vm2447_vm7 = vc.u32 %v10298_v9, %v10279_v23  ;;  %v12954_v17 = vand.u32 2147483647, %v9946_v56 }
 0x262   : > { %v1656_v10 = vsel %vm1654_vm2, %v10160_v54, %v13183_v14  ;;  %v1659_v13 = vsel %vm1657_vm11, %v13184_v48, %v10168_v62  ;;  %13185 = vst [vmem:[#allocation41_spill] sm:$0xff] %v10320_v18  ;;  %v2613_v19 = vsub.s32 32, %v2612_v22  ;;  %v1734_v12 = vsub.s32 32, %v1733_v53 }
 0x263   : > { %v1936_v49 = vsub.s32 0, %v10300_v30  ;;  %v2449_v54 = vsel %vm2447_vm7, %v2448_v52, %v10280_v60  ;;  %v2615_v62 = vshll.u32 %v13168_v57, %v2612_v22  ;;  %v2618_v51 = vshll.u32 %v13162_v1, %v2612_v22 }
 0x264   : > { %v2450_v39 = vadd.s32 %v2449_v54, %v2445_v20  ;;  %v2616_v28 = vshrl.u32 %v13162_v1, %v2613_v19  ;;  %v2619_v31 = vshrl.u32 %v13163_v27, %v2613_v19  ;;  %v1738_v25 = vsub.s32 4294967266, %v1733_v53 }
 0x265   : > { %v2621_v35 = vshll.u32 %v13163_v27, %v2612_v22  ;;  %v2622_v50 = vshrl.u32 %v13164_v24, %v2613_v19  ;;  %v2624_v2 = vshll.u32 %v13164_v24, %v2612_v22  ;;  %v2605_v60 = vand.u32 8388607, %v12954_v17 }
 0x266   : > { %v2451_v29 = vadd.s32 536870912, %v2450_v39  ;;  %v10336_v59 = vshrl.u32 %v2610_v33, 5  ;;  %v2625_v52 = vshrl.u32 %v13165_v11, %v2613_v19  ;;  %v8148_v14 = vmin.u32 %v1936_v49, %v10300_v30 }
 0x267   : > { %v2627_v48 = vshll.u32 %v13165_v11, %v2612_v22  ;;  %v2628_v20 = vshrl.u32 %v13166_v46, %v2613_v19  ;;  %v2497_v54 = vand.u32 2139095040, %v9948_v32  ;;  %v2617_v6 = vor.u32 %v2616_v28, %v2615_v62 }
 0x268   : > { %v2452_v26 = vshrl.u32 %v2451_v29, 30  ;;  %v2620_v4 = vor.u32 %v2619_v31, %v2618_v51  ;;  %v2626_v42 = vor.u32 %v2625_v52, %v2624_v2  ;;  %v1660_v16 = vsel %vm1653_vm5, %v1656_v10, %v1659_v13 }
 0x269   : > { %vm1865_vm6 = vcmp.eq.s32.totalorder %v10306_v37, 2  ;;  %v1735_v33 = vshll.u32 %v10221_v58, %v1733_v53  ;;  %v1736_v17 = vshrl.u32 %v1718_v61, %v1734_v12  ;;  %v2623_v45 = vor.u32 %v2622_v50, %v2621_v35 }
 0x26a   : > { %v1739_v49 = vadd.s32 127, %v1738_v25  ;;  %v2453_v3 = vshll.u32 %v2452_v26, 30  ;;  %v2606_v22 = vor.u32 8388608, %v2605_v60  ;;  %vm2633_vm4 = vcmp.lt.s32.totalorder %v10336_v59, 4 }
 0x26b   : > { %v2629_v18 = vor.u32 %v2628_v20, %v2627_v48  ;;  %vm2630_vm1 = vcmp.lt.s32.totalorder %v10336_v59, 1  ;;  %v2639_v62 = vsel %vm2633_vm4, %v2626_v42, 920167782  ;;  %v2498_v28 = vshrl.u32 %v2497_v54, 23 }
 0x26c   : > { %v1938_v47 = vclz %v8148_v14  ;;  %v10351_v10 = vsub.s32 %v2450_v39, %v2453_v3  ;;  %vm2632_vm0 = vcmp.lt.s32.totalorder %v10336_v59, 3  ;;  %v2638_v58 = vsel %vm2630_vm1, %v2617_v6, %v2620_v4 }
 0x26d   : > { %v10358_v53 = vsel %vm1650_vm12, nan, %v1660_v16  ;;  %v10360_v13 = vor.u32 %v1736_v17, %v1735_v33  ;;  %vm2392_vm2 = vcmp.lt.s32.totalorder %v9944_v55, 0  ;;  %v2640_v61 = vsel %vm2632_vm0, %v2623_v45, %v2639_v62 }
 0x26e   : > { %13186 = vst [vmem:[#allocation42_spill] sm:$0xff] %v10358_v53  ;;  %v1740_v12 = vshll.u32 %v1739_v49, 23  ;;  %v2456_v3 = vsub.s32 0, %v10351_v10  ;;  %vm2631_vm14 = vcmp.lt.s32.totalorder %v10336_v59, 2  ;;  %v2646_v39 = vshll.u32 %v2606_v22, 8  ;;  %v10428_v59 = vpop.f32.mrb[14].mxu0 }
 0x26f   : > { %v13187_v51 = vand.u32 2147483647, %v9944_v55  ;;  %v2614_v34 = vshrl.u32 %v13168_v57, %v2613_v19  ;;  %v2641_v16 = vsel %vm2631_vm14, %v2638_v58, %v2640_v61  ;;  %v2643_v17 = vsel %vm2633_vm4, %v2629_v18, 1326507024 }
 0x270   : > { %v8171_v25 = vadd.s32 4294967169, %v2498_v28  ;;  %v8149_v35 = vadd.s32 4294967294, %v1938_v47  ;;  %v8168_v50 = vmin.u32 %v2456_v3, %v10351_v10  ;;  %v2635_v2 = vsel %vm2633_vm4, %v2623_v45, 2102212464 }
 0x271   : > { %vm10369_vm9 = vcmp.le.f32.partialorder %v13187_v51, 0.7853982  ;;  %v2642_v29 = vsel %vm2630_vm1, %v2620_v4, %v2623_v45  ;;  %v2476_v60 = vsub.s32 4, %v2452_v26  ;;  %v2644_v19 = vsel %vm2632_vm0, %v2626_v42, %v2643_v17 }
 0x272   : > { %v10385_v52 = vmul.u32.u64.low %v2646_v39, %v2641_v16  ;;  %v10386_v14 = vmul.u32.u64.high %v2646_v39, %v2641_v16, %v10385_v52  ;;  %v13190_v18 = vxor.u32 2147483648, %v10214_v8  ;;  %v10398_v20 = vadd.s32 %v10207_v15, %v10205_v7 }
 0x273   : > { %v2458_v45 = vclz %v8168_v50  ;;  %v12960_v54 = vand.u32 2147483647, %v9948_v32  ;;  %v2634_v42 = vsel %vm2630_vm1, %v2614_v34, %v2617_v6  ;;  %v2636_v33 = vsel %vm2632_vm0, %v2620_v4, %v2635_v2 }
 0x274   : > { %v10394_v48 = vsel %vm1865_vm6, %v13190_v18, %v10218_v5  ;;  %v2645_v49 = vsel %vm2631_vm14, %v2642_v29, %v2644_v19  ;;  %v2504_v22 = vadd.s32 1, %v8171_v25  ;;  %vm8150_vm12 = vcmp.lt.s32.totalorder %v8149_v35, 0 }
 0x275   : > { %v8169_v62 = vadd.s32 4294967294, %v2458_v45  ;;  %v10407_v28 = vmul.u32.u64.low %v2646_v39, %v2645_v49  ;;  %v10408_v47 = vmul.u32.u64.high %v2646_v39, %v2645_v49, %v10407_v28  ;;  %v10410_v7 = vor.u32 4788187, %v1740_v12 }
 0x276   : > { %v1744_v15 = vcvt.s32.f32 %v10360_v13  ;;  %v2477_v58 = vsel %vm2392_vm2, %v2476_v60, %v2452_v26  ;;  %vm2505_vm5 = vcmp.gt.s32.totalorder %v2504_v22, 0  ;;  %v2637_v4 = vsel %vm2631_vm14, %v2634_v42, %v2636_v33 }
 0x277   : > { %vm8170_vm11 = vcmp.lt.s32.totalorder %v8169_v62, 0  ;;  %v2656_v6 = vadd.s32 1, %v10386_v14  ;;  %v2506_v61 = vsel %vm2505_vm5, %v2504_v22, 0  ;;  %v10418_v3 = vsel %vm8150_vm12, 0, %v8149_v35 }
 0x278   : > { %v2461_v51 = vsel %vm8170_vm11, 0, %v8169_v62  ;;  %v2501_v12 = vand.u32 8388607, %v12960_v54  ;;  %v2508_v34 = vand.u32 31, %v2506_v61  ;;  %v2446_v16 = vadd.s32 %v10279_v23, %v10298_v9 }
 0x279   : > { %v2462_v17 = vsub.s32 32, %v2461_v51  ;;  %v2466_v26 = vsub.s32 4294967266, %v2461_v51  ;;  %v10426_v25 = vsel %vm10369_vm9, 0, %v2477_v58  ;;  %v2653_v50 = vmul.u32 %v2646_v39, %v2637_v4 }
 0x27a   : > { %vm2655_vm7 = vc.u32 %v10408_v47, %v10385_v52  ;;  %v10432_v35 = vshrl.u32 %v2506_v61, 5  ;;  %v2509_v2 = vsub.s32 32, %v2508_v34  ;;  %v2463_v29 = vshll.u32 %v10351_v10, %v2461_v51 }
 0x27b   : > { %v2464_v60 = vshrl.u32 %v2446_v16, %v2462_v17  ;;  %v2467_v19 = vadd.s32 127, %v2466_v26  ;;  %v2657_v23 = vsel %vm2655_vm7, %v2656_v6, %v10386_v14  ;;  %v2511_v18 = vshll.u32 %v13168_v57, %v2508_v34 }
 0x27c   : > { %v2658_v9 = vadd.s32 %v2657_v23, %v2653_v50  ;;  %v2512_v45 = vshrl.u32 %v13162_v1, %v2509_v2  ;;  %v2515_v42 = vshrl.u32 %v13163_v27, %v2509_v2  ;;  %v2514_v49 = vshll.u32 %v13162_v1, %v2508_v34 }
 0x27d   : > { %v2465_v39 = vor.u32 %v2464_v60, %v2463_v29  ;;  %v2468_v33 = vshll.u32 %v2467_v19, 23  ;;  %v2518_v22 = vshrl.u32 %v13164_v24, %v2509_v2  ;;  %v2517_v10 = vshll.u32 %v13163_v27, %v2508_v34 }
 0x27e   : > { %v2659_v62 = vadd.s32 536870912, %v2658_v9  ;;  %v2520_v28 = vshll.u32 %v13164_v24, %v2508_v34  ;;  %v2521_v14 = vshrl.u32 %v13165_v11, %v2509_v2  ;;  %v2502_v4 = vor.u32 8388608, %v2501_v12 }
 0x27f   : > { %v2469_v58 = vor.u32 4788187, %v2468_v33  ;;  %v2513_v6 = vor.u32 %v2512_v45, %v2511_v18  ;;  %v2516_v61 = vor.u32 %v2515_v42, %v2514_v49  ;;  %v2519_v16 = vor.u32 %v2518_v22, %v2517_v10 }
 0x280   : > { %v10444_v51 = vshrl.u32 %v2659_v62, 30  ;;  %v2522_v17 = vor.u32 %v2521_v14, %v2520_v28  ;;  %v2524_v26 = vshrl.u32 %v13166_v46, %v2509_v2  ;;  %v2472_v29 = vcvt.s32.f32 %v2465_v39 }
 0x281   : > { %v2470_v50 = vand.u32 2147483647, %v2469_v58  ;;  %v2523_v60 = vshll.u32 %v13165_v11, %v2508_v34  ;;  %v2705_v19 = vand.u32 2139095040, %v9950_v21  ;;  %vm1862_vm6 = vcmp.eq.s32.totalorder %v10306_v37, 0 }
 0x282   : > { %v2661_v23 = vshll.u32 %v10444_v51, 30  ;;  %vm2526_vm4 = vcmp.lt.s32.totalorder %v10432_v35, 1  ;;  %vm2528_vm1 = vcmp.lt.s32.totalorder %v10432_v35, 3  ;;  %vm2529_vm0 = vcmp.lt.s32.totalorder %v10432_v35, 4 }
 0x283   : > { %v2473_v12 = vmul.f32 %v2472_v29, %v2470_v50  ;;  %v2525_v18 = vor.u32 %v2524_v26, %v2523_v60  ;;  %v2534_v45 = vsel %vm2526_vm4, %v2513_v6, %v2516_v61  ;;  %v2535_v34 = vsel %vm2529_vm0, %v2522_v17, 920167782 }
 0x284   : > { %v1742_v42 = vand.u32 2147483647, %v10410_v7  ;;  %v10459_v39 = vsub.s32 %v2658_v9, %v2661_v23  ;;  %vm2527_vm14 = vcmp.lt.s32.totalorder %v10432_v35, 2  ;;  %v2536_v33 = vsel %vm2528_vm1, %v2519_v16, %v2535_v34 }
 0x285   : > { %v1946_v49 = vsub.s32 4294967266, %v10418_v3  ;;  %v2474_v22 = vxor.u32 2147483648, %v2473_v12  ;;  %v2537_v62 = vsel %vm2527_vm14, %v2534_v45, %v2536_v33  ;;  %v2542_v10 = vshll.u32 %v2502_v4, 8  ;;  %v10497_v33 = vpop.f32.mrb[14].mxu1 }
 0x286   : > { %v2483_v28 = vadd.s32 3, %v10426_v25  ;;  %v2664_v14 = vsub.s32 0, %v10459_v39  ;;  %v2531_v7 = vsel %vm2529_vm0, %v2519_v16, 2102212464  ;;  %v2706_v9 = vshrl.u32 %v2705_v19, 23 }
 0x287   : > { %v2475_v58 = vsel %vm2392_vm2, %v2474_v22, %v2473_v12  ;;  %v2539_v26 = vsel %vm2529_vm0, %v2525_v18, 1326507024  ;;  %v10475_v50 = vmul.u32.u64.low %v2542_v10, %v2537_v62  ;;  %v10476_v29 = vmul.u32.u64.high %v2542_v10, %v2537_v62, %v10475_v50 }
 0x288   : > { %v2478_v4 = vsel %vm10369_vm9, %v9944_v55, %v2475_v58  ;;  %v8176_v60 = vmin.u32 %v2664_v14, %v10459_v39  ;;  %v2510_v23 = vshrl.u32 %v13168_v57, %v2509_v2  ;;  %v2538_v19 = vsel %vm2526_vm4, %v2516_v61, %v2519_v16 }
 0x289   : > { %v10486_v45 = vadd.s32 127, %v1946_v49  ;;  %8870 = vcosq.f32 %v2478_v4  ;;  %v10489_v12 = vand.u32 3, %v10426_v25  ;;  %v2540_v18 = vsel %vm2528_vm1, %v2522_v17, %v2539_v26 }
 0x28a   : > { %8872 = vsinq.f32 %v2478_v4  ;;  %v2666_v34 = vclz %v8176_v60  ;;  %v2530_v31 = vsel %vm2526_vm4, %v2510_v23, %v2513_v6  ;;  %v2532_v2 = vsel %vm2528_vm1, %v2516_v61, %v2531_v7 }
 0x28b   : > { %v13191_v16 = vxor.u32 2147483648, %v10218_v5  ;;  %v10508_v17 = vmul.f32 %v1744_v15, %v1742_v42  ;;  %v2484_v49 = vand.u32 3, %v2483_v28  ;;  %v2541_v6 = vsel %vm2527_vm14, %v2538_v19, %v2540_v18 }
 0x28c   : > { %vm2600_vm2 = vcmp.lt.s32.totalorder %v9946_v56, 0  ;;  %v8177_v61 = vadd.s32 4294967294, %v2666_v34  ;;  %v10513_v22 = vmul.u32.u64.low %v2542_v10, %v2541_v6  ;;  %v10514_v62 = vmul.u32.u64.high %v2542_v10, %v2541_v6, %v10513_v22 }
 0x28d   : > { %v10504_v25 = vsel %vm1862_vm6, %v10214_v8, %v13191_v16  ;;  %v8179_v5 = vadd.s32 4294967169, %v2706_v9  ;;  %v1942_v14 = vsub.s32 32, %v10418_v3  ;;  %v1948_v8 = vshll.u32 %v10486_v45, 23 }
 0x28e   : > { %v2533_v13 = vsel %vm2527_vm14, %v2530_v31, %v2532_v2  ;;  %v12958_v15 = vand.u32 2147483647, %v9950_v21  ;;  %vm4141_vm9 = vcmp.eq.s32.totalorder %v10489_v12, 0  ;;  %vm8178_vm12 = vcmp.lt.s32.totalorder %v8177_v61, 0 }
 0x28f   : > { %v2552_v42 = vadd.s32 1, %v10476_v29  ;;  %v2712_v28 = vadd.s32 1, %v8179_v5  ;;  %vm2485_vm5 = vcmp.lt.s32.totalorder %v2484_v49, 2  ;;  %vm4140_vm11 = vcmp.lt.s32.totalorder %v10489_v12, 2 }
 0x290   : > { %vm4144_vm7 = vcmp.eq.s32.totalorder %v10489_v12, 2  ;;  %v2654_v7 = vadd.s32 %v10385_v52, %v10408_v47  ;;  %v2669_v9 = vsel %vm8178_vm12, 0, %v8177_v61  ;;  %vm2482_vm6 = vweird.f32 %v9944_v55 }
 0x291   : > { %v2670_v35 = vsub.s32 32, %v2669_v9  ;;  %v2674_v58 = vsub.s32 4294967266, %v2669_v9  ;;  %v2684_v26 = vsub.s32 4, %v10444_v51  ;;  %v2549_v4 = vmul.u32 %v2542_v10, %v2533_v13 }
 0x292   : > { %v2671_v60 = vshll.u32 %v10459_v39, %v2669_v9  ;;  %vm2551_vm4 = vc.u32 %v10514_v62, %v10475_v50  ;;  %vm2713_vm1 = vcmp.gt.s32.totalorder %v2712_v28, 0  ;;  %v1977_v23 = vand.u32 2139095040, %v10051_v40 }
 0x293   : > { %v13192_v19 = vand.u32 2147483647, %v9946_v56  ;;  %v2672_v47 = vshrl.u32 %v2654_v7, %v2670_v35  ;;  %v2675_v45 = vadd.s32 127, %v2674_v58  ;;  %v2553_v18 = vsel %vm2551_vm4, %v2552_v42, %v10476_v29  ;;  %v8871_v10 = vpop.eup %8870 }
 0x294   : > { %v2714_v34 = vsel %vm2713_vm1, %v2712_v28, 0  ;;  %vm2486_vm14 = vcmp.eq.s32.totalorder %v2484_v49, 0  ;;  %vm2489_vm12 = vcmp.eq.s32.totalorder %v2484_v49, 2  ;;  %v2554_v39 = vadd.s32 %v2553_v18, %v2549_v4  ;;  %v8873_v2 = vpop.eup %8872 }
 0x295   : > { %vm10535_vm0 = vcmp.le.f32.partialorder %v13192_v19, 0.7853982  ;;  %v2716_v31 = vand.u32 31, %v2714_v34  ;;  %v2490_v16 = vxor.u32 2147483648, %v8871_v10  ;;  %v2673_v6 = vor.u32 %v2672_v47, %v2671_v60 }
 0x296   : > { %v2676_v61 = vshll.u32 %v2675_v45, 23  ;;  %v2709_v22 = vand.u32 8388607, %v12958_v15  ;;  %v2487_v5 = vxor.u32 2147483648, %v8873_v2  ;;  %v2685_v13 = vsel %vm2600_vm2, %v2684_v26, %v10444_v51 }
 0x297   : > { %v2555_v7 = vadd.s32 536870912, %v2554_v39  ;;  %v2717_v29 = vsub.s32 32, %v2716_v31  ;;  %v2491_v42 = vsel %vm2489_vm12, %v2490_v16, %v8873_v2  ;;  %v4146_v28 = vsel %vm4144_vm7, %v2490_v16, %v8873_v2 }
 0x298   : > { %v2677_v9 = vor.u32 4788187, %v2676_v61  ;;  %v1978_v35 = vshrl.u32 %v1977_v23, 23  ;;  %v2488_v58 = vsel %vm2486_vm14, %v8871_v10, %v2487_v5  ;;  %v4143_v4 = vsel %vm4141_vm9, %v8871_v10, %v2487_v5 }
 0x299   : > { %v10550_v60 = vshrl.u32 %v2555_v7, 30  ;;  %v2719_v19 = vshll.u32 %v13168_v57, %v2716_v31  ;;  %v2492_v47 = vsel %vm2485_vm5, %v2488_v58, %v2491_v42  ;;  %v4147_v51 = vsel %vm4140_vm11, %v4143_v4, %v4146_v28 }
 0x29a   : > { %v2678_v26 = vand.u32 2147483647, %v2677_v9  ;;  %v2680_v45 = vcvt.s32.f32 %v2673_v6  ;;  %v10558_v18 = vsel %vm2482_vm6, nan, %v2492_v47  ;;  %v10562_v23 = vsel %vm2482_vm6, nan, %v4147_v51 }
 0x29b   : > { %13195 = vst [vmem:[#allocation43_spill] sm:$0xff] %v10558_v18  ;;  %13196 = vst [vmem:[#allocation44_spill] sm:$0xff] %v10562_v23  ;;  %v2557_v10 = vshll.u32 %v10550_v60, 30  ;;  %v2720_v2 = vshrl.u32 %v13162_v1, %v2717_v29  ;;  %v1944_v49 = vshrl.u32 %v10398_v20, %v1942_v14  ;;  %v10571_v61 = vor.u32 4788187, %v1948_v8 }
 0x29c   : > { %v2681_v6 = vmul.f32 %v2680_v45, %v2678_v26  ;;  %v2687_v55 = vsel %vm10535_vm0, 0, %v2685_v13  ;;  %v2722_v5 = vshll.u32 %v13162_v1, %v2716_v31  ;;  %v2723_v7 = vshrl.u32 %v13163_v27, %v2717_v29 }
 0x29d   : > { %v2710_v28 = vor.u32 8388608, %v2709_v22  ;;  %v2725_v20 = vshll.u32 %v13163_v27, %v2716_v31  ;;  %v2726_v14 = vshrl.u32 %v13164_v24, %v2717_v29  ;;  %vm1861_vm9 = vcmp.lt.s32.totalorder %v10306_v37, 2 }
 0x29e   : > { %v2682_v42 = vxor.u32 2147483648, %v2681_v6  ;;  %v10580_v9 = vsub.s32 %v2554_v39, %v2557_v10  ;;  %v2715_v58 = vshrl.u32 %v2714_v34, 5  ;;  %v2721_v8 = vor.u32 %v2720_v2, %v2719_v19 }
 0x29f   : > { %v8151_v4 = vadd.s32 4294967169, %v1978_v35  ;;  %v2724_v47 = vor.u32 %v2723_v7, %v2722_v5  ;;  %v2728_v51 = vshll.u32 %v13164_v24, %v2716_v31  ;;  %v2729_v26 = vshrl.u32 %v13165_v11, %v2717_v29 }
 0x2a0   : > { %v2683_v13 = vsel %vm2600_vm2, %v2682_v42, %v2681_v6  ;;  %v2691_v45 = vadd.s32 3, %v2687_v55  ;;  %v2727_v16 = vor.u32 %v2726_v14, %v2725_v20  ;;  %v2731_v39 = vshll.u32 %v13165_v11, %v2716_v31 }
 0x2a1   : > { %v2686_v22 = vsel %vm10535_vm0, %v9946_v56, %v2683_v13  ;;  %v10590_v34 = vand.u32 3, %v2687_v55  ;;  %v2730_v35 = vor.u32 %v2729_v26, %v2728_v51  ;;  %v2732_v19 = vshrl.u32 %v13166_v46, %v2717_v29 }
 0x2a2   : > { %8874 = vcosq.f32 %v2686_v22  ;;  %v2560_v10 = vsub.s32 0, %v10580_v9  ;;  %vm2734_vm2 = vcmp.lt.s32.totalorder %v2715_v58, 1  ;;  %v1984_v2 = vadd.s32 1, %v8151_v4 }
 0x2a3   : > { %8876 = vsinq.f32 %v2686_v22  ;;  %v2733_v6 = vor.u32 %v2732_v19, %v2731_v39  ;;  %vm2737_vm5 = vcmp.lt.s32.totalorder %v2715_v58, 4  ;;  %v2742_v52 = vsel %vm2734_vm2, %v2721_v8, %v2724_v47 }
 0x2a4   : > { %v2750_v5 = vshll.u32 %v2710_v28, 8  ;;  %v2718_v7 = vshrl.u32 %v13168_v57, %v2717_v29  ;;  %vm2736_vm11 = vcmp.lt.s32.totalorder %v2715_v58, 3  ;;  %v2743_v31 = vsel %vm2737_vm5, %v2730_v35, 920167782 }
 0x2a5   : > { %v2746_v55 = vsel %vm2734_vm2, %v2724_v47, %v2727_v16  ;;  %vm2735_vm7 = vcmp.lt.s32.totalorder %v2715_v58, 2  ;;  %v2739_v42 = vsel %vm2737_vm5, %v2727_v16, 2102212464  ;;  %v2744_v20 = vsel %vm2736_vm11, %v2727_v16, %v2743_v31 }
 0x2a6   : > { %v2747_v14 = vsel %vm2737_vm5, %v2733_v6, 1326507024  ;;  %v8172_v13 = vmin.u32 %v2560_v10, %v10580_v9  ;;  %v2745_v4 = vsel %vm2735_vm7, %v2742_v52, %v2744_v20  ;;  %vm1985_vm6 = vcmp.gt.s32.totalorder %v1984_v2, 0  ;;  %v10615_v10 = vpop.f32.mrb[15].mxu0 }
 0x2a7   : > { %v2748_v51 = vsel %vm2736_vm11, %v2730_v35, %v2747_v14  ;;  %v1868_v29 = vsel %vm1861_vm9, %v10504_v25, %v10394_v48  ;;  %v10606_v26 = vmul.u32.u64.low %v2750_v5, %v2745_v4  ;;  %v10607_v22 = vmul.u32.u64.high %v2750_v5, %v2745_v4, %v10606_v26 }
 0x2a8   : > { %v2749_v28 = vsel %vm2735_vm7, %v2746_v55, %v2748_v51  ;;  %v1943_v16 = vshll.u32 %v10300_v30, %v10418_v3  ;;  %vm2690_vm4 = vweird.f32 %v9946_v56  ;;  %v2692_v39 = vand.u32 3, %v2691_v45 }
 0x2a9   : > { %v2738_v35 = vsel %vm2734_vm2, %v2718_v7, %v2721_v8  ;;  %v2740_v19 = vsel %vm2736_vm11, %v2724_v47, %v2739_v42  ;;  %v1746_v37 = vxor.u32 2147483648, %v10508_v17  ;;  %v1986_v6 = vsel %vm1985_vm6, %v1984_v2, 0 }
 0x2aa   : > { %v10618_v48 = vmul.u32.u64.low %v2750_v5, %v2749_v28  ;;  %v10619_v25 = vmul.u32.u64.high %v2750_v5, %v2749_v28, %v10618_v48  ;;  %v1945_v52 = vor.u32 %v1944_v49, %v1943_v16  ;;  %v1950_v31 = vand.u32 2147483647, %v10571_v61 }
 0x2ab   : > { %vm4346_vm1 = vcmp.lt.s32.totalorder %v10590_v34, 2  ;;  %v2562_v30 = vclz %v8172_v13  ;;  %vm4347_vm0 = vcmp.eq.s32.totalorder %v10590_v34, 0  ;;  %v2741_v8 = vsel %vm2735_vm7, %v2738_v35, %v2740_v19 }
 0x2ac   : > { %v8875_v3 = vpop.eup %8874  ;;  %v2760_v47 = vadd.s32 1, %v10607_v22  ;;  %v1988_v45 = vand.u32 31, %v1986_v6  ;;  %vm2693_vm14 = vcmp.lt.s32.totalorder %v2692_v39, 2  ;;  %vm4350_vm12 = vcmp.eq.s32.totalorder %v10590_v34, 2 }
 0x2ad   : > { %v8877_v7 = vpop.eup %8876  ;;  %v2698_v55 = vxor.u32 2147483648, %v8875_v3  ;;  %v12959_v49 = vand.u32 2147483647, %v10051_v40  ;;  %vm2694_vm9 = vcmp.eq.s32.totalorder %v2692_v39, 0  ;;  %vm2697_vm2 = vcmp.eq.s32.totalorder %v2692_v39, 2 }
 0x2ae   : > { %v2695_v61 = vxor.u32 2147483648, %v8877_v7  ;;  %vm2759_vm5 = vc.u32 %v10619_v25, %v10606_v26  ;;  %v8173_v58 = vadd.s32 4294967294, %v2562_v30  ;;  %v2757_v20 = vmul.u32 %v2750_v5, %v2741_v8 }
 0x2af   : > { %v2699_v2 = vsel %vm2697_vm2, %v2698_v55, %v8877_v7  ;;  %v4352_v42 = vsel %vm4350_vm12, %v2698_v55, %v8877_v7  ;;  %v2761_v4 = vsel %vm2759_vm5, %v2760_v47, %v10607_v22  ;;  %v1989_v51 = vsub.s32 32, %v1988_v45 }
 0x2b0   : > { %v2696_v14 = vsel %vm2694_vm9, %v8875_v3, %v2695_v61  ;;  %v4349_v13 = vsel %vm4347_vm0, %v8875_v3, %v2695_v61  ;;  %vm1872_vm11 = vcmp.lt.s32.totalorder %v9937_v0, 0  ;;  %v2762_v35 = vadd.s32 %v2761_v4, %v2757_v20 }
 0x2b1   : > { %v2700_v28 = vsel %vm2693_vm14, %v2696_v14, %v2699_v2  ;;  %v4353_v16 = vsel %vm4346_vm1, %v4349_v13, %v4352_v42  ;;  %v1981_v19 = vand.u32 8388607, %v12959_v49  ;;  %v10641_v5 = vsel %vm1858_vm15, nan, %v1868_v29 }
 0x2b2   : > { %13197 = vst [vmem:[#allocation45_spill] sm:$0xff] %v10641_v5  ;;  %v1956_v48 = vsub.s32 4, %v10268_v43  ;;  %v10646_v22 = vsel %vm2690_vm4, nan, %v2700_v28  ;;  %v10650_v39 = vsel %vm2690_vm4, nan, %v4353_v16  ;;  %v1952_v34 = vcvt.s32.f32 %v1945_v52 }
 0x2b3   : > { %13198 = vst [vmem:[#allocation46_spill] sm:$0xff] %v10646_v22  ;;  %13199 = vst [vmem:[#allocation47_spill] sm:$0xff] %v10650_v39  ;;  %v2763_v38 = vadd.s32 536870912, %v2762_v35  ;;  %v1747_v29 = vsel %vm1664_vm10, %v1746_v37, %v10508_v17  ;;  %vm8174_vm15 = vcmp.lt.s32.totalorder %v8173_v58, 0  ;;  %v1992_v8 = vshrl.u32 %v13162_v1, %v1989_v51 }
 0x2b4   : > { %v1995_v47 = vshrl.u32 %v13163_v27, %v1989_v51  ;;  %v1953_v56 = vmul.f32 %v1952_v34, %v1950_v31  ;;  %v1982_v7 = vor.u32 8388608, %v1981_v19  ;;  %v1998_v52 = vshrl.u32 %v13164_v24, %v1989_v51  ;;  %v13200_v34 = vld [vmem:[#allocation41_spill] sm:$0xff] }
 0x2b5   : > { %v2001_v55 = vshrl.u32 %v13165_v11, %v1989_v51  ;;  %v1991_v61 = vshll.u32 %v13168_v57, %v1988_v45  ;;  %v1994_v2 = vshll.u32 %v13162_v1, %v1988_v45  ;;  %v2000_v42 = vshll.u32 %v13164_v24, %v1988_v45 }
 0x2b6   : > { %v2004_v20 = vshrl.u32 %v13166_v46, %v1989_v51  ;;  %v10667_v17 = vsel %vm8174_vm15, 0, %v8173_v58  ;;  %v10669_v37 = vshrl.u32 %v2763_v38, 30  ;;  %v1987_v14 = vshrl.u32 %v1986_v6, 5 }
 0x2b7   : > { %v1997_v31 = vshll.u32 %v13163_v27, %v1988_v45  ;;  %v1993_v13 = vor.u32 %v1992_v8, %v1991_v61  ;;  %v1996_v4 = vor.u32 %v1995_v47, %v1994_v2  ;;  %v2002_v28 = vor.u32 %v2001_v55, %v2000_v42 }
 0x2b8   : > { %v2003_v16 = vshll.u32 %v13165_v11, %v1988_v45  ;;  %v1750_v19 = vsel %vm10289_vm8, %v9933_v44, %v1747_v29  ;;  %v1755_v3 = vadd.s32 3, %v13200_v34  ;;  %v10678_v30 = vand.u32 3, %v13200_v34 }
 0x2b9   : > { %v13202_v58 = vand.u32 2147483647, %v9937_v0  ;;  %v1999_v38 = vor.u32 %v1998_v52, %v1997_v31  ;;  %v1954_v8 = vxor.u32 2147483648, %v1953_v56  ;;  %v1957_v45 = vsel %vm1872_vm11, %v1956_v48, %v10268_v43 }
 0x2ba   : > { %13201 = vst [vmem:[#allocation41_spill] sm:$0xff] %v10678_v30  ;;  %v2005_v47 = vor.u32 %v2004_v20, %v2003_v16  ;;  %v2185_v29 = vand.u32 2139095040, %v13205_v41  ;;  %v2570_v55 = vsub.s32 4294967266, %v10667_v17  ;;  %v2765_v61 = vshll.u32 %v10669_v37, 30 }
 0x2bb   : > { %vm10682_vm10 = vcmp.le.f32.partialorder %v13202_v58, 0.7853982  ;;  %vm2006_vm8 = vcmp.lt.s32.totalorder %v1987_v14, 1  ;;  %vm2009_vm7 = vcmp.lt.s32.totalorder %v1987_v14, 4  ;;  %vm2008_vm6 = vcmp.lt.s32.totalorder %v1987_v14, 3 }
 0x2bc   : > { %v2014_v2 = vsel %vm2006_vm8, %v1993_v13, %v1996_v4  ;;  %v2015_v42 = vsel %vm2009_vm7, %v2002_v28, 920167782  ;;  %v2022_v34 = vshll.u32 %v1982_v7, 8  ;;  %vm2007_vm4 = vcmp.lt.s32.totalorder %v1987_v14, 2 }
 0x2bd   : > { %v2011_v52 = vsel %vm2009_vm7, %v1999_v38, 2102212464  ;;  %v2016_v31 = vsel %vm2008_vm6, %v1999_v38, %v2015_v42  ;;  %v2018_v43 = vsel %vm2006_vm8, %v1996_v4, %v1999_v38  ;;  %v1990_v48 = vshrl.u32 %v13168_v57, %v1989_v51 }
 0x2be   : > { %v2017_v20 = vsel %vm2007_vm4, %v2014_v2, %v2016_v31  ;;  %v2019_v16 = vsel %vm2009_vm7, %v2005_v47, 1326507024  ;;  %v2186_v58 = vshrl.u32 %v2185_v29, 23  ;;  %v10697_v12 = vsub.s32 %v2762_v35, %v2765_v61  ;;  %v10711_v35 = vpop.f32.mrb[15].mxu1 }
 0x2bf   : > { %v2020_v15 = vsel %vm2008_vm6, %v2002_v28, %v2019_v16  ;;  %v10700_v49 = vmul.u32.u64.low %v2022_v34, %v2017_v20  ;;  %v10701_v54 = vmul.u32.u64.high %v2022_v34, %v2017_v20, %v10700_v49  ;;  %v2010_v7 = vsel %vm2006_vm8, %v1990_v48, %v1993_v13  ;;  %v13210_v20 = vld [vmem:[#allocation38_spill] sm:$0xff] }
 0x2c0   : > { %v2012_v42 = vsel %vm2008_vm6, %v1996_v4, %v2011_v52  ;;  %v2021_v38 = vsel %vm2007_vm4, %v2018_v43, %v2020_v15  ;;  %v8159_v63 = vadd.s32 4294967169, %v2186_v58  ;;  %8878 = vcosq.f32 %v1750_v19 }
 0x2c1   : > { %v2566_v51 = vsub.s32 32, %v10667_v17  ;;  %v10708_v47 = vmul.u32.u64.low %v2022_v34, %v2021_v38  ;;  %v10709_v29 = vmul.u32.u64.high %v2022_v34, %v2021_v38, %v10708_v47  ;;  %v1955_v28 = vsel %vm1872_vm11, %v1954_v8, %v1953_v56 }
 0x2c2   : > { %v1959_v61 = vsel %vm10682_vm10, 0, %v1957_v45  ;;  %v2571_v13 = vadd.s32 127, %v2570_v55  ;;  %v2192_v2 = vadd.s32 1, %v8159_v63  ;;  %v2550_v15 = vadd.s32 %v10475_v50, %v10514_v62 }
 0x2c3   : > { %v2768_v4 = vsub.s32 0, %v10697_v12  ;;  %v2013_v52 = vsel %vm2007_vm4, %v2010_v7, %v2012_v42  ;;  %v2032_v31 = vadd.s32 1, %v10701_v54  ;;  %8880 = vsinq.f32 %v1750_v19 }
 0x2c4   : > { %v10722_v43 = vand.u32 3, %v1755_v3  ;;  %vm2496_vm1 = vcmp.lt.s32.totalorder %v9948_v32, 0  ;;  %vm2193_vm0 = vcmp.gt.s32.totalorder %v2192_v2, 0  ;;  %v1958_v56 = vsel %vm10682_vm10, %v9937_v0, %v1955_v28 }
 0x2c5   : > { %v1963_v63 = vadd.s32 3, %v1959_v61  ;;  %v13206_v8 = vand.u32 2147483647, %v9948_v32  ;;  %v2568_v62 = vshrl.u32 %v2550_v15, %v2566_v51  ;;  %v2580_v14 = vsub.s32 4, %v10550_v60 }
 0x2c6   : > { %v2572_v19 = vshll.u32 %v2571_v13, 23  ;;  %v2029_v3 = vmul.u32 %v2022_v34, %v2013_v52  ;;  %vm2031_vm12 = vc.u32 %v10709_v29, %v10700_v49  ;;  %v2194_v45 = vsel %vm2193_vm0, %v2192_v2, 0 }
 0x2c7   : > { %vm10730_vm14 = vcmp.le.f32.partialorder %v13206_v8, 0.7853982  ;;  %v10737_v55 = vand.u32 3, %v1959_v61  ;;  %v8180_v6 = vmin.u32 %v2768_v4, %v10697_v12  ;;  %v2033_v48 = vsel %vm2031_vm12, %v2032_v31, %v10701_v54 }
 0x2c8   : > { %v2081_v16 = vand.u32 2139095040, %v13210_v20  ;;  %8882 = vcosq.f32 %v1958_v56  ;;  %v2567_v58 = vshll.u32 %v10580_v9, %v10667_v17  ;;  %v2034_v7 = vadd.s32 %v2033_v48, %v2029_v3 }
 0x2c9   : > { %13209 = vst [vmem:[#allocation36_spill] sm:$0xff] %v10737_v55  ;;  %v2196_v42 = vand.u32 31, %v2194_v45  ;;  %8884 = vsinq.f32 %v1958_v56  ;;  %v10744_v34 = vand.u32 3, %v1963_v63  ;;  %v2581_v38 = vsel %vm2496_vm1, %v2580_v14, %v10550_v60 }
 0x2ca   : > { %v12969_v51 = vand.u32 2147483647, %v13205_v41  ;;  %v2569_v47 = vor.u32 %v2568_v62, %v2567_v58  ;;  %v2573_v28 = vor.u32 4788187, %v2572_v19  ;;  %v2035_v54 = vadd.s32 536870912, %v2034_v7  ;;  %v10750_v13 = vpop.eup %8878 }
 0x2cb   : > { %v2197_v61 = vsub.s32 32, %v2196_v42  ;;  %v2770_v2 = vclz %v8180_v6  ;;  %v2195_v15 = vshrl.u32 %v2194_v45, 5  ;;  %v2205_v9 = vshll.u32 %v13163_v27, %v2196_v42 }
 0x2cc   : > { %v2082_v17 = vshrl.u32 %v2081_v16, 23  ;;  %v10753_v4 = vshrl.u32 %v2035_v54, 30  ;;  %v2199_v52 = vshll.u32 %v13168_v57, %v2196_v42  ;;  %v2202_v31 = vshll.u32 %v13162_v1, %v2196_v42 }
 0x2cd   : > { %v2208_v60 = vshll.u32 %v13164_v24, %v2196_v42  ;;  %v2200_v56 = vshrl.u32 %v13162_v1, %v2197_v61  ;;  %v2203_v63 = vshrl.u32 %v13163_v27, %v2197_v61  ;;  %v2206_v8 = vshrl.u32 %v13164_v24, %v2197_v61  ;;  %v10762_v14 = vpop.eup %8880 }
 0x2ce   : > { %v2209_v62 = vshrl.u32 %v13165_v11, %v2197_v61  ;;  %v2574_v19 = vand.u32 2147483647, %v2573_v28  ;;  %v10766_v3 = vsel %vm10730_vm14, 0, %v2581_v38  ;;  %v2037_v45 = vshll.u32 %v10753_v4, 30 }
 0x2cf   : > { %13211 = vst [vmem:[#allocation48_spill] sm:$0xff] %v10766_v3  ;;  %v2189_v6 = vand.u32 8388607, %v12969_v51  ;;  %v8181_v48 = vadd.s32 4294967294, %v2770_v2  ;;  %v2207_v16 = vor.u32 %v2206_v8, %v2205_v9  ;;  %v2211_v58 = vshll.u32 %v13165_v11, %v2196_v42 }
 0x2d0   : > { %v2212_v54 = vshrl.u32 %v13166_v46, %v2197_v61  ;;  %v2576_v39 = vcvt.s32.f32 %v2569_v47  ;;  %v10773_v36 = vsub.s32 %v2034_v7, %v2037_v45  ;;  %v2210_v23 = vor.u32 %v2209_v62, %v2208_v60 }
 0x2d1   : > { %v8155_v28 = vadd.s32 4294967169, %v2082_v17  ;;  %v2198_v55 = vshrl.u32 %v13168_v57, %v2197_v61  ;;  %v2201_v38 = vor.u32 %v2200_v56, %v2199_v52  ;;  %v2204_v30 = vor.u32 %v2203_v63, %v2202_v31 }
 0x2d2   : > { %vm2217_vm9 = vcmp.lt.s32.totalorder %v2195_v15, 4  ;;  %v10776_v5 = vpop.eup %8882  ;;  %v2577_v22 = vmul.f32 %v2576_v39, %v2574_v19  ;;  %v2040_v2 = vsub.s32 0, %v10773_v36  ;;  %v2190_v9 = vor.u32 8388608, %v2189_v6 }
 0x2d3   : > { %13212 = vst [vmem:[#allocation49_spill] sm:$0xff] %v10776_v5  ;;  %v2219_v42 = vsel %vm2217_vm9, %v2207_v16, 2102212464  ;;  %v10780_v8 = vpop.eup %8884  ;;  %v10783_v7 = vadd.s32 3, %v10766_v3  ;;  %v10787_v47 = vadd.s32 %v10606_v26, %v10619_v25  ;;  %vm8182_vm2 = vcmp.lt.s32.totalorder %v8181_v48, 0 }
 0x2d4   : > { %13213 = vst [vmem:[#allocation50_spill] sm:$0xff] %v10780_v8  ;;  %v2213_v61 = vor.u32 %v2212_v54, %v2211_v58  ;;  %v8152_v17 = vmin.u32 %v2040_v2, %v10773_v36  ;;  %vm2214_vm5 = vcmp.lt.s32.totalorder %v2195_v15, 1  ;;  %vm2216_vm11 = vcmp.lt.s32.totalorder %v2195_v15, 3 }
 0x2d5   : > { %v2223_v39 = vsel %vm2217_vm9, %v2210_v23, 920167782  ;;  %v2218_v52 = vsel %vm2214_vm5, %v2198_v55, %v2201_v38  ;;  %v2220_v31 = vsel %vm2216_vm11, %v2204_v30, %v2219_v42  ;;  %v2222_v60 = vsel %vm2214_vm5, %v2201_v38, %v2204_v30 }
 0x2d6   : > { %v2088_v56 = vadd.s32 1, %v8155_v28  ;;  %v2578_v63 = vxor.u32 2147483648, %v2577_v22  ;;  %v10792_v62 = vsel %vm8182_vm2, 0, %v8181_v48  ;;  %v2042_v19 = vclz %v8152_v17 }
 0x2d7   : > { %v2230_v45 = vshll.u32 %v2190_v9, 8  ;;  %vm2215_vm15 = vcmp.lt.s32.totalorder %v2195_v15, 2  ;;  %v2224_v26 = vsel %vm2216_vm11, %v2207_v16, %v2223_v39  ;;  %v2226_v25 = vsel %vm2214_vm5, %v2204_v30, %v2207_v16 }
 0x2d8   : > { %v2227_v6 = vsel %vm2217_vm9, %v2213_v61, 1326507024  ;;  %v8153_v58 = vadd.s32 4294967294, %v2042_v19  ;;  %v2221_v54 = vsel %vm2215_vm15, %v2218_v52, %v2220_v31  ;;  %v2225_v2 = vsel %vm2215_vm15, %v2222_v60, %v2224_v26 }
 0x2d9   : > { %v2228_v55 = vsel %vm2216_vm11, %v2210_v23, %v2227_v6  ;;  %v10797_v42 = vmul.u32.u64.low %v2230_v45, %v2225_v2  ;;  %v10798_v38 = vmul.u32.u64.high %v2230_v45, %v2225_v2, %v10797_v42  ;;  %vm2089_vm10 = vcmp.gt.s32.totalorder %v2088_v56, 0 }
 0x2da   : > { %v2229_v51 = vsel %vm2215_vm15, %v2226_v25, %v2228_v55  ;;  %vm8154_vm8 = vcmp.lt.s32.totalorder %v8153_v58, 0  ;;  %v2090_v9 = vsel %vm2089_vm10, %v2088_v56, 0  ;;  %v2778_v30 = vsub.s32 4294967266, %v10792_v62 }
 0x2db   : > { %v10801_v48 = vmul.u32.u64.low %v2230_v45, %v2229_v51  ;;  %v10802_v28 = vmul.u32.u64.high %v2230_v45, %v2229_v51, %v10801_v48  ;;  %v2045_v16 = vsel %vm8154_vm8, 0, %v8153_v58  ;;  %v12970_v61 = vand.u32 2147483647, %v13210_v20 }
 0x2dc   : > { %v2092_v17 = vand.u32 31, %v2090_v9  ;;  %v10808_v23 = vsel %vm2496_vm1, %v2578_v63, %v2577_v22  ;;  %v2030_v15 = vadd.s32 %v10700_v49, %v10709_v29  ;;  %v2046_v39 = vsub.s32 32, %v2045_v16 }
 0x2dd   : > { %v2050_v52 = vsub.s32 4294967266, %v2045_v16  ;;  %v2237_v51 = vmul.u32 %v2230_v45, %v2221_v54  ;;  %v2240_v60 = vadd.s32 1, %v10798_v38  ;;  %v2047_v19 = vshll.u32 %v10773_v36, %v2045_v16 }
 0x2de   : > { %v2093_v56 = vsub.s32 32, %v2092_v17  ;;  %v2048_v26 = vshrl.u32 %v2030_v15, %v2046_v39  ;;  %vm2239_vm7 = vc.u32 %v10802_v28, %v10797_v42  ;;  %v2774_v22 = vsub.s32 32, %v10792_v62 }
 0x2df   : > { %v2051_v25 = vadd.s32 127, %v2050_v52  ;;  %v2779_v63 = vadd.s32 127, %v2778_v30  ;;  %v2241_v49 = vsel %vm2239_vm7, %v2240_v60, %v10798_v38  ;;  %v2085_v29 = vand.u32 8388607, %v12970_v61 }
 0x2e0   : > { %v2049_v6 = vor.u32 %v2048_v26, %v2047_v19  ;;  %v2242_v58 = vadd.s32 %v2241_v49, %v2237_v51  ;;  %v10821_v54 = vshrl.u32 %v2090_v9, 5  ;;  %vm1976_vm6 = vcmp.lt.s32.totalorder %v10051_v40, 0 }
 0x2e1   : > { %v2052_v45 = vshll.u32 %v2051_v25, 23  ;;  %v2095_v36 = vshll.u32 %v13168_v57, %v2092_v17  ;;  %v2096_v2 = vshrl.u32 %v13162_v1, %v2093_v56  ;;  %v2099_v55 = vshrl.u32 %v13163_v27, %v2093_v56 }
 0x2e2   : > { %v2102_v48 = vshrl.u32 %v13164_v24, %v2093_v56  ;;  %v13214_v38 = vand.u32 2147483647, %v10051_v40  ;;  %v2243_v15 = vadd.s32 536870912, %v2242_v58  ;;  %v2104_v9 = vshll.u32 %v13164_v24, %v2092_v17 }
 0x2e3   : > { %v2053_v16 = vor.u32 4788187, %v2052_v45  ;;  %v2105_v39 = vshrl.u32 %v13165_v11, %v2093_v56  ;;  %v2098_v52 = vshll.u32 %v13162_v1, %v2092_v17  ;;  %v2101_v51 = vshll.u32 %v13163_v27, %v2092_v17 }
 0x2e4   : > { %vm10830_vm4 = vcmp.le.f32.partialorder %v13214_v38, 0.7853982  ;;  %v2107_v60 = vshll.u32 %v13165_v11, %v2092_v17  ;;  %v2108_v19 = vshrl.u32 %v13166_v46, %v2093_v56  ;;  %v2056_v25 = vcvt.s32.f32 %v2049_v6 }
 0x2e5   : > { %v2054_v26 = vand.u32 2147483647, %v2053_v16  ;;  %v10840_v49 = vshrl.u32 %v2243_v15, 30  ;;  %v2106_v38 = vor.u32 %v2105_v39, %v2104_v9  ;;  %v2097_v61 = vor.u32 %v2096_v2, %v2095_v36 }
 0x2e6   : > { %v2100_v45 = vor.u32 %v2099_v55, %v2098_v52  ;;  %v2103_v31 = vor.u32 %v2102_v48, %v2101_v51  ;;  %v2109_v3 = vor.u32 %v2108_v19, %v2107_v60  ;;  %v2060_v18 = vsub.s32 4, %v10753_v4 }
 0x2e7   : > { %v2057_v53 = vmul.f32 %v2056_v25, %v2054_v26  ;;  %v2245_v5 = vshll.u32 %v10840_v49, 30  ;;  %vm2113_vm1 = vcmp.lt.s32.totalorder %v10821_v54, 4  ;;  %v2775_v17 = vshll.u32 %v10697_v12, %v10792_v62 }
 0x2e8   : > { %v2776_v16 = vshrl.u32 %v10787_v47, %v2774_v22  ;;  %v2086_v6 = vor.u32 8388608, %v2085_v29  ;;  %v2119_v15 = vsel %vm2113_vm1, %v2106_v38, 920167782  ;;  %vm2110_vm0 = vcmp.lt.s32.totalorder %v10821_v54, 1 }
 0x2e9   : > { %v2058_v36 = vxor.u32 2147483648, %v2057_v53  ;;  %v10850_v2 = vsub.s32 %v2242_v58, %v2245_v5  ;;  %vm2112_vm12 = vcmp.lt.s32.totalorder %v10821_v54, 3  ;;  %v2780_v55 = vshll.u32 %v2779_v63, 23 }
 0x2ea   : > { %v2118_v48 = vsel %vm2110_vm0, %v2097_v61, %v2100_v45  ;;  %v2120_v12 = vsel %vm2112_vm12, %v2103_v31, %v2119_v15  ;;  %v2123_v47 = vsel %vm2113_vm1, %v2109_v3, 1326507024  ;;  %v2061_v5 = vsel %vm1976_vm6, %v2060_v18, %v10753_v4 }
 0x2eb   : > { %v2059_v62 = vsel %vm1976_vm6, %v2058_v36, %v2057_v53  ;;  %v2248_v22 = vsub.s32 0, %v10850_v2  ;;  %v2122_v63 = vsel %vm2110_vm0, %v2100_v45, %v2103_v31  ;;  %vm2111_vm9 = vcmp.lt.s32.totalorder %v10821_v54, 2 }
 0x2ec   : > { %v2062_v29 = vsel %vm10830_vm4, %v10051_v40, %v2059_v62  ;;  %v2115_v3 = vsel %vm2113_vm1, %v2103_v31, 2102212464  ;;  %v2124_v53 = vsel %vm2112_vm12, %v2106_v38, %v2123_v47  ;;  %v13217_v58 = vand.u32 2147483647, %v9950_v21 }
 0x2ed   : > { %8886 = vcosq.f32 %v2062_v29  ;;  %v8160_v4 = vmin.u32 %v2248_v22, %v10850_v2  ;;  %v2094_v9 = vshrl.u32 %v13168_v57, %v2093_v56  ;;  %v2121_v39 = vsel %vm2111_vm9, %v2118_v48, %v2120_v12 }
 0x2ee   : > { %vm10878_vm2 = vcmp.le.f32.partialorder %v13217_v58, 0.7853982  ;;  %v2781_v52 = vor.u32 4788187, %v2780_v55  ;;  %8888 = vsinq.f32 %v2062_v29  ;;  %v2125_v31 = vsel %vm2111_vm9, %v2122_v63, %v2124_v53  ;;  %v13220_v55 = vld [vmem:[#allocation40_spill] sm:$0xff] }
 0x2ef   : > { %v2126_v51 = vshll.u32 %v2086_v6, 8  ;;  %v10890_v60 = vsel %vm10830_vm4, 0, %v2061_v5  ;;  %v2250_v19 = vclz %v8160_v4  ;;  %v2114_v26 = vsel %vm2110_vm0, %v2094_v9, %v2097_v61 }
 0x2f0   : > { %v2116_v56 = vsel %vm2112_vm12, %v2100_v45, %v2115_v3  ;;  %v10904_v6 = vand.u32 3, %v10783_v7  ;;  %vm2704_vm5 = vcmp.lt.s32.totalorder %v9950_v21, 0  ;;  %v2289_v48 = vand.u32 2139095040, %v13220_v55 }
 0x2f1   : > { %v10896_v25 = vmul.u32.u64.low %v2126_v51, %v2125_v31  ;;  %v10897_v38 = vmul.u32.u64.high %v2126_v51, %v2125_v31, %v10896_v25  ;;  %v10899_v15 = vmul.u32.u64.low %v2126_v51, %v2121_v39  ;;  %v10900_v36 = vmul.u32.u64.high %v2126_v51, %v2121_v39, %v10899_v15 }
 0x2f2   : > { %v8161_v30 = vadd.s32 4294967294, %v2250_v19  ;;  %v2582_v61 = vsel %vm10730_vm14, %v9948_v32, %v10808_v23  ;;  %v2777_v45 = vor.u32 %v2776_v16, %v2775_v17  ;;  %v13221_v12 = vsub.s32 4, %v10669_v37 }
 0x2f3   : > { %v2117_v7 = vsel %vm2111_vm9, %v2114_v26, %v2116_v56  ;;  %v2782_v62 = vand.u32 2147483647, %v2781_v52  ;;  %v3727_v5 = vand.u32 3, %v10890_v60  ;;  %v2290_v22 = vshrl.u32 %v2289_v48, 23 }
 0x2f4   : > { %v2789_v47 = vsel %vm2704_vm5, %v13221_v12, %v10669_v37  ;;  %vm8162_vm11 = vcmp.lt.s32.totalorder %v8161_v30, 0  ;;  %vm2066_vm15 = vweird.f32 %v10051_v40  ;;  %v2238_v50 = vadd.s32 %v10797_v42, %v10802_v28 }
 0x2f5   : > { %v2253_v23 = vsel %vm8162_vm11, 0, %v8161_v30  ;;  %vm2135_vm14 = vc.u32 %v10897_v38, %v10899_v15  ;;  %v2136_v17 = vadd.s32 1, %v10900_v36  ;;  %v2133_v54 = vmul.u32 %v2126_v51, %v2117_v7 }
 0x2f6   : > { %v2254_v37 = vsub.s32 32, %v2253_v23  ;;  %v2258_v16 = vsub.s32 4294967266, %v2253_v23  ;;  %v8163_v63 = vadd.s32 4294967169, %v2290_v22  ;;  %v2784_v29 = vcvt.s32.f32 %v2777_v45 }
 0x2f7   : > { %v10928_v3 = vsel %vm10878_vm2, 0, %v2789_v47  ;;  %vm2184_vm10 = vcmp.lt.s32.totalorder %v13205_v41, 0  ;;  %v2255_v53 = vshll.u32 %v10850_v2, %v2253_v23  ;;  %v2137_v42 = vsel %vm2135_vm14, %v2136_v17, %v10900_v36  ;;  %v10933_v28 = vpop.eup %8886 }
 0x2f8   : > { %13222 = vst [vmem:[#allocation40_spill] sm:$0xff] %v10928_v3  ;;  %v2256_v58 = vshrl.u32 %v2238_v50, %v2254_v37  ;;  %v2259_v4 = vadd.s32 127, %v2258_v16  ;;  %v2138_v9 = vadd.s32 %v2137_v42, %v2133_v54  ;;  %v2296_v39 = vadd.s32 1, %v8163_v63  ;;  %v10935_v52 = vpop.eup %8888 }
 0x2f9   : > { %v10937_v31 = vmul.f32 %v2784_v29, %v2782_v62  ;;  %v12977_v51 = vxor.u32 2147483648, %v10933_v28  ;;  %vm3732_vm8 = vcmp.eq.s32.totalorder %v3727_v5, 2  ;;  %v2809_v19 = vand.u32 2139095040, %v10428_v59 }
 0x2fa   : > { %v12976_v26 = vxor.u32 2147483648, %v10935_v52  ;;  %v13223_v2 = vand.u32 2147483647, %v13205_v41  ;;  %v2257_v25 = vor.u32 %v2256_v58, %v2255_v53  ;;  %v2260_v36 = vshll.u32 %v2259_v4, 23 }
 0x2fb   : > { %v2139_v30 = vadd.s32 536870912, %v2138_v9  ;;  %vm3729_vm6 = vcmp.eq.s32.totalorder %v3727_v5, 0  ;;  %v3734_v48 = vsel %vm3732_vm8, %v12977_v51, %v10935_v52  ;;  %v12975_v45 = vand.u32 2147483647, %v13220_v55 }
 0x2fc   : > { %vm10944_vm7 = vcmp.le.f32.partialorder %v13223_v2, 0.7853982  ;;  %vm2297_vm4 = vcmp.gt.s32.totalorder %v2296_v39, 0  ;;  %vm3728_vm1 = vcmp.lt.s32.totalorder %v3727_v5, 2  ;;  %v3731_v12 = vsel %vm3729_vm6, %v10933_v28, %v12976_v26 }
 0x2fd   : > { %v2261_v47 = vor.u32 4788187, %v2260_v36  ;;  %v2268_v7 = vsub.s32 4, %v10840_v49  ;;  %v3735_v62 = vsel %vm3728_vm1, %v3731_v12, %v3734_v48  ;;  %v10956_v22 = vshrl.u32 %v2139_v30, 30 }
 0x2fe   : > { %v2298_v50 = vsel %vm2297_vm4, %v2296_v39, 0  ;;  %v2810_v23 = vshrl.u32 %v2809_v19, 23  ;;  %8890 = vcosq.f32 %v2582_v61  ;;  %v10960_v17 = vsel %vm2066_vm15, nan, %v3735_v62 }
 0x2ff   : > { %v2262_v37 = vand.u32 2147483647, %v2261_v47  ;;  %v2264_v16 = vcvt.s32.f32 %v2257_v25  ;;  %8892 = vsinq.f32 %v2582_v61  ;;  %v2141_v5 = vshll.u32 %v10956_v22, 30 }
 0x300   : > { %v2293_v54 = vand.u32 8388607, %v12975_v45  ;;  %v2300_v63 = vand.u32 31, %v2298_v50  ;;  %v10967_v53 = vadd.s32 3, %v10928_v3  ;;  %v2269_v58 = vsel %vm2184_vm10, %v2268_v7, %v10840_v49 }
 0x301   : > { %v2265_v42 = vmul.f32 %v2264_v16, %v2262_v37  ;;  %v2067_v4 = vadd.s32 3, %v10890_v60  ;;  %v10973_v39 = vsub.s32 %v2138_v9, %v2141_v5  ;;  %v8183_v19 = vadd.s32 4294967169, %v2810_v23 }
 0x302   : > { %v2301_v61 = vsub.s32 32, %v2300_v63  ;;  %v2303_v25 = vshll.u32 %v13168_v57, %v2300_v63  ;;  %v2306_v36 = vshll.u32 %v13162_v1, %v2300_v63  ;;  %v2309_v30 = vshll.u32 %v13163_v27, %v2300_v63 }
 0x303   : > { %v2266_v2 = vxor.u32 2147483648, %v2265_v42  ;;  %v2271_v48 = vsel %vm10944_vm7, 0, %v2269_v58  ;;  %v2144_v12 = vsub.s32 0, %v10973_v39  ;;  %v2294_v47 = vor.u32 8388608, %v2293_v54 }
 0x304   : > { %v2299_v49 = vshrl.u32 %v2298_v50, 5  ;;  %v2304_v9 = vshrl.u32 %v13162_v1, %v2301_v61  ;;  %v2307_v7 = vshrl.u32 %v13163_v27, %v2301_v61  ;;  %v2310_v62 = vshrl.u32 %v13164_v24, %v2301_v61 }
 0x305   : > { %v2267_v60 = vsel %vm2184_vm10, %v2266_v2, %v2265_v42  ;;  %v8156_v37 = vmin.u32 %v2144_v12, %v10973_v39  ;;  %v2312_v16 = vshll.u32 %v13164_v24, %v2300_v63  ;;  %v2816_v5 = vadd.s32 1, %v8183_v19 }
 0x306   : > { %v2270_v23 = vsel %vm10944_vm7, %v13205_v41, %v2267_v60  ;;  %v2305_v50 = vor.u32 %v2304_v9, %v2303_v25  ;;  %v2308_v54 = vor.u32 %v2307_v7, %v2306_v36  ;;  %v2311_v58 = vor.u32 %v2310_v62, %v2309_v30 }
 0x307   : > { %8894 = vcosq.f32 %v2270_v23  ;;  %v2146_v42 = vclz %v8156_v37  ;;  %v2313_v2 = vshrl.u32 %v13165_v11, %v2301_v61  ;;  %v2315_v45 = vshll.u32 %v13165_v11, %v2300_v63 }
 0x308   : > { %8896 = vsinq.f32 %v2270_v23  ;;  %v10993_v26 = vpop.eup %8890  ;;  %v2316_v56 = vshrl.u32 %v13166_v46, %v2301_v61  ;;  %vm2318_vm0 = vcmp.lt.s32.totalorder %v2299_v49, 1  ;;  %vm2319_vm12 = vcmp.lt.s32.totalorder %v2299_v49, 2 }
 0x309   : > { %v2334_v12 = vshll.u32 %v2294_v47, 8  ;;  %v10996_v60 = vpop.eup %8892  ;;  %v8157_v19 = vadd.s32 4294967294, %v2146_v42  ;;  %v2302_v25 = vshrl.u32 %v13168_v57, %v2301_v61  ;;  %v2314_v36 = vor.u32 %v2313_v2, %v2312_v16 }
 0x30a   : > { %vm2320_vm9 = vcmp.lt.s32.totalorder %v2299_v49, 3  ;;  %v2317_v30 = vor.u32 %v2316_v56, %v2315_v45  ;;  %vm2321_vm11 = vcmp.lt.s32.totalorder %v2299_v49, 4  ;;  %v2326_v9 = vsel %vm2318_vm0, %v2305_v50, %v2308_v54 }
 0x30b   : > { %vm2817_vm14 = vcmp.gt.s32.totalorder %v2816_v5, 0  ;;  %vm8158_vm10 = vcmp.lt.s32.totalorder %v8157_v19, 0  ;;  %v2323_v63 = vsel %vm2321_vm11, %v2311_v58, 2102212464  ;;  %v2327_v7 = vsel %vm2321_vm11, %v2314_v36, 920167782 }
 0x30c   : > { %v2330_v62 = vsel %vm2318_vm0, %v2308_v54, %v2311_v58  ;;  %v11001_v23 = vsel %vm8158_vm10, 0, %v8157_v19  ;;  %v2328_v47 = vsel %vm2320_vm9, %v2311_v58, %v2327_v7  ;;  %v2331_v37 = vsel %vm2321_vm11, %v2317_v30, 1326507024 }
 0x30d   : > { %v2818_v42 = vsel %vm2817_vm14, %v2816_v5, 0  ;;  %vm2274_vm8 = vweird.f32 %v13205_v41  ;;  %v3933_v61 = vand.u32 3, %v2271_v48  ;;  %v2154_v45 = vsub.s32 4294967266, %v11001_v23 }
 0x30e   : > { %v2322_v16 = vsel %vm2318_vm0, %v2302_v25, %v2305_v50  ;;  %v2329_v2 = vsel %vm2319_vm12, %v2326_v9, %v2328_v47  ;;  %v2324_v56 = vsel %vm2320_vm9, %v2308_v54, %v2323_v63  ;;  %v2332_v51 = vsel %vm2320_vm9, %v2314_v36, %v2331_v37 }
 0x30f   : > { %v11010_v29 = vmul.u32.u64.low %v2334_v12, %v2329_v2  ;;  %v11011_v19 = vmul.u32.u64.high %v2334_v12, %v2329_v2, %v11010_v29  ;;  %v13226_v5 = vxor.u32 2147483648, %v10937_v31  ;;  %v11019_v30 = vand.u32 3, %v2067_v4 }
 0x310   : > { %v2333_v50 = vsel %vm2319_vm12, %v2330_v62, %v2332_v51  ;;  %v2820_v25 = vand.u32 31, %v2818_v42  ;;  %v2275_v54 = vadd.s32 3, %v2271_v48  ;;  %v12981_v7 = vand.u32 2147483647, %v10428_v59 }
 0x311   : > { %v2787_v58 = vsel %vm2704_vm5, %v13226_v5, %v10937_v31  ;;  %v11022_v9 = vpop.eup %8894  ;;  %v11024_v63 = vmul.u32.u64.low %v2334_v12, %v2333_v50  ;;  %v11025_v36 = vmul.u32.u64.high %v2334_v12, %v2333_v50, %v11024_v63  ;;  %vm3934_vm7 = vcmp.lt.s32.totalorder %v3933_v61, 2 }
 0x312   : > { %v11028_v47 = vpop.eup %8896  ;;  %v12978_v37 = vxor.u32 2147483648, %v11022_v9  ;;  %v2155_v2 = vadd.s32 127, %v2154_v45  ;;  %v2325_v31 = vsel %vm2319_vm12, %v2322_v16, %v2324_v56  ;;  %vm3938_vm5 = vcmp.eq.s32.totalorder %v3933_v61, 2 }
 0x313   : > { %v12979_v4 = vxor.u32 2147483648, %v11028_v47  ;;  %v2150_v51 = vsub.s32 32, %v11001_v23  ;;  %v2344_v48 = vadd.s32 1, %v11011_v19  ;;  %vm3935_vm6 = vcmp.eq.s32.totalorder %v3933_v61, 0 }
 0x314   : > { %v3940_v62 = vsel %vm3938_vm5, %v12978_v37, %v11028_v47  ;;  %v2134_v5 = vadd.s32 %v10899_v15, %v10897_v38  ;;  %v2821_v50 = vsub.s32 32, %v2820_v25  ;;  %v2341_v45 = vmul.u32 %v2334_v12, %v2325_v31 }
 0x315   : > { %v3937_v49 = vsel %vm3935_vm6, %v11022_v9, %v12979_v4  ;;  %vm2343_vm4 = vc.u32 %v11025_v36, %v11010_v29  ;;  %v2813_v16 = vand.u32 8388607, %v12981_v7  ;;  %v2151_v63 = vshll.u32 %v10973_v39, %v11001_v23 }
 0x316   : > { %v3941_v56 = vsel %vm3934_vm7, %v3937_v49, %v3940_v62  ;;  %v2156_v37 = vshll.u32 %v2155_v2, 23  ;;  %v2345_v38 = vsel %vm2343_vm4, %v2344_v48, %v11011_v19  ;;  %v2152_v4 = vshrl.u32 %v2134_v5, %v2150_v51 }
 0x317   : > { %v11053_v15 = vsel %vm2274_vm8, nan, %v3941_v56  ;;  %v2346_v12 = vadd.s32 %v2345_v38, %v2341_v45  ;;  %v11055_v31 = vshrl.u32 %v2818_v42, 5  ;;  %v2823_v3 = vshll.u32 %v13168_v57, %v2820_v25 }
 0x318   : > { %13227 = vst [vmem:[#allocation51_spill] sm:$0xff] %v11053_v15  ;;  %v2824_v7 = vshrl.u32 %v13162_v1, %v2821_v50  ;;  %v2826_v61 = vshll.u32 %v13162_v1, %v2820_v25  ;;  %v2827_v62 = vshrl.u32 %v13163_v27, %v2821_v50  ;;  %v2830_v23 = vshrl.u32 %v13164_v24, %v2821_v50 }
 0x319   : > { %v2347_v39 = vadd.s32 536870912, %v2346_v12  ;;  %v2832_v19 = vshll.u32 %v13164_v24, %v2820_v25  ;;  %v2833_v2 = vshrl.u32 %v13165_v11, %v2821_v50  ;;  %v2157_v48 = vor.u32 4788187, %v2156_v37 }
 0x31a   : > { %v2825_v51 = vor.u32 %v2824_v7, %v2823_v3  ;;  %v2828_v5 = vor.u32 %v2827_v62, %v2826_v61  ;;  %v2829_v42 = vshll.u32 %v13163_v27, %v2820_v25  ;;  %v2814_v45 = vor.u32 8388608, %v2813_v16 }
 0x31b   : > { %v11065_v49 = vshrl.u32 %v2347_v39, 30  ;;  %v2834_v56 = vor.u32 %v2833_v2, %v2832_v19  ;;  %v2836_v38 = vshrl.u32 %v13166_v46, %v2821_v50  ;;  %v11071_v15 = vsel %vm10878_vm2, %v9950_v21, %v2787_v58 }
 0x31c   : > { %vm2080_vm1 = vcmp.lt.s32.totalorder %v13210_v20, 0  ;;  %v2153_v0 = vor.u32 %v2152_v4, %v2151_v63  ;;  %v2831_v8 = vor.u32 %v2830_v23, %v2829_v42  ;;  %v2835_v3 = vshll.u32 %v13165_v11, %v2820_v25 }
 0x31d   : > { %v11075_v7 = vand.u32 3, %v2275_v54  ;;  %v2349_v37 = vshll.u32 %v11065_v49, 30  ;;  %vm2838_vm0 = vcmp.lt.s32.totalorder %v11055_v31, 1  ;;  %vm2841_vm12 = vcmp.lt.s32.totalorder %v11055_v31, 4 }
 0x31e   : > { %v2158_v16 = vand.u32 2147483647, %v2157_v48  ;;  %v2837_v61 = vor.u32 %v2836_v38, %v2835_v3  ;;  %v2846_v18 = vsel %vm2838_vm0, %v2825_v51, %v2828_v5  ;;  %v2847_v58 = vsel %vm2841_vm12, %v2834_v56, 920167782 }
 0x31f   : > { %vm2070_vm2 = vcmp.eq.s32.totalorder %v11019_v30, 0  ;;  %v13228_v25 = vand.u32 2147483647, %v13210_v20  ;;  %v2164_v4 = vsub.s32 4, %v10956_v22  ;;  %v11092_v63 = vsub.s32 %v2346_v12, %v2349_v37 }
 0x320   : > { %vm2840_vm11 = vcmp.lt.s32.totalorder %v11055_v31, 3  ;;  %v2854_v62 = vshll.u32 %v2814_v45, 8  ;;  %v2160_v39 = vcvt.s32.f32 %v2153_v0  ;;  %vm2839_vm14 = vcmp.lt.s32.totalorder %v11055_v31, 2 }
 0x321   : > { %vm11087_vm9 = vcmp.le.f32.partialorder %v13228_v25, 0.7853982  ;;  %v2843_v23 = vsel %vm2841_vm12, %v2831_v8, 2102212464  ;;  %v2848_v19 = vsel %vm2840_vm11, %v2831_v8, %v2847_v58  ;;  %v2352_v2 = vsub.s32 0, %v11092_v63 }
 0x322   : > { %v2822_v48 = vshrl.u32 %v13168_v57, %v2821_v50  ;;  %v2849_v12 = vsel %vm2839_vm14, %v2846_v18, %v2848_v19  ;;  %v2850_v42 = vsel %vm2838_vm0, %v2828_v5, %v2831_v8  ;;  %v2161_v45 = vmul.f32 %v2160_v39, %v2158_v16 }
 0x323   : > { %v2851_v0 = vsel %vm2841_vm12, %v2837_v61, 1326507024  ;;  %v11108_v38 = vmul.u32.u64.low %v2854_v62, %v2849_v12  ;;  %v11109_v3 = vmul.u32.u64.high %v2854_v62, %v2849_v12, %v11108_v38  ;;  %vm2069_vm10 = vcmp.lt.s32.totalorder %v11019_v30, 2 }
 0x324   : > { %v8164_v37 = vmin.u32 %v2352_v2, %v11092_v63  ;;  %v2842_v50 = vsel %vm2838_vm0, %v2822_v48, %v2825_v51  ;;  %v2844_v18 = vsel %vm2840_vm11, %v2828_v5, %v2843_v23  ;;  %v2852_v8 = vsel %vm2840_vm11, %v2834_v56, %v2851_v0 }
 0x325   : > { %vm2073_vm7 = vcmp.eq.s32.totalorder %v11019_v30, 2  ;;  %v2853_v16 = vsel %vm2839_vm14, %v2850_v42, %v2852_v8  ;;  %v12986_v61 = vand.u32 2147483647, %v10497_v33  ;;  %v3017_v58 = vand.u32 2139095040, %v10497_v33 }
 0x326   : > { %v2165_v25 = vsel %vm2080_vm1, %v2164_v4, %v10956_v22  ;;  %v2354_v51 = vclz %v8164_v37  ;;  %v11128_v39 = vmul.u32.u64.low %v2854_v62, %v2853_v16  ;;  %v11129_v19 = vmul.u32.u64.high %v2854_v62, %v2853_v16, %v11128_v39 }
 0x327   : > { %v2162_v5 = vxor.u32 2147483648, %v2161_v45  ;;  %v2845_v56 = vsel %vm2839_vm14, %v2842_v50, %v2844_v18  ;;  %v2864_v23 = vadd.s32 1, %v11109_v3  ;;  %v3018_v2 = vshrl.u32 %v3017_v58, 23 }
 0x328   : > { %v13231_v48 = vxor.u32 2147483648, %v10933_v28  ;;  %vm2278_vm5 = vcmp.eq.s32.totalorder %v11075_v7, 0  ;;  %vm2281_vm6 = vcmp.eq.s32.totalorder %v11075_v7, 2  ;;  %v8165_v22 = vadd.s32 4294967294, %v2354_v51 }
 0x329   : > { %v13232_v4 = vxor.u32 2147483648, %v10935_v52  ;;  %v13233_v31 = vxor.u32 2147483648, %v11022_v9  ;;  %v11149_v37 = vsel %vm11087_vm9, 0, %v2165_v25  ;;  %v8191_v50 = vadd.s32 4294967169, %v3018_v2 }
 0x32a   : > { %v2075_v12 = vsel %vm2073_vm7, %v13231_v48, %v10935_v52  ;;  %13234 = vst [vmem:[#allocation52_spill] sm:$0xff] %v11149_v37  ;;  %v13235_v18 = vxor.u32 2147483648, %v11028_v47  ;;  %vm8166_vm4 = vcmp.lt.s32.totalorder %v8165_v22, 0  ;;  %v2861_v16 = vmul.u32 %v2854_v62, %v2845_v56 }
 0x32b   : > { %v2072_v42 = vsel %vm2070_vm2, %v10933_v28, %v13232_v4  ;;  %v2283_v0 = vsel %vm2281_vm6, %v13233_v31, %v11028_v47  ;;  %vm2863_vm0 = vc.u32 %v11129_v19, %v11108_v38  ;;  %v2163_v28 = vsel %vm2080_vm1, %v2162_v5, %v2161_v45 }
 0x32c   : > { %v2280_v8 = vsel %vm2278_vm5, %v11022_v9, %v13235_v18  ;;  %v2865_v52 = vsel %vm2863_vm0, %v2864_v23, %v11109_v3  ;;  %v3021_v58 = vand.u32 8388607, %v12986_v61  ;;  %v3024_v25 = vadd.s32 1, %v8191_v50 }
 0x32d   : > { %vm2277_vm12 = vcmp.lt.s32.totalorder %v11075_v7, 2  ;;  %v2171_v47 = vadd.s32 3, %v11149_v37  ;;  %v11163_v51 = vsel %vm8166_vm4, 0, %v8165_v22  ;;  %v2866_v9 = vadd.s32 %v2865_v52, %v2861_v16 }
 0x32e   : > { %v11166_v62 = vand.u32 3, %v10967_v53  ;;  %v2076_v39 = vsel %vm2069_vm10, %v2072_v42, %v2075_v12  ;;  %v2284_v45 = vsel %vm2277_vm12, %v2280_v8, %v2283_v0  ;;  %vm3025_vm1 = vcmp.gt.s32.totalorder %v3024_v25, 0 }
 0x32f   : > { %v2166_v3 = vsel %vm11087_vm9, %v13210_v20, %v2163_v28  ;;  %v2867_v5 = vadd.s32 536870912, %v2866_v9  ;;  %v3026_v56 = vsel %vm3025_vm1, %v3024_v25, 0  ;;  %v2913_v7 = vand.u32 2139095040, %v10615_v10 }
 0x330   : > { %8898 = vcosq.f32 %v11071_v15  ;;  %v2362_v23 = vsub.s32 4294967266, %v11163_v51  ;;  %v3022_v2 = vor.u32 8388608, %v3021_v58  ;;  %v3028_v53 = vand.u32 31, %v3026_v56 }
 0x331   : > { %8900 = vsinq.f32 %v11071_v15  ;;  %v11179_v30 = vsel %vm2066_vm15, nan, %v2076_v39  ;;  %v11181_v48 = vand.u32 3, %v2171_v47  ;;  %v2868_v54 = vshrl.u32 %v2867_v5, 30 }
 0x332   : > { %v11185_v12 = vsel %vm2274_vm8, nan, %v2284_v45  ;;  %8902 = vcosq.f32 %v2166_v3  ;;  %v2342_v22 = vadd.s32 %v11010_v29, %v11025_v36  ;;  %v3029_v4 = vsub.s32 32, %v3028_v53 }
 0x333   : > { %13236 = vst [vmem:[#allocation53_spill] sm:$0xff] %v11181_v48  ;;  %v2358_v42 = vsub.s32 32, %v11163_v51  ;;  %v2869_v31 = vshll.u32 %v2868_v54, 30  ;;  %v12987_v15 = vand.u32 2147483647, %v10615_v10  ;;  %v2914_v40 = vshrl.u32 %v2913_v7, 23 }
 0x334   : > { %8904 = vsinq.f32 %v2166_v3  ;;  %v2363_v0 = vadd.s32 127, %v2362_v23  ;;  %vm2808_vm15 = vcmp.lt.s32.totalorder %v10428_v59, 0  ;;  %v11193_v41 = vshll.u32 %v3022_v2, 8 }
 0x335   : > { %v11195_v18 = vsub.s32 %v2866_v9, %v2869_v31  ;;  %v3031_v8 = vshll.u32 %v13168_v57, %v3028_v53  ;;  %v3034_v29 = vshll.u32 %v13162_v1, %v3028_v53  ;;  %v3037_v36 = vshll.u32 %v13163_v27, %v3028_v53 }
 0x336   : > { %v3032_v16 = vshrl.u32 %v13162_v1, %v3029_v4  ;;  %v3035_v28 = vshrl.u32 %v13163_v27, %v3029_v4  ;;  %v3038_v52 = vshrl.u32 %v13164_v24, %v3029_v4  ;;  %v3040_v58 = vshll.u32 %v13164_v24, %v3028_v53 }
 0x337   : > { %v2360_v25 = vshrl.u32 %v2342_v22, %v2358_v42  ;;  %v2872_v47 = vsub.s32 0, %v11195_v18  ;;  %v8187_v39 = vadd.s32 4294967169, %v2914_v40  ;;  %v2917_v9 = vand.u32 8388607, %v12987_v15 }
 0x338   : > { %v2364_v45 = vshll.u32 %v2363_v0, 23  ;;  %v3041_v3 = vshrl.u32 %v13165_v11, %v3029_v4  ;;  %v3043_v5 = vshll.u32 %v13165_v11, %v3028_v53  ;;  %v3044_v7 = vshrl.u32 %v13166_v46, %v3029_v4 }
 0x339   : > { %v2359_v23 = vshll.u32 %v11092_v63, %v11163_v51  ;;  %v8184_v2 = vmin.u32 %v2872_v47, %v11195_v18  ;;  %v2892_v31 = vsub.s32 4, %v2868_v54  ;;  %v3027_v22 = vshrl.u32 %v3026_v56, 5 }
 0x33a   : > { %v11213_v42 = vpop.eup %8898  ;;  %v3033_v40 = vor.u32 %v3032_v16, %v3031_v8  ;;  %v3036_v61 = vor.u32 %v3035_v28, %v3034_v29  ;;  %v3039_v50 = vor.u32 %v3038_v52, %v3037_v36  ;;  %v3042_v15 = vor.u32 %v3041_v3, %v3040_v58 }
 0x33b   : > { %v11215_v0 = vpop.eup %8900  ;;  %vm2288_vm8 = vcmp.lt.s32.totalorder %v13220_v55, 0  ;;  %v2862_v53 = vadd.s32 %v11108_v38, %v11129_v19  ;;  %v2874_v20 = vclz %v8184_v2  ;;  %v2918_v48 = vor.u32 8388608, %v2917_v9 }
 0x33c   : > { %v2920_v63 = vadd.s32 1, %v8187_v39  ;;  %v11220_v51 = vpop.eup %8902  ;;  %v11222_v47 = vor.u32 %v2360_v25, %v2359_v23  ;;  %v11224_v56 = vor.u32 4788187, %v2364_v45  ;;  %v13237_v8 = vand.u32 2147483647, %v10428_v59 }
 0x33d   : > { %v3030_v36 = vshrl.u32 %v13168_v57, %v3029_v4  ;;  %v3045_v16 = vor.u32 %v3044_v7, %v3043_v5  ;;  %v8185_v28 = vadd.s32 4294967294, %v2874_v20  ;;  %v2893_v38 = vsel %vm2808_vm15, %v2892_v31, %v2868_v54 }
 0x33e   : > { %vm11228_vm2 = vcmp.le.f32.partialorder %v13237_v8, 0.7853982  ;;  %vm3046_vm9 = vcmp.lt.s32.totalorder %v3027_v22, 1  ;;  %vm3049_vm11 = vcmp.lt.s32.totalorder %v3027_v22, 4  ;;  %v11235_v19 = vpop.eup %8904  ;;  %vm3048_vm14 = vcmp.lt.s32.totalorder %v3027_v22, 3 }
 0x33f   : > { %v3051_v52 = vsel %vm3049_vm11, %v3039_v50, 2102212464  ;;  %v3054_v58 = vsel %vm3046_vm9, %v3033_v40, %v3036_v61  ;;  %v3055_v25 = vsel %vm3049_vm11, %v3042_v15, 920167782  ;;  %vm8186_vm10 = vcmp.lt.s32.totalorder %v8185_v28, 0 }
 0x340   : > { %vm3047_vm7 = vcmp.lt.s32.totalorder %v3027_v22, 2  ;;  %v3056_v39 = vsel %vm3048_vm14, %v3039_v50, %v3055_v25  ;;  %v3058_v9 = vsel %vm3046_vm9, %v3036_v61, %v3039_v50  ;;  %v2877_v45 = vsel %vm8186_vm10, 0, %v8185_v28 }
 0x341   : > { %v3050_v3 = vsel %vm3046_vm9, %v3030_v36, %v3033_v40  ;;  %v3057_v4 = vsel %vm3047_vm7, %v3054_v58, %v3056_v39  ;;  %v3059_v20 = vsel %vm3049_vm11, %v3045_v16, 1326507024  ;;  %v2878_v5 = vsub.s32 32, %v2877_v45 }
 0x342   : > { %v2882_v7 = vsub.s32 4294967266, %v2877_v45  ;;  %v3052_v54 = vsel %vm3048_vm14, %v3036_v61, %v3051_v52  ;;  %v3060_v23 = vsel %vm3048_vm14, %v3042_v15, %v3059_v20  ;;  %v2879_v2 = vshll.u32 %v11195_v18, %v2877_v45 }
 0x343   : > { %v3061_v31 = vsel %vm3047_vm7, %v3058_v9, %v3060_v23  ;;  %v11241_v8 = vmul.u32.u64.low %v11193_v41, %v3057_v4  ;;  %v11242_v37 = vmul.u32.u64.high %v11193_v41, %v3057_v4, %v11241_v8  ;;  %v2880_v25 = vshrl.u32 %v2862_v53, %v2878_v5 }
 0x344   : > { %v2883_v50 = vadd.s32 127, %v2882_v7  ;;  %v11246_v40 = vmul.u32.u64.low %v11193_v41, %v3061_v31  ;;  %v11247_v36 = vmul.u32.u64.high %v11193_v41, %v3061_v31, %v11246_v40  ;;  %v13240_v16 = vsub.s32 4, %v11065_v49 }
 0x345   : > { %v3053_v15 = vsel %vm3047_vm7, %v3050_v3, %v3052_v54  ;;  %vm2921_vm5 = vcmp.gt.s32.totalorder %v2920_v63, 0  ;;  %v11257_v18 = vshll.u32 %v2918_v48, 8  ;;  %v2881_v28 = vor.u32 %v2880_v25, %v2879_v2 }
 0x346   : > { %v11254_v61 = vsel %vm2288_vm8, %v13240_v16, %v11065_v49  ;;  %v2884_v52 = vshll.u32 %v2883_v50, 23  ;;  %v2895_v53 = vsel %vm11228_vm2, 0, %v2893_v38  ;;  %v2922_v58 = vsel %vm2921_vm5, %v2920_v63, 0 }
 0x347   : > { %v2368_v39 = vcvt.s32.f32 %v11222_v47  ;;  %v3072_v9 = vadd.s32 1, %v11242_v37  ;;  %v2924_v45 = vand.u32 31, %v2922_v58  ;;  %v3118_v4 = vand.u32 2147483647, %v10711_v35 }
 0x348   : > { %v2366_v49 = vand.u32 2147483647, %v11224_v56  ;;  %v2885_v22 = vor.u32 4788187, %v2884_v52  ;;  %v3069_v3 = vmul.u32 %v11193_v41, %v3053_v15  ;;  %vm3071_vm6 = vc.u32 %v11247_v36, %v11241_v8 }
 0x349   : > { %v2899_v48 = vadd.s32 3, %v2895_v53  ;;  %vm3016_vm4 = vcmp.lt.s32.totalorder %v10497_v33, 0  ;;  %v3073_v63 = vsel %vm3071_vm6, %v3072_v9, %v11242_v37  ;;  %v11270_v38 = vshrl.u32 %v2922_v58, 5 }
 0x34a   : > { %v2925_v47 = vsub.s32 32, %v2924_v45  ;;  %v2886_v20 = vand.u32 2147483647, %v2885_v22  ;;  %v2888_v5 = vcvt.s32.f32 %v2881_v28  ;;  %v3074_v7 = vadd.s32 %v3073_v63, %v3069_v3 }
 0x34b   : > { %v2927_v54 = vshll.u32 %v13168_v57, %v2924_v45  ;;  %v2930_v41 = vshll.u32 %v13162_v1, %v2924_v45  ;;  %v13241_v25 = vand.u32 2147483647, %v10497_v33  ;;  %v2936_v40 = vshll.u32 %v13164_v24, %v2924_v45 }
 0x34c   : > { %v2928_v56 = vshrl.u32 %v13162_v1, %v2925_v47  ;;  %v2931_v23 = vshrl.u32 %v13163_v27, %v2925_v47  ;;  %v2934_v2 = vshrl.u32 %v13164_v24, %v2925_v47  ;;  %v2889_v31 = vmul.f32 %v2888_v5, %v2886_v20 }
 0x34d   : > { %vm11279_vm0 = vcmp.le.f32.partialorder %v13241_v25, 0.7853982  ;;  %v3075_v50 = vadd.s32 536870912, %v3074_v7  ;;  %v2937_v16 = vshrl.u32 %v13165_v11, %v2925_v47  ;;  %v2933_v52 = vshll.u32 %v13163_v27, %v2924_v45 }
 0x34e   : > { %v2929_v15 = vor.u32 %v2928_v56, %v2927_v54  ;;  %v2932_v28 = vor.u32 %v2931_v23, %v2930_v41  ;;  %v2940_v58 = vshrl.u32 %v13166_v46, %v2925_v47  ;;  %v2890_v9 = vxor.u32 2147483648, %v2889_v31 }
 0x34f   : > { %v11287_v22 = vand.u32 3, %v2895_v53  ;;  %v3076_v3 = vshrl.u32 %v3075_v50, 30  ;;  %v2938_v63 = vor.u32 %v2937_v16, %v2936_v40  ;;  %v2935_v20 = vor.u32 %v2934_v2, %v2933_v52 }
 0x350   : > { %v2939_v5 = vshll.u32 %v13165_v11, %v2924_v45  ;;  %vm2942_vm12 = vcmp.lt.s32.totalorder %v11270_v38, 1  ;;  %v3121_v25 = vand.u32 2139095040, %v10711_v35  ;;  %v2891_v54 = vsel %vm2808_vm15, %v2890_v9, %v2889_v31 }
 0x351   : > { %v3077_v56 = vshll.u32 %v3076_v3, 30  ;;  %v3100_v41 = vsub.s32 4, %v3076_v3  ;;  %vm2945_vm1 = vcmp.lt.s32.totalorder %v11270_v38, 4  ;;  %v2894_v53 = vsel %vm11228_vm2, %v10428_v59, %v2891_v54 }
 0x352   : > { %v2941_v23 = vor.u32 %v2940_v58, %v2939_v5  ;;  %v2950_v2 = vsel %vm2942_vm12, %v2929_v15, %v2932_v28  ;;  %v2951_v45 = vsel %vm2945_vm1, %v2938_v63, 920167782  ;;  %8906 = vcosq.f32 %v2894_v53 }
 0x353   : > { %v11302_v50 = vsub.s32 %v3074_v7, %v3077_v56  ;;  %v3101_v31 = vsel %vm3016_vm4, %v3100_v41, %v3076_v3  ;;  %vm2944_vm15 = vcmp.lt.s32.totalorder %v11270_v38, 3  ;;  %8908 = vsinq.f32 %v2894_v53 }
 0x354   : > { %vm2943_vm9 = vcmp.lt.s32.totalorder %v11270_v38, 2  ;;  %v2952_v29 = vsel %vm2944_vm15, %v2935_v20, %v2951_v45  ;;  %v3122_v40 = vshrl.u32 %v3121_v25, 23  ;;  %v2900_v16 = vand.u32 3, %v2899_v48 }
 0x355   : > { %v3080_v52 = vsub.s32 0, %v11302_v50  ;;  %v2947_v58 = vsel %vm2945_vm1, %v2935_v20, 2102212464  ;;  %v2953_v7 = vsel %vm2943_vm9, %v2950_v2, %v2952_v29  ;;  %v3103_v9 = vsel %vm11279_vm0, 0, %v3101_v31 }
 0x356   : > { %v2955_v3 = vsel %vm2945_vm1, %v2941_v23, 1326507024  ;;  %v11320_v5 = vmul.u32.u64.low %v11257_v18, %v2953_v7  ;;  %v11321_v54 = vmul.u32.u64.high %v11257_v18, %v2953_v7, %v11320_v5  ;;  %v11324_v48 = vmul.f32 %v2368_v39, %v2366_v49 }
 0x357   : > { %v8192_v25 = vmin.u32 %v3080_v52, %v11302_v50  ;;  %v2926_v56 = vshrl.u32 %v13168_v57, %v2925_v47  ;;  %v2954_v41 = vsel %vm2942_vm12, %v2932_v28, %v2935_v20  ;;  %vm4553_vm2 = vcmp.eq.s32.totalorder %v11287_v22, 0 }
 0x358   : > { %vm4556_vm11 = vcmp.eq.s32.totalorder %v11287_v22, 2  ;;  %v2956_v53 = vsel %vm2944_vm15, %v2938_v63, %v2955_v3  ;;  %v8195_v23 = vadd.s32 4294967169, %v3122_v40  ;;  %vm4552_vm14 = vcmp.lt.s32.totalorder %v11287_v22, 2 }
 0x359   : > { %v3082_v2 = vclz %v8192_v25  ;;  %v3107_v39 = vadd.s32 3, %v3103_v9  ;;  %v2946_v49 = vsel %vm2942_vm12, %v2926_v56, %v2929_v15  ;;  %v2948_v47 = vsel %vm2944_vm15, %v2932_v28, %v2947_v58 }
 0x35a   : > { %vm2898_vm10 = vweird.f32 %v10428_v59  ;;  %vm2901_vm7 = vcmp.lt.s32.totalorder %v2900_v16, 2  ;;  %vm2902_vm5 = vcmp.eq.s32.totalorder %v2900_v16, 0  ;;  %v2957_v20 = vsel %vm2943_vm9, %v2954_v41, %v2956_v53 }
 0x35b   : > { %v3128_v45 = vadd.s32 1, %v8195_v23  ;;  %vm2905_vm6 = vcmp.eq.s32.totalorder %v2900_v16, 2  ;;  %v8193_v63 = vadd.s32 4294967294, %v3082_v2  ;;  %v3070_v15 = vadd.s32 %v11241_v8, %v11247_v36 }
 0x35c   : > { %v11343_v31 = vmul.u32.u64.low %v11257_v18, %v2957_v20  ;;  %v11344_v29 = vmul.u32.u64.high %v11257_v18, %v2957_v20, %v11343_v31  ;;  %v2949_v28 = vsel %vm2943_vm9, %v2946_v49, %v2948_v47  ;;  %v3125_v40 = vand.u32 8388607, %v3118_v4  ;;  %v8907_v52 = vpop.eup %8906 }
 0x35d   : > { %vm3129_vm12 = vcmp.gt.s32.totalorder %v3128_v45, 0  ;;  %vm8194_vm1 = vcmp.lt.s32.totalorder %v8193_v63, 0  ;;  %v11352_v58 = vand.u32 3, %v3107_v39  ;;  %v11354_v7 = vand.u32 3, %v3103_v9  ;;  %v8909_v25 = vpop.eup %8908 }
 0x35e   : > { %v3130_v3 = vsel %vm3129_vm12, %v3128_v45, 0  ;;  %v2906_v56 = vxor.u32 2147483648, %v8907_v52  ;;  %v3085_v41 = vsel %vm8194_vm1, 0, %v8193_v63  ;;  %v2968_v53 = vadd.s32 1, %v11321_v54 }
 0x35f   : > { %v3132_v8 = vand.u32 31, %v3130_v3  ;;  %v2903_v36 = vxor.u32 2147483648, %v8909_v25  ;;  %v3086_v38 = vsub.s32 32, %v3085_v41  ;;  %v3090_v23 = vsub.s32 4294967266, %v3085_v41 }
 0x360   : > { %v2965_v2 = vmul.u32 %v11257_v18, %v2949_v28  ;;  %v2907_v49 = vsel %vm2905_vm6, %v2906_v56, %v8909_v25  ;;  %v4558_v39 = vsel %vm4556_vm11, %v2906_v56, %v8909_v25  ;;  %v3087_v9 = vshll.u32 %v11302_v50, %v3085_v41 }
 0x361   : > { %vm2967_vm15 = vc.u32 %v11344_v29, %v11320_v5  ;;  %v2904_v47 = vsel %vm2902_vm5, %v8907_v52, %v2903_v36  ;;  %v4555_v20 = vsel %vm4553_vm2, %v8907_v52, %v2903_v36  ;;  %v3088_v45 = vshrl.u32 %v3070_v15, %v3086_v38 }
 0x362   : > { %v3091_v63 = vadd.s32 127, %v3090_v23  ;;  %v2908_v31 = vsel %vm2901_vm7, %v2904_v47, %v2907_v49  ;;  %v4559_v18 = vsel %vm4552_vm14, %v4555_v20, %v4558_v39  ;;  %v2969_v28 = vsel %vm2967_vm15, %v2968_v53, %v11321_v54 }
 0x363   : > { %v3133_v25 = vsub.s32 32, %v3132_v8  ;;  %v11373_v50 = vsel %vm2898_vm10, nan, %v2908_v31  ;;  %v11377_v56 = vsel %vm2898_vm10, nan, %v4559_v18  ;;  %v3089_v41 = vor.u32 %v3088_v45, %v3087_v9 }
 0x364   : > { %v3092_v52 = vshll.u32 %v3091_v63, 23  ;;  %v2970_v15 = vadd.s32 %v2969_v28, %v2965_v2  ;;  %v3126_v36 = vor.u32 8388608, %v3125_v40  ;;  %v11383_v53 = vshrl.u32 %v3130_v3, 5 }
 0x365   : > { %v3135_v38 = vshll.u32 %v13168_v57, %v3132_v8  ;;  %v3136_v23 = vshrl.u32 %v13162_v1, %v3133_v25  ;;  %v3138_v49 = vshll.u32 %v13162_v1, %v3132_v8  ;;  %v3139_v39 = vshrl.u32 %v13163_v27, %v3133_v25 }
 0x366   : > { %v3093_v54 = vor.u32 4788187, %v3092_v52  ;;  %v2971_v59 = vadd.s32 536870912, %v2970_v15  ;;  %v3141_v9 = vshll.u32 %v13163_v27, %v3132_v8  ;;  %v3096_v20 = vcvt.s32.f32 %v3089_v41 }
 0x367   : > { %v3142_v45 = vshrl.u32 %v13164_v24, %v3133_v25  ;;  %v3144_v40 = vshll.u32 %v13164_v24, %v3132_v8  ;;  %v3134_v3 = vshrl.u32 %v13168_v57, %v3133_v25  ;;  %v3137_v63 = vor.u32 %v3136_v23, %v3135_v38 }
 0x368   : > { %v3094_v47 = vand.u32 2147483647, %v3093_v54  ;;  %v11392_v2 = vshrl.u32 %v2971_v59, 30  ;;  %v3145_v31 = vshrl.u32 %v13165_v11, %v3133_v25  ;;  %vm1758_vm9 = vcmp.eq.s32.totalorder %v10722_v43, 0 }
 0x369   : > { %v3143_v18 = vor.u32 %v3142_v45, %v3141_v9  ;;  %v3147_v28 = vshll.u32 %v13165_v11, %v3132_v8  ;;  %v3148_v27 = vshrl.u32 %v13166_v46, %v3133_v25  ;;  %v3140_v52 = vor.u32 %v3139_v39, %v3138_v49 }
 0x36a   : > { %v3097_v1 = vmul.f32 %v3096_v20, %v3094_v47  ;;  %v2973_v41 = vshll.u32 %v11392_v2, 30  ;;  %v11400_v54 = vshll.u32 %v3126_v36, 8  ;;  %v1759_v24 = vxor.u32 2147483648, %v10762_v14 }
 0x36b   : > { %v3146_v57 = vor.u32 %v3145_v31, %v3144_v40  ;;  %vm3153_vm2 = vcmp.lt.s32.totalorder %v11383_v53, 4  ;;  %vm1757_vm11 = vcmp.lt.s32.totalorder %v10722_v43, 2  ;;  %vm1761_vm14 = vcmp.eq.s32.totalorder %v10722_v43, 2 }
 0x36c   : > { %v3098_v59 = vxor.u32 2147483648, %v3097_v1  ;;  %vm12993_vm10 = vcmp.lt.s32.totalorder %v10615_v10, 0  ;;  %v11407_v11 = vsub.s32 %v2970_v15, %v2973_v41  ;;  %vm3150_vm7 = vcmp.lt.s32.totalorder %v11383_v53, 1 }
 0x36d   : > { %v3155_v46 = vsel %vm3153_vm2, %v3143_v18, 2102212464  ;;  %v1762_v8 = vxor.u32 2147483648, %v10750_v13  ;;  %v3149_v36 = vor.u32 %v3148_v27, %v3147_v28  ;;  %vm3152_vm5 = vcmp.lt.s32.totalorder %v11383_v53, 3 }
 0x36e   : > { %v3099_v25 = vsel %vm3016_vm4, %v3098_v59, %v3097_v1  ;;  %v3154_v38 = vsel %vm3150_vm7, %v3134_v3, %v3137_v63  ;;  %vm1754_vm6 = vweird.f32 %v9933_v44  ;;  %v2976_v23 = vsub.s32 0, %v11407_v11 }
 0x36f   : > { %v3102_v15 = vsel %vm11279_vm0, %v10497_v33, %v3099_v25  ;;  %v3156_v49 = vsel %vm3152_vm5, %v3140_v52, %v3155_v46  ;;  %v3158_v39 = vsel %vm3150_vm7, %v3137_v63, %v3140_v52  ;;  %v2996_v9 = vsub.s32 4, %v11392_v2 }
 0x370   : > { %8910 = vcosq.f32 %v3102_v15  ;;  %vm3151_vm4 = vcmp.lt.s32.totalorder %v11383_v53, 2  ;;  %v3159_v47 = vsel %vm3153_vm2, %v3146_v57, 920167782  ;;  %v8188_v37 = vmin.u32 %v2976_v23, %v11407_v11 }
 0x371   : > { %8912 = vsinq.f32 %v3102_v15  ;;  %v3160_v20 = vsel %vm3152_vm5, %v3143_v18, %v3159_v47  ;;  %v3162_v45 = vsel %vm3150_vm7, %v3140_v52, %v3143_v18  ;;  %vm2589_vm0 = vcmp.lt.s32.totalorder %v10904_v6, 2 }
 0x372   : > { %v3157_v40 = vsel %vm3151_vm4, %v3154_v38, %v3156_v49  ;;  %v3161_v3 = vsel %vm3151_vm4, %v3158_v39, %v3160_v20  ;;  %v3163_v63 = vsel %vm3153_vm2, %v3149_v36, 1326507024  ;;  %v1760_v31 = vsel %vm1758_vm9, %v10750_v13, %v1759_v24  ;;  %v13244_v20 = vld [vmem:[#allocation50_spill] sm:$0xff] }
 0x373   : > { %vm2586_vm12 = vweird.f32 %v9948_v32  ;;  %v2978_v1 = vclz %v8188_v37  ;;  %v3164_v18 = vsel %vm3152_vm5, %v3146_v57, %v3163_v63  ;;  %vm3113_vm1 = vcmp.eq.s32.totalorder %v11352_v58, 2 }
 0x374   : > { %v11452_v28 = vmul.u32.u64.low %v11400_v54, %v3161_v3  ;;  %v11453_v27 = vmul.u32.u64.high %v11400_v54, %v3161_v3, %v11452_v28  ;;  %vm4762_vm15 = vcmp.eq.s32.totalorder %v11354_v7, 2  ;;  %v2966_v41 = vadd.s32 %v11320_v5, %v11344_v29 }
 0x375   : > { %v3165_v52 = vsel %vm3151_vm4, %v3162_v45, %v3164_v18  ;;  %v1763_v59 = vsel %vm1761_vm14, %v1762_v8, %v10762_v14  ;;  %v2591_v57 = vxor.u32 2147483648, %v10996_v60  ;;  %vm3110_vm9 = vcmp.eq.s32.totalorder %v11352_v58, 0 }
 0x376   : > { %vm4759_vm2 = vcmp.eq.s32.totalorder %v11354_v7, 0  ;;  %v8189_v46 = vadd.s32 4294967294, %v2978_v1  ;;  %v11471_v25 = vmul.u32.u64.low %v11400_v54, %v3165_v52  ;;  %v11472_v36 = vmul.u32.u64.high %v11400_v54, %v3165_v52, %v11471_v25 }
 0x377   : > { %v1764_v5 = vsel %vm1757_vm11, %v1760_v31, %v1763_v59  ;;  %vm3109_vm7 = vcmp.lt.s32.totalorder %v11352_v58, 2  ;;  %vm4758_vm5 = vcmp.lt.s32.totalorder %v11354_v7, 2  ;;  %v11481_v29 = vsel %vm12993_vm10, %v2996_v9, %v11392_v2 }
 0x378   : > { %v3173_v53 = vmul.u32 %v11400_v54, %v3157_v40  ;;  %vm2590_vm14 = vcmp.eq.s32.totalorder %v10904_v6, 0  ;;  %v2594_v38 = vxor.u32 2147483648, %v10993_v26  ;;  %vm3106_vm4 = vweird.f32 %v10497_v33 }
 0x379   : > { %vm8190_vm3 = vcmp.lt.s32.totalorder %v8189_v46, 0  ;;  %v3176_v43 = vadd.s32 1, %v11453_v27  ;;  %v2592_v15 = vsel %vm2590_vm14, %v10993_v26, %v2591_v57  ;;  %vm2593_vm11 = vcmp.eq.s32.totalorder %v10904_v6, 2 }
 0x37a   : > { %v2981_v23 = vsel %vm8190_vm3, 0, %v8189_v46  ;;  %v1765_v2 = vsel %vm1754_vm6, nan, %v1764_v5  ;;  %v2595_v54 = vsel %vm2593_vm11, %v2594_v38, %v10996_v60  ;;  %vm1966_vm10 = vcmp.eq.s32.totalorder %v10744_v34, 0  ;;  %v8911_v9 = vpop.eup %8910 }
 0x37b   : > { %v2982_v49 = vsub.s32 32, %v2981_v23  ;;  %v2986_v39 = vsub.s32 4294967266, %v2981_v23  ;;  %v2983_v47 = vshll.u32 %v11407_v11, %v2981_v23  ;;  %vm3175_vm14 = vc.u32 %v11472_v36, %v11452_v28  ;;  %v8913_v40 = vpop.eup %8912 }
 0x37c   : > { %v2596_v37 = vsel %vm2589_vm0, %v2592_v15, %v2595_v54  ;;  %v1967_v45 = vxor.u32 2147483648, %v13244_v20  ;;  %v3114_v3 = vxor.u32 2147483648, %v8911_v9  ;;  %v3177_v1 = vsel %vm3175_vm14, %v3176_v43, %v11453_v27  ;;  %v13250_v54 = vld [vmem:[#allocation35_spill] sm:$0xff] }
 0x37d   : > { %v2984_v63 = vshrl.u32 %v2966_v41, %v2982_v49  ;;  %v2987_v31 = vadd.s32 127, %v2986_v39  ;;  %v3111_v18 = vxor.u32 2147483648, %v8913_v40  ;;  %v3178_v52 = vadd.s32 %v3177_v1, %v3173_v53 }
 0x37e   : > { %v2597_v59 = vsel %vm2586_vm12, nan, %v2596_v37  ;;  %vm1969_vm3 = vcmp.eq.s32.totalorder %v10744_v34, 2  ;;  %v3115_v11 = vsel %vm3113_vm1, %v3114_v3, %v8913_v40  ;;  %v4764_v6 = vsel %vm4762_vm15, %v3114_v3, %v8913_v40  ;;  %v13251_v37 = vld [vmem:[#allocation49_spill] sm:$0xff] }
 0x37f   : > { %v2985_v46 = vor.u32 %v2984_v63, %v2983_v47  ;;  %v2988_v25 = vshll.u32 %v2987_v31, 23  ;;  %vm9006_vm0 = vmmov 1   ;;  %v13247_v27 = vand.u32 2147483647, %v13220_v55  ;;  %v13252_v63 = vld [vmem:[#allocation51_spill] sm:$0xff] }
 0x380   : > { %vm11513_vm11 = vmpackc.low %vm4891_vm13, %vm9006_vm0  ;;  %v3112_v53 = vsel %vm3110_vm9, %v8911_v9, %v3111_v18  ;;  %v4761_v43 = vsel %vm4759_vm2, %v8911_v9, %v3111_v18  ;;  %v3179_v15 = vadd.s32 536870912, %v3178_v52  ;;  %v8557_v23 = vpack.c.bf16 %v2597_v59, %v1765_v2  ;;  %v13253_v59 = vld [vmem:[#allocation43_spill] sm:$0xff] }
 0x381   : > { %vm11519_vm14 = vcmp.le.f32.partialorder %v13247_v27, 0.7853982  ;;  %vm12995_vm1 = vweird.f32 %v13250_v54  ;;  %vm12994_vm13 = vweird.f32 %v9950_v21  ;;  %v3116_v49 = vsel %vm3109_vm7, %v3112_v53, %v3115_v11  ;;  %v13254_v11 = vld [vmem:[#allocation42_spill] sm:$0xff] }
 0x382   : > { %v4765_v39 = vsel %vm4758_vm5, %v4761_v43, %v4764_v6  ;;  %v2989_v47 = vor.u32 4788187, %v2988_v25  ;;  %v1968_v40 = vsel %vm1966_vm10, %v13251_v37, %v1967_v45  ;;  %v11540_v2 = vsel %vm3106_vm4, nan, %v3116_v49  ;;  %8559 = vmatprep.subr.msk.bf16.mxu0 %vm11513_vm11, %v8557_v23  ;;  %v11581_v49 = vld [vmem:[%s12821_s3] sm:$0xff] }
 0x383   : > { %v11544_v9 = vsel %vm3106_vm4, nan, %v4765_v39  ;;  %v11546_v58 = vshrl.u32 %v3179_v15, 30  ;;  %v1970_v7 = vxor.u32 2147483648, %v13251_v37  ;;  %v2992_v18 = vcvt.s32.f32 %v2985_v46 }
 0x384   : > { %v2990_v1 = vand.u32 2147483647, %v2989_v47  ;;  %v13255_v33 = vpack.c.bf16 %v13253_v59, %v13254_v11  ;;  %v2370_v6 = vxor.u32 2147483648, %v11324_v48  ;;  %v13256_v25 = vand.u32 2147483647, %v10615_v10 }
 0x385   : > { %v3181_v53 = vshll.u32 %v11546_v58, 30  ;;  %v1971_v46 = vsel %vm1969_vm3, %v1970_v7, %v13244_v20  ;;  %vm1965_vm15 = vcmp.lt.s32.totalorder %v10744_v34, 2  ;;  %v2799_v23 = vxor.u32 2147483648, %v11215_v0 }
 0x386   : > { %8562 = vmatpush1.bf16.msk.msra.mxu0 %vm11513_vm11, %v13255_v33  ;;  %vm11563_vm10 = vcmp.le.f32.partialorder %v13256_v25, 0.7853982  ;;  %v2993_v43 = vmul.f32 %v2992_v18, %v2990_v1  ;;  %v1972_v47 = vsel %vm1965_vm15, %v1968_v40, %v1971_v46  ;;  %vm2798_vm9 = vcmp.eq.s32.totalorder %v11166_v62, 0 }
 0x387   : > { %v2999_v15 = vsel %vm11563_vm10, 0, %v11481_v29  ;;  %v11583_v39 = vsub.s32 %v3178_v52, %v3181_v53  ;;  %v2802_v1 = vxor.u32 2147483648, %v11213_v42  ;;  %v2800_v29 = vsel %vm2798_vm9, %v11213_v42, %v2799_v23 }
 0x388   : > { %v2994_v18 = vxor.u32 2147483648, %v2993_v43  ;;  %vm2801_vm2 = vcmp.eq.s32.totalorder %v11166_v62, 2  ;;  %vm4878_vm7 = vcmask 97280   ;;  %v2371_v34 = vsel %vm2288_vm8, %v2370_v6, %v11324_v48 }
 0x389   : > { %v3184_v52 = vsub.s32 0, %v11583_v39  ;;  %vm2797_vm5 = vcmp.lt.s32.totalorder %v11166_v62, 2  ;;  %v2803_v40 = vsel %vm2801_vm2, %v2802_v1, %v11215_v0  ;;  %8265 = vmatmul.mubr.msk.f32.vlgmr.msra.gmra.mrb[16].mxu0 %vm4878_vm7, %v11581_v49  ;;  %v11604_v59 = vsel %vm11519_vm14, 0, %v11254_v61  ;;  %v11612_v62 = vld [vmem:[%s12821_s3 + $0x8] sm:$0xff] }
 0x38a   : > { %vm13259_vm4 = vcmp.lt.s32.totalorder %v10615_v10, 0  ;;  %v3003_v48 = vadd.s32 3, %v2999_v15  ;;  %v2804_v33 = vsel %vm2797_vm5, %v2800_v29, %v2803_v40  ;;  %v13260_v6 = vmov 0.0   ;;  %v13261_v40 = vld [vmem:[#allocation48_spill] sm:$0xff] }
 0x38b   : > { %v2995_v11 = vsel %vm13259_vm4, %v2994_v18, %v2993_v43  ;;  %4986 = vmatprep.mubr.f32.mxu0 %v13260_v6  ;;  %v8196_v53 = vmin.u32 %v3184_v52, %v11583_v39  ;;  %v1973_v61 = vsel %vm12995_vm1, nan, %v1972_v47  ;;  %v2805_v46 = vsel %vm12994_vm13, nan, %v2804_v33  ;;  %v13262_v52 = vld [vmem:[#allocation40_spill] sm:$0xff] }
 0x38c   : > { %v2998_v25 = vsel %vm11563_vm10, %v10615_v10, %v2995_v11  ;;  %v2374_v43 = vsel %vm11519_vm14, %v13220_v55, %v2371_v34  ;;  %v8563_v18 = vpack.c.bf16 %v2805_v46, %v1973_v61  ;;  %v2175_v29 = vxor.u32 2147483648, %v11235_v19  ;;  %v13263_v33 = vld [vmem:[#allocation52_spill] sm:$0xff]  ;;  %v13264_v46 = vld [vmem:[#allocation46_spill] sm:$0xff] }
 0x38d   : > { %8914 = vcosq.f32 %v2998_v25  ;;  %v11627_v31 = vand.u32 3, %v13261_v40  ;;  %v3186_v27 = vclz %v8196_v53  ;;  %8266 = vmatmul.mubr.msk.f32.gmra.mrb[18].mxu0 %vm4878_vm7, %v11612_v62  ;;  %v2178_v47 = vxor.u32 2147483648, %v11220_v51  ;;  %v13265_v40 = vld [vmem:[#allocation45_spill] sm:$0xff] }
 0x38e   : > { %8916 = vsinq.f32 %v2998_v25  ;;  %v11633_v11 = vand.u32 3, %v13262_v52  ;;  %v11636_v5 = vand.u32 3, %v13263_v33  ;;  %v11639_v34 = vadd.s32 3, %v11604_v59  ;;  %8565 = vmatprep.subr.msk.bf16.mxu1 %vm11513_vm11, %v8563_v18  ;;  %4992 = vmatprep.mubr.f32.mxu0 %v13260_v6  ;;  %v11649_v25 = vld [vmem:[%s12821_s3 + $0x10] sm:$0xff] }
 0x38f   : > { %v11641_v61 = vand.u32 3, %v3003_v48  ;;  %8918 = vcosq.f32 %v2374_v43  ;;  %v8197_v53 = vadd.s32 4294967294, %v3186_v27  ;;  %v13266_v52 = vpack.c.bf16 %v13264_v46, %v13265_v40  ;;  %v13267_v48 = vld [vmem:[#allocation53_spill] sm:$0xff] }
 0x390   : > { %vm2174_vm8 = vcmp.eq.s32.totalorder %v13267_v48, 0  ;;  %vm2177_vm3 = vcmp.eq.s32.totalorder %v13267_v48, 2  ;;  %8920 = vsinq.f32 %v2374_v43  ;;  %v11658_v18 = vand.u32 3, %v2999_v15  ;;  %v11678_v43 = vld [vmem:[%s12821_s3 + $0x18] sm:$0xff] }
 0x391   : > { %8568 = vmatpush1.bf16.msk.msra.mxu1 %vm11513_vm11, %v13266_v52  ;;  %v2176_v33 = vsel %vm2174_vm8, %v11220_v51, %v2175_v29  ;;  %v2179_v27 = vsel %vm2177_vm3, %v2178_v47, %v11235_v19  ;;  %v3174_v46 = vadd.s32 %v11452_v28, %v11472_v36  ;;  %vm8198_vm0 = vcmp.lt.s32.totalorder %v8197_v53, 0  ;;  %8267 = vmatmul.mubr.msk.f32.gmra.mrb[20].mxu0 %vm4878_vm7, %v11649_v25  ;;  %v13268_v28 = vld [vmem:[#allocation38_spill] sm:$0xff] }
 0x392   : > { %vm2173_vm14 = vcmp.lt.s32.totalorder %v13267_v48, 2  ;;  %v3189_v15 = vsel %vm8198_vm0, 0, %v8197_v53  ;;  %4998 = vmatprep.mubr.f32.mxu0 %v13260_v6  ;;  %vm3005_vm10 = vcmp.lt.s32.totalorder %v11641_v61, 2  ;;  %vm3006_vm15 = vcmp.eq.s32.totalorder %v11641_v61, 0  ;;  %v13269_v48 = vld [vmem:[#allocation41_spill] sm:$0xff] }
 0x393   : > { %vm3009_vm9 = vcmp.eq.s32.totalorder %v11641_v61, 2  ;;  %vm2170_vm2 = vweird.f32 %v13268_v28  ;;  %vm3002_vm5 = vweird.f32 %v10615_v10  ;;  %v3190_v36 = vsub.s32 32, %v3189_v15  ;;  %v6070_v10 = vld [vmem:[%s12823_s5 + $0x10] sm:$0xff] }
 0x394   : > { %8271 = vmatmul.mubr.msk.f32.vlgmr.msra.gmra.mrb[16].mxu1 %vm4878_vm7, %v11581_v49  ;;  %v3194_v53 = vsub.s32 4294967266, %v3189_v15  ;;  %v2180_v52 = vsel %vm2173_vm14, %v2176_v33, %v2179_v27  ;;  %vm3419_vm4 = vcmp.lt.s32.totalorder %v13269_v48, 2  ;;  %v3191_v22 = vshll.u32 %v11583_v39, %v3189_v15 }
 0x395   : > { %5075 = vmatprep.mubr.f32.mxu1 %v13260_v6  ;;  %vm3420_vm8 = vcmp.eq.s32.totalorder %v13269_v48, 0  ;;  %vm3423_vm3 = vcmp.eq.s32.totalorder %v13269_v48, 2  ;;  %vm4243_vm0 = vcmp.lt.s32.totalorder %v11627_v31, 2  ;;  %v3192_v3 = vshrl.u32 %v3174_v46, %v3190_v36  ;;  %8268 = vmatmul.mubr.msk.f32.gmra.mrb[22].mxu0 %vm4878_vm7, %v11678_v43  ;;  %v13270_v46 = vld [vmem:[#allocation36_spill] sm:$0xff] }
 0x396   : > { %v3195_v16 = vadd.s32 127, %v3194_v53  ;;  %v3422_v40 = vsel %vm3420_vm8, %v10750_v13, %v1759_v24  ;;  %v3425_v33 = vsel %vm3423_vm3, %v1762_v8, %v10762_v14  ;;  %5158 = vmatprep.mubr.f32.mxu0 %v13260_v6  ;;  %vm4244_vm14 = vcmp.eq.s32.totalorder %v11627_v31, 0 }
 0x397   : > { %v11699_v39 = vpop.eup %8914  ;;  %v3426_v27 = vsel %vm3419_vm4, %v3422_v40, %v3425_v33  ;;  %vm4247_vm13 = vcmp.eq.s32.totalorder %v11627_v31, 2  ;;  %vm3625_vm1 = vcmp.lt.s32.totalorder %v13270_v46, 2  ;;  %vm3120_vm8 = vcmp.lt.s32.totalorder %v10711_v35, 0 }
 0x398   : > { %8272 = vmatmul.mubr.msk.f32.gmra.mrb[18].mxu1 %vm4878_vm7, %v11612_v62  ;;  %v11707_v15 = vpop.eup %8916  ;;  %v3193_v13 = vor.u32 %v3192_v3, %v3191_v22  ;;  %v3196_v14 = vshll.u32 %v3195_v16, 23  ;;  %v3010_v24 = vxor.u32 2147483648, %v11699_v39  ;;  %v11714_v8 = vsel %vm1754_vm6, nan, %v3426_v27 }
 0x399   : > { %5081 = vmatprep.mubr.f32.mxu1 %v13260_v6  ;;  %v3007_v40 = vxor.u32 2147483648, %v11707_v15  ;;  %v4246_v36 = vsel %vm4244_vm14, %v10993_v26, %v2591_v57  ;;  %v4249_v53 = vsel %vm4247_vm13, %v2594_v38, %v10996_v60  ;;  %vm3626_vm4 = vcmp.eq.s32.totalorder %v13270_v46, 0  ;;  %v11724_v16 = vpop.eup %8918 }
 0x39a   : > { %v3197_v22 = vor.u32 4788187, %v3196_v14  ;;  %v3200_v3 = vcvt.s32.f32 %v3193_v13  ;;  %v3011_v44 = vsel %vm3009_vm9, %v3010_v24, %v11707_v15  ;;  %v4250_v48 = vsel %vm4243_vm0, %v4246_v36, %v4249_v53  ;;  %v11731_v33 = vpop.eup %8920 }
 0x39b   : > { %v3008_v26 = vsel %vm3006_vm15, %v11699_v39, %v3007_v40  ;;  %v11740_v60 = vsel %vm2586_vm12, nan, %v4250_v48  ;;  %v3628_v57 = vsel %vm3626_vm4, %v13251_v37, %v1967_v45  ;;  %vm3629_vm6 = vcmp.eq.s32.totalorder %v13270_v46, 2 }
 0x39c   : > { %8273 = vmatmul.mubr.msk.f32.gmra.mrb[20].mxu1 %vm4878_vm7, %v11649_v25  ;;  %v3198_v38 = vand.u32 2147483647, %v3197_v22  ;;  %v3012_v31 = vsel %vm3005_vm10, %v3008_v26, %v3011_v44  ;;  %v8581_v27 = vpack.c.bf16 %v11740_v60, %v11714_v8  ;;  %v3631_v32 = vsel %vm3629_vm6, %v1970_v7, %v13244_v20  ;;  %v13286_v8 = vld [vmem:[#allocation30_spill] sm:$0xff]  ;;  %v4872_v60 = vld [vmem:[%s12820_s2 + $0x10] sm:$0xff] }
 0x39d   : > { %5087 = vmatprep.mubr.f32.mxu1 %v13260_v6  ;;  %v2181_v13 = vsel %vm2170_vm2, nan, %v2180_v52  ;;  %v3013_v45 = vsel %vm3002_vm5, nan, %v3012_v31  ;;  %v3632_v14 = vsel %vm3625_vm1, %v3628_v57, %v3631_v32  ;;  %vm4450_vm12 = vcmp.eq.s32.totalorder %v11633_v11, 0 }
 0x39e   : > { %v3201_v61 = vmul.f32 %v3200_v3, %v3198_v38  ;;  %v8569_v36 = vpack.c.bf16 %v3013_v45, %v2181_v13  ;;  %vm13271_vm13 = vweird.f32 %v13250_v54  ;;  %v4452_v20 = vsel %vm4450_vm12, %v11213_v42, %v2799_v23 }
 0x39f   : > { %v11763_v53 = vsel %vm13271_vm13, nan, %v3632_v14  ;;  %vm4449_vm10 = vcmp.lt.s32.totalorder %v11633_v11, 2  ;;  %vm4453_vm15 = vcmp.eq.s32.totalorder %v11633_v11, 2  ;;  %vm3832_vm1 = vcmp.eq.s32.totalorder %v11636_v5, 0  ;;  %v6160_v14 = vld [vmem:[%s12825_s7] sm:$0xff] }
 0x3a0   : > { %8274 = vmatmul.mubr.msk.f32.gmra.mrb[22].mxu1 %vm4878_vm7, %v11678_v43  ;;  %vm3835_vm9 = vcmp.eq.s32.totalorder %v11636_v5, 2  ;;  %v3202_v37 = vxor.u32 2147483648, %v3201_v61  ;;  %8571 = vmatprep.subr.msk.bf16.mxu0 %vm11513_vm11, %v8569_v36  ;;  %v4455_v54 = vsel %vm4453_vm15, %v2802_v1, %v11215_v0  ;;  %v3834_v7 = vsel %vm3832_vm1, %v11220_v51, %v2175_v29 }
 0x3a1   : > { %5247 = vmatprep.mubr.f32.mxu1 %v13260_v6  ;;  %v3837_v23 = vsel %vm3835_vm9, %v2178_v47, %v11235_v19  ;;  %vm3119_vm3 = vcmp.le.f32.partialorder %v3118_v4, 0.7853982  ;;  %v13272_v11 = vsub.s32 4, %v11546_v58  ;;  %v13273_v42 = vpack.c.bf16 %v11373_v50, %v11179_v30  ;;  %v13274_v19 = vld [vmem:[#allocation29_spill] sm:$0xff]  ;;  %v13277_v47 = vld [vmem:[#allocation27_spill] sm:$0xff] }
 0x3a2   : > { %v4456_v0 = vsel %vm4449_vm10, %v4452_v20, %v4455_v54  ;;  %vm4656_vm0 = vcmp.eq.s32.totalorder %v11658_v18, 0  ;;  %v3203_v51 = vsel %vm3120_vm8, %v3202_v37, %v3201_v61  ;;  %vm13275_vm14 = vcmask 1042432   ;;  %v11870_v54 = vld [vmem:[%s12820_s2] sm:$0xff] }
 0x3a3   : > { %v3205_v52 = vsel %vm3120_vm8, %v13272_v11, %v11546_v58  ;;  %8574 = vmatpush1.bf16.msk.msra.mxu0 %vm11513_vm11, %v13273_v42  ;;  %vm13276_vm4 = vweird.f32 %v9950_v21  ;;  %vm3831_vm6 = vcmp.lt.s32.totalorder %v11636_v5, 2  ;;  %v4658_v30 = vsel %vm4656_vm0, %v11699_v39, %v3007_v40  ;;  %vm13278_vm13 = vmmov %vm13275_vm14  ;;  %v13279_v39 = vld [vmem:[#allocation33_spill] sm:$0xff] }
 0x3a4   : > { %8287 = vmatprep.subr.msk.mxu0 %vm13275_vm14, %v13274_v19  ;;  %v11805_v4 = vsel %vm13276_vm4, nan, %v4456_v0  ;;  %v3206_v50 = vsel %vm3119_vm3, %v10711_v35, %v3203_v51  ;;  %v3838_v1 = vsel %vm3831_vm6, %v3834_v7, %v3837_v23  ;;  %vm4659_vm12 = vcmp.eq.s32.totalorder %v11658_v18, 2  ;;  %vm13280_vm10 = vmmov %vm13278_vm13  ;;  %v6162_v51 = vld [vmem:[%s12825_s7 + $0x10] sm:$0xff] }
 0x3a5   : > { %v8587_v58 = vpack.c.bf16 %v11805_v4, %v11763_v53  ;;  %v3207_v29 = vsel %vm3119_vm3, 0, %v3205_v52  ;;  %8922 = vcosq.f32 %v3206_v50  ;;  %vm4655_vm8 = vcmp.lt.s32.totalorder %v11658_v18, 2  ;;  %v6068_v18 = vld [vmem:[%s12823_s5] sm:$0xff]  ;;  %v5641_v53 = vld [vmem:[%s12822_s4 + $0x8] sm:$0xff] }
 0x3a6   : > { %8277 = vmatmul.mubr.msk.f32.vlgmr.msra.gmra.mrb[24].mxu0 %vm4878_vm7, %v11581_v49  ;;  %v4661_v21 = vsel %vm4659_vm12, %v3010_v24, %v11707_v15  ;;  %8924 = vsinq.f32 %v3206_v50  ;;  %v11824_v46 = vsel %vm2170_vm2, nan, %v3838_v1  ;;  %v3211_v15 = vadd.s32 3, %v3207_v29  ;;  %v13310_v4 = vld [vmem:[#allocation39_spill] sm:$0xff] }
 0x3a7   : > { %8288 = vmatpush1.msk.msra.mxu0 %vm13278_vm13, %v13277_v47  ;;  %5164 = vmatprep.mubr.f32.mxu0 %v13260_v6  ;;  %v4662_v5 = vsel %vm4655_vm8, %v4658_v30, %v4661_v21  ;;  %v2380_v22 = vand.u32 3, %v11639_v34  ;;  %v9007_v28 = vmov 0   ;;  %v4036_v3 = vand.u32 3, %v11604_v59  ;;  %v6069_v34 = vld [vmem:[%s12823_s5 + $0x8] sm:$0xff]  ;;  %v6071_v59 = vld [vmem:[%s12823_s5 + $0x18] sm:$0xff] }
 0x3a8   : > { %8299 = vmatprep.subr.msk.mxu0 %vm13280_vm10, %v13279_v39  ;;  %v11828_v40 = vsel %vm3002_vm5, nan, %v4662_v5  ;;  %8860 = vset.pattern.permute.xlu0 %v9007_v28  ;;  %v2383_v44 = vxor.u32 2147483648, %v11731_v33  ;;  %v2386_v48 = vxor.u32 2147483648, %v11724_v16  ;;  %v3212_v26 = vand.u32 3, %v3211_v15  ;;  %v11893_v21 = vld [vmem:[%s12820_s2 + $0x8] sm:$0xff] }
 0x3a9   : > { %v8593_v24 = vpack.c.bf16 %v11828_v40, %v11824_v46  ;;  %6074 = vperm.xlu0 %8860, %v6068_v18   ;;  %8861 = vset.pattern.permute.xlu1 %v9007_v28  ;;  %v4860_v57 = vand.u32 3, %v3207_v29  ;;  %vm2382_vm2 = vcmp.eq.s32.totalorder %v2380_v22, 0  ;;  %vm2385_vm5 = vcmp.eq.s32.totalorder %v2380_v22, 2  ;;  %v13282_v29 = vld [vmem:[#allocation31_spill] sm:$0xff]  ;;  %v6586_v5 = vld [vmem:[%s12827_s9] sm:$0xf] }
 0x3aa   : > { %8278 = vmatmul.mubr.msk.f32.gmra.mrb[26].mxu0 %vm4878_vm7, %v11612_v62  ;;  %6084 = vperm.xlu1 %8861, %v6070_v10   ;;  %v2384_v38 = vsel %vm2382_vm2, %v11724_v16, %v2383_v44  ;;  %v2387_v31 = vsel %vm2385_vm5, %v2386_v48, %v11731_v33  ;;  %vm4038_vm15 = vcmp.eq.s32.totalorder %v4036_v3, 0  ;;  %vm4041_vm1 = vcmp.eq.s32.totalorder %v4036_v3, 2  ;;  %v13296_v18 = vld [vmem:[#allocation37_spill] sm:$0xff] }
 0x3ab   : > { %5170 = vmatprep.mubr.f32.mxu0 %v13260_v6  ;;  %v4040_v13 = vsel %vm4038_vm15, %v11724_v16, %v2383_v44  ;;  %v4043_v45 = vsel %vm4041_vm1, %v2386_v48, %v11731_v33  ;;  %vm2381_vm9 = vcmp.lt.s32.totalorder %v2380_v22, 2  ;;  %vm3214_vm3 = vcmp.eq.s32.totalorder %v3212_v26, 0  ;;  %v6161_v16 = vld [vmem:[%s12825_s7 + $0x8] sm:$0xff]  ;;  %v5643_v46 = vld [vmem:[%s12822_s4 + $0x18] sm:$0xff] }
 0x3ac   : > { %vm3217_vm0 = vcmp.eq.s32.totalorder %v3212_v26, 2  ;;  %v2388_v20 = vsel %vm2381_vm9, %v2384_v38, %v2387_v31  ;;  %vm4037_vm14 = vcmp.lt.s32.totalorder %v4036_v3, 2  ;;  %vm4865_vm4 = vcmp.eq.s32.totalorder %v4860_v57, 2 }
 0x3ad   : > { %6079 = vperm.xlu0 %8860, %v6069_v34   ;;  %v4044_v7 = vsel %vm4037_vm14, %v4040_v13, %v4043_v45  ;;  %vm4862_vm6 = vcmp.eq.s32.totalorder %v4860_v57, 0  ;;  %vm3213_vm12 = vcmp.lt.s32.totalorder %v3212_v26, 2  ;;  %vm4861_vm8 = vcmp.lt.s32.totalorder %v4860_v57, 2 }
 0x3ae   : > { %8279 = vmatmul.mubr.msk.f32.gmra.mrb[28].mxu0 %vm4878_vm7, %v11649_v25  ;;  %6089 = vperm.xlu1 %8861, %v6071_v59   ;;  %vm2378_vm13 = vweird.f32 %v13220_v55  ;;  %vm3210_vm10 = vweird.f32 %v10711_v35  ;;  %vm13281_vm2 = vcmask 23552   ;;  %v6163_v35 = vld [vmem:[%s12825_s7 + $0x18] sm:$0xff]  ;;  %vm13283_vm5 = vcmask 1042432  }
 0x3af   : > { %5176 = vmatprep.mubr.f32.mxu0 %v13260_v6  ;;  %v8923_v32 = vpop.eup %8922  ;;  %v2389_v19 = vsel %vm2378_vm13, nan, %v2388_v20  ;;  %v11880_v50 = vsel %vm2378_vm13, nan, %v4044_v7  ;;  %v13284_v39 = vpack.c.bf16 %v11540_v2, %v11185_v12  ;;  %vm13285_vm15 = vmmov %vm13281_vm2  ;;  %v13288_v12 = vld [vmem:[#allocation28_spill] sm:$0xff]  ;;  %v13290_v2 = vld [vmem:[#allocation34_spill] sm:$0xff]  ;;  %v13314_v40 = vpack.c.bf16 %v11544_v9, %v13252_v63 }
 0x3b0   : > { %v8925_v61 = vpop.eup %8924  ;;  %v3218_v36 = vxor.u32 2147483648, %v8923_v32  ;;  %vm13287_vm1 = vmmov %vm13283_vm5 }
 0x3b1   : > { %v3215_v37 = vxor.u32 2147483648, %v8925_v61  ;;  %6166 = vperm.xlu0 %8860, %v6160_v14   ;;  %vm13289_vm9 = vmmov %vm13287_vm1 }
 0x3b2   : > { %8280 = vmatmul.mubr.msk.f32.gmra.mrb[30].mxu0 %vm4878_vm7, %v11678_v43  ;;  %v3219_v33 = vsel %vm3217_vm0, %v3218_v36, %v8925_v61  ;;  %v4867_v23 = vsel %vm4865_vm4, %v3218_v36, %v8925_v61  ;;  %6171 = vperm.xlu1 %8861, %v6161_v16   ;;  %vm13292_vm0 = vmmov %vm13281_vm2 }
 0x3b3   : > { %5348 = vmatprep.mubr.f32.mxu0 %v13260_v6  ;;  %v3216_v11 = vsel %vm3214_vm3, %v8923_v32, %v3215_v37  ;;  %v4864_v52 = vsel %vm4862_vm6, %v8923_v32, %v3215_v37  ;;  %vm13291_vm3 = vmmov %vm13287_vm1 }
 0x3b4   : > { %v3220_v42 = vsel %vm3213_vm12, %v3216_v11, %v3219_v33  ;;  %v4868_v0 = vsel %vm4861_vm8, %v4864_v52, %v4867_v23  ;;  %vm13293_vm14 = vmmov %vm13292_vm0 }
 0x3b5   : > { %v3221_v30 = vsel %vm3210_vm10, nan, %v3220_v42  ;;  %v11882_v1 = vsel %vm3210_vm10, nan, %v4868_v0  ;;  %6176 = vperm.xlu0 %8860, %v6162_v51   ;;  %vm13294_vm4 = vmmov %vm13292_vm0 }
 0x3b6   : > { %8289 = vmatmul.mubr.msk.f32.vlgmr.msra.gmra.mrb[16].mxu0 %vm13281_vm2, %v11870_v54  ;;  %v8575_v55 = vpack.c.bf16 %v3221_v30, %v2389_v19  ;;  %v8599_v47 = vpack.c.bf16 %v11882_v1, %v11880_v50  ;;  %6181 = vperm.xlu1 %8861, %v6163_v35   ;;  %vm13298_vm6 = vmmov %vm13292_vm0 }
 0x3b7   : > { %8300 = vmatpush1.msk.msra.mxu0 %vm13283_vm5, %v13282_v29  ;;  %5354 = vmatprep.mubr.f32.mxu0 %v13260_v6  ;;  %vm13299_vm12 = vmmov %vm13292_vm0 }
 0x3b8   : > { %8583 = vmatprep.subr.msk.bf16.mxu0 %vm11513_vm11, %v8581_v27  ;;  %8577 = vmatprep.subr.msk.bf16.mxu1 %vm11513_vm11, %v8575_v55  ;;  %v4873_v27 = vld [vmem:[%s12820_s2 + $0x18] sm:$0xff]  ;;  %vm13301_vm8 = vmmov %vm13287_vm1  ;;  %v12073_v55 = vld [vmem:[%s12824_s6] sm:$0xff] }
 0x3b9   : > { %8580 = vmatpush1.bf16.msk.msra.mxu1 %vm11513_vm11, %v13284_v39  ;;  %6589 = vperm.xlu0 %8860, %v6586_v5   ;;  %vm13302_vm13 = vmmov %vm13292_vm0 }
 0x3ba   : > { %8290 = vmatmul.mubr.msk.f32.gmra.mrb[18].mxu0 %vm13285_vm15, %v11893_v21  ;;  %8293 = vmatprep.subr.msk.mxu1 %vm13287_vm1, %v13286_v8  ;;  %vm13303_vm10 = vmmov %vm13292_vm0 }
 0x3bb   : > { %5360 = vmatprep.mubr.f32.mxu0 %v13260_v6  ;;  %vm13304_vm2 = vmmov %vm13292_vm0 }
 0x3bc   : > { %8283 = vmatmul.mubr.msk.f32.vlgmr.msra.gmra.mrb[24].mxu1 %vm4878_vm7, %v11581_v49  ;;  %v13295_v49 = vld [vmem:[#allocation44_spill] sm:$0xff]  ;;  %vm13305_vm5 = vmmov %vm13292_vm0 }
 0x3bd   : > { %8294 = vmatpush1.msk.msra.mxu1 %vm13289_vm9, %v13288_v12  ;;  %5253 = vmatprep.mubr.f32.mxu1 %v13260_v6  ;;  %v13297_v15 = vpack.c.bf16 %v13295_v49, %v13296_v18  ;;  %vm13307_vm15 = vmmov %vm13292_vm0  ;;  %v12083_v18 = vld [vmem:[%s12824_s6 + $0x8] sm:$0xff] }
 0x3be   : > { %8305 = vmatprep.subr.msk.mxu1 %vm13291_vm3, %v13290_v2  ;;  %8291 = vmatmul.mubr.msk.f32.gmra.mrb[20].mxu0 %vm13292_vm0, %v4872_v60  ;;  %vm13308_vm1 = vmmov %vm13292_vm0 }
 0x3bf   : > { %5366 = vmatprep.mubr.f32.mxu0 %v13260_v6  ;;  %vm13312_vm9 = vmmov %vm13292_vm0 }
 0x3c0   : > { %8284 = vmatmul.mubr.msk.f32.gmra.mrb[26].mxu1 %vm4878_vm7, %v11612_v62  ;;  %v13300_v62 = vld [vmem:[#allocation32_spill] sm:$0xff]  ;;  %vm13313_vm3 = vmmov %vm13292_vm0 }
 0x3c1   : > { %5259 = vmatprep.mubr.f32.mxu1 %v13260_v6 }
 0x3c2   : > { %8292 = vmatmul.mubr.msk.f32.gmra.mrb[22].mxu0 %vm13293_vm14, %v4873_v27 }
 0x3c3   : > { %5526 = vmatprep.mubr.f32.mxu0 %v13260_v6 }
 0x3c4   : > { %8285 = vmatmul.mubr.msk.f32.gmra.mrb[28].mxu1 %vm4878_vm7, %v11649_v25  ;;  %v5640_v25 = vld [vmem:[%s12822_s4] sm:$0xff] }
 0x3c5   : > { %5265 = vmatprep.mubr.f32.mxu1 %v13260_v6 }
 0x3c6   : > { %8301 = vmatmul.mubr.msk.f32.vlgmr.msra.gmra.mrb[24].mxu0 %vm13294_vm4, %v11870_v54 }
 0x3c7   : > { %8586 = vmatpush1.bf16.msk.msra.mxu0 %vm11513_vm11, %v13297_v15  ;;  %5532 = vmatprep.mubr.f32.mxu0 %v13260_v6 }
 0x3c8   : > { %8286 = vmatmul.mubr.msk.f32.gmra.mrb[30].mxu1 %vm4878_vm7, %v11678_v43  ;;  %8595 = vmatprep.subr.msk.bf16.mxu0 %vm11513_vm11, %v8593_v24  ;;  %v13306_v43 = vpack.c.bf16 %v11377_v56, %v10960_v17  ;;  %v5642_v17 = vld [vmem:[%s12822_s4 + $0x10] sm:$0xff]  ;;  %v13309_v56 = vld [vmem:[#allocation47_spill] sm:$0xff] }
 0x3c9   : > { %5437 = vmatprep.mubr.f32.mxu1 %v13260_v6 }
 0x3ca   : > { %8302 = vmatmul.mubr.msk.f32.gmra.mrb[26].mxu0 %vm13298_vm6, %v11893_v21 }
 0x3cb   : > { %5538 = vmatprep.mubr.f32.mxu0 %v13260_v6 }
 0x3cc   : > { %8295 = vmatmul.mubr.msk.f32.vlgmr.msra.gmra.mrb[16].mxu1 %vm13299_vm12, %v11870_v54 }
 0x3cd   : > { %8306 = vmatpush1.msk.msra.mxu1 %vm13301_vm8, %v13300_v62  ;;  %5443 = vmatprep.mubr.f32.mxu1 %v13260_v6 }
 0x3ce   : > { %8589 = vmatprep.subr.msk.bf16.mxu1 %vm11513_vm11, %v8587_v58  ;;  %8303 = vmatmul.mubr.msk.f32.gmra.mrb[28].mxu0 %vm13302_vm13, %v4872_v60  ;;  %v13311_v58 = vpack.c.bf16 %v13309_v56, %v13310_v4 }
 0x3cf   : > { %5544 = vmatprep.mubr.f32.mxu0 %v13260_v6 }
 0x3d0   : > { %8296 = vmatmul.mubr.msk.f32.gmra.mrb[18].mxu1 %vm13303_vm10, %v11893_v21 }
 0x3d1   : > { %5449 = vmatprep.mubr.f32.mxu1 %v13260_v6 }
 0x3d2   : > { %8304 = vmatmul.mubr.msk.f32.gmra.mrb[30].mxu0 %vm13304_vm2, %v4873_v27 }
 0x3d3   : > { %5744 = vmatprep.mubr.f32.mxu0 %v13260_v6 }
 0x3d4   : > { %8297 = vmatmul.mubr.msk.f32.gmra.mrb[20].mxu1 %vm13305_vm5, %v4872_v60 }
 0x3d5   : > { %5455 = vmatprep.mubr.f32.mxu1 %v13260_v6 }
 0x3d6   : > { %8313 = vmatmul.mubr.msk.f32.vlgmr.msra.gmra.mrb[16].mxu0 %vm4878_vm7, %v5640_v25 }
 0x3d7   : > { %8598 = vmatpush1.bf16.msk.msra.mxu0 %vm11513_vm11, %v13306_v43  ;;  %5750 = vmatprep.mubr.f32.mxu0 %v13260_v6 }
 0x3d8   : > { %8298 = vmatmul.mubr.msk.f32.gmra.mrb[22].mxu1 %vm13307_vm15, %v4873_v27 }
 0x3d9   : > { %5615 = vmatprep.mubr.f32.mxu1 %v13260_v6 }
 0x3da   : > { %8314 = vmatmul.mubr.msk.f32.gmra.mrb[18].mxu0 %vm4878_vm7, %v5641_v53 }
 0x3db   : > { %5756 = vmatprep.mubr.f32.mxu0 %v13260_v6 }
 0x3dc   : > { %8307 = vmatmul.mubr.msk.f32.vlgmr.msra.gmra.mrb[24].mxu1 %vm13308_vm1, %v11870_v54 }
 0x3dd   : > { %8592 = vmatpush1.bf16.msk.msra.mxu1 %vm11513_vm11, %v13311_v58  ;;  %5621 = vmatprep.mubr.f32.mxu1 %v13260_v6 }
 0x3de   : > { %8601 = vmatprep.subr.msk.bf16.mxu1 %vm11513_vm11, %v8599_v47  ;;  %8315 = vmatmul.mubr.msk.f32.gmra.mrb[20].mxu0 %vm4878_vm7, %v5642_v17 }
 0x3df   : > { %5762 = vmatprep.mubr.f32.mxu0 %v13260_v6 }
 0x3e0   : > { %8308 = vmatmul.mubr.msk.f32.gmra.mrb[26].mxu1 %vm13312_vm9, %v11893_v21 }
 0x3e1   : > { %5627 = vmatprep.mubr.f32.mxu1 %v13260_v6 }
 0x3e2   : > { %8316 = vmatmul.mubr.msk.f32.gmra.mrb[22].mxu0 %vm4878_vm7, %v5643_v46 }
 0x3e3   : > { %5922 = vmatprep.mubr.f32.mxu0 %v13260_v6 }
 0x3e4   : > { %8309 = vmatmul.mubr.msk.f32.gmra.mrb[28].mxu1 %vm13313_vm3, %v4872_v60 }
 0x3e5   : > { %5633 = vmatprep.mubr.f32.mxu1 %v13260_v6 }
 0x3e6   : > { %8325 = vmatmul.mubr.msk.f32.vlgmr.msra.gmra.mrb[24].mxu0 %vm4878_vm7, %v5640_v25 }
 0x3e7   : > { %5928 = vmatprep.mubr.f32.mxu0 %v13260_v6 }
 0x3e8   : > { %8310 = vmatmul.mubr.msk.f32.gmra.mrb[30].mxu1 %vm13292_vm0, %v4873_v27 }
 0x3e9   : > { %5833 = vmatprep.mubr.f32.mxu1 %v13260_v6 }
 0x3ea   : > { %8326 = vmatmul.mubr.msk.f32.gmra.mrb[26].mxu0 %vm4878_vm7, %v5641_v53 }
 0x3eb   : > { %5934 = vmatprep.mubr.f32.mxu0 %v13260_v6 }
 0x3ec   : > { %8319 = vmatmul.mubr.msk.f32.vlgmr.msra.gmra.mrb[16].mxu1 %vm4878_vm7, %v5640_v25 }
 0x3ed   : > { %8604 = vmatpush1.bf16.msk.msra.mxu1 %vm11513_vm11, %v13314_v40  ;;  %5839 = vmatprep.mubr.f32.mxu1 %v13260_v6  ;;  %vm6184_vm11 = vcmask 261120  }
 0x3ee   : > { %8327 = vmatmul.mubr.msk.f32.gmra.mrb[28].mxu0 %vm4878_vm7, %v5642_v17 }
 0x3ef   : > { %5940 = vmatprep.mubr.f32.mxu0 %v13260_v6 }
 0x3f0   : > { %8320 = vmatmul.mubr.msk.f32.gmra.mrb[18].mxu1 %vm4878_vm7, %v5641_v53 }
 0x3f1   : > { %5845 = vmatprep.mubr.f32.mxu1 %v13260_v6 }
 0x3f2   : > { %8328 = vmatmul.mubr.msk.f32.gmra.mrb[30].mxu0 %vm4878_vm7, %v5643_v46 }
 0x3f3   : > { %6261 = vmatprep.mubr.f32.mxu0 %v13260_v6 }
 0x3f4   : > { %8321 = vmatmul.mubr.msk.f32.gmra.mrb[20].mxu1 %vm4878_vm7, %v5642_v17 }
 0x3f5   : > { %5851 = vmatprep.mubr.f32.mxu1 %v13260_v6 }
 0x3f8   : > { %8322 = vmatmul.mubr.msk.f32.gmra.mrb[22].mxu1 %vm4878_vm7, %v5643_v46 }
 0x3f9   : > { %6011 = vmatprep.mubr.f32.mxu1 %v13260_v6 }
 0x3fc   : > { %8331 = vmatmul.mubr.msk.f32.vlgmr.msra.gmra.mrb[24].mxu1 %vm4878_vm7, %v5640_v25 }
 0x3fd   : > { %6017 = vmatprep.mubr.f32.mxu1 %v13260_v6 }
 0x400   : > { %8332 = vmatmul.mubr.msk.f32.gmra.mrb[26].mxu1 %vm4878_vm7, %v5641_v53 }
 0x401   : > { %6023 = vmatprep.mubr.f32.mxu1 %v13260_v6 }
 0x404   : > { %8333 = vmatmul.mubr.msk.f32.gmra.mrb[28].mxu1 %vm4878_vm7, %v5642_v17 }
 0x405   : > { %6029 = vmatprep.mubr.f32.mxu1 %v13260_v6 }
 0x408   : > { %8334 = vmatmul.mubr.msk.f32.gmra.mrb[30].mxu1 %vm4878_vm7, %v5643_v46 }
 0x409   : > { %6350 = vmatprep.mubr.f32.mxu1 %v13260_v6 }
 0x428   : > { %v12051_v41 = vpop.permute.xlu0 %6074 }
 0x429   : > { %v12058_v48 = vpop.permute.xlu1 %6084 }
 0x42c   : > { %v12054_v22 = vpop.permute.xlu0 %6079 }
 0x42d   : > { %v12062_v61 = vpop.permute.xlu1 %6089 }
 0x4a9   : > { %v5746_v9 = vpop.f32.mrb[16].mxu0 }
 0x4aa   : > { %v5748_v63 = vpop.f32.mrb[17].mxu0  ;;  %v6092_v24 = vadd.f32 %v12051_v41, %v5746_v9 }
 0x4ab   : > { %v6093_v28 = vadd.f32 %v12051_v41, %v5748_v63 }
 0x4ac   : > { %v6124_v26 = vmax.f32 %v6092_v24, 0.0  ;;  %v12097_v24 = vld [vmem:[%s12824_s6 + $0x10] sm:$0xff] }
 0x4ad   : > { %v5752_v10 = vpop.f32.mrb[18].mxu0  ;;  %v6125_v59 = vmax.f32 %v6093_v28, 0.0 }
 0x4ae   : > { %v6100_v3 = vadd.f32 %v12054_v22, %v5752_v10  ;;  %v5754_v44 = vpop.f32.mrb[19].mxu0 }
 0x4af   : > { %v6101_v34 = vadd.f32 %v12054_v22, %v5754_v44 }
 0x4b0   : > { %v6132_v57 = vmax.f32 %v6100_v3, 0.0 }
 0x4b1   : > { %v6133_v38 = vmax.f32 %v6101_v34, 0.0  ;;  %v5758_v31 = vpop.f32.mrb[20].mxu0 }
 0x4b2   : > { %v8607_v32 = vpack.c.bf16 %v6132_v57, %v6124_v26  ;;  %v5760_v13 = vpop.f32.mrb[21].mxu0  ;;  %v6108_v14 = vadd.f32 %v12058_v48, %v5758_v31 }
 0x4b3   : > { %v8605_v45 = vpack.c.bf16 %v6133_v38, %v6125_v59  ;;  %v6109_v36 = vadd.f32 %v12058_v48, %v5760_v13 }
 0x4b4   : > { %v6140_v54 = vmax.f32 %v6108_v14, 0.0  ;;  %v12107_v14 = vld [vmem:[%s12824_s6 + $0x18] sm:$0xff] }
 0x4b5   : > { %v5764_v20 = vpop.f32.mrb[22].mxu0  ;;  %8606 = vmatprep.subr.bf16.mxu0 %v8605_v45  ;;  %v6141_v23 = vmax.f32 %v6109_v36, 0.0 }
 0x4b6   : > { %v6116_v37 = vadd.f32 %v12062_v61, %v5764_v20  ;;  %v5766_v16 = vpop.f32.mrb[23].mxu0  ;;  %8608 = vmatpush1.bf16.msra.mxu0 %v8607_v32 }
 0x4b7   : > { %v6117_v33 = vadd.f32 %v12062_v61, %v5766_v16 }
 0x4b8   : > { %v6148_v7 = vmax.f32 %v6116_v37, 0.0 }
 0x4b9   : > { %v6149_v11 = vmax.f32 %v6117_v33, 0.0  ;;  %v5924_v52 = vpop.f32.mrb[24].mxu0 }
 0x4ba   : > { %v8611_v42 = vpack.c.bf16 %v6148_v7, %v6140_v54  ;;  %v5926_v0 = vpop.f32.mrb[25].mxu0  ;;  %v6096_v19 = vadd.f32 %v12051_v41, %v5924_v52 }
 0x4bb   : > { %v8609_v51 = vpack.c.bf16 %v6149_v11, %v6141_v23  ;;  %v6097_v30 = vadd.f32 %v12051_v41, %v5926_v0 }
 0x4bc   : > { %v6128_v5 = vmax.f32 %v6096_v19, 0.0 }
 0x4bd   : > { %v5930_v50 = vpop.f32.mrb[26].mxu0  ;;  %8610 = vmatprep.subr.bf16.mxu0 %v8609_v51  ;;  %v6129_v8 = vmax.f32 %v6097_v30, 0.0 }
 0x4be   : > { %v6104_v1 = vadd.f32 %v12054_v22, %v5930_v50  ;;  %v5932_v35 = vpop.f32.mrb[27].mxu0  ;;  %8612 = vmatpush1.bf16.msra.mxu0 %v8611_v42 }
 0x4bf   : > { %v5835_v29 = vpop.f32.mrb[16].mxu1  ;;  %v6105_v21 = vadd.f32 %v12054_v22, %v5932_v35 }
 0x4c0   : > { %v5837_v47 = vpop.f32.mrb[17].mxu1  ;;  %v6136_v39 = vmax.f32 %v6104_v1, 0.0  ;;  %v6094_v2 = vadd.f32 %v12051_v41, %v5835_v29 }
 0x4c1   : > { %v6137_v60 = vmax.f32 %v6105_v21, 0.0  ;;  %v5936_v12 = vpop.f32.mrb[28].mxu0  ;;  %8335 = vmatmul.mubr.msk.f32.vlgmr.msra.gmra.mrb[32].mxu0 %vm6184_vm11, %v12073_v55  ;;  %v6095_v15 = vadd.f32 %v12051_v41, %v5837_v47 }
 0x4c2   : > { %v8623_v27 = vpack.c.bf16 %v6136_v39, %v6128_v5  ;;  %v5938_v49 = vpop.f32.mrb[29].mxu0  ;;  %6267 = vmatprep.mubr.f32.mxu0 %v13260_v6  ;;  %v6112_v17 = vadd.f32 %v12058_v48, %v5936_v12  ;;  %v6126_v46 = vmax.f32 %v6094_v2, 0.0 }
 0x4c3   : > { %v5841_v62 = vpop.f32.mrb[18].mxu1  ;;  %v8621_v25 = vpack.c.bf16 %v6137_v60, %v6129_v8  ;;  %v6113_v4 = vadd.f32 %v12058_v48, %v5938_v49  ;;  %v6127_v28 = vmax.f32 %v6095_v15, 0.0 }
 0x4c4   : > { %v6102_v43 = vadd.f32 %v12054_v22, %v5841_v62  ;;  %v5843_v53 = vpop.f32.mrb[19].mxu1  ;;  %v6144_v57 = vmax.f32 %v6112_v17, 0.0 }
 0x4c5   : > { %v6103_v56 = vadd.f32 %v12054_v22, %v5843_v53  ;;  %v5942_v58 = vpop.f32.mrb[30].mxu0  ;;  %8336 = vmatmul.mubr.msk.f32.gmra.mrb[34].mxu0 %vm6184_vm11, %v12083_v18  ;;  %8622 = vmatprep.subr.bf16.mxu0 %v8621_v25  ;;  %v6145_v31 = vmax.f32 %v6113_v4, 0.0 }
 0x4c6   : > { %v6134_v40 = vmax.f32 %v6102_v43, 0.0  ;;  %v6120_v9 = vadd.f32 %v12062_v61, %v5942_v58  ;;  %v5944_v63 = vpop.f32.mrb[31].mxu0  ;;  %8624 = vmatpush1.bf16.msra.mxu0 %v8623_v27  ;;  %6273 = vmatprep.mubr.f32.mxu0 %v13260_v6 }
 0x4c7   : > { %v6135_v10 = vmax.f32 %v6103_v56, 0.0  ;;  %v5847_v3 = vpop.f32.mrb[20].mxu1  ;;  %v6121_v44 = vadd.f32 %v12062_v61, %v5944_v63 }
 0x4c8   : > { %v8615_v34 = vpack.c.bf16 %v6134_v40, %v6126_v46  ;;  %v5849_v26 = vpop.f32.mrb[21].mxu1  ;;  %v6152_v59 = vmax.f32 %v6120_v9, 0.0  ;;  %v6110_v13 = vadd.f32 %v12058_v48, %v5847_v3  ;;  %v12162_v40 = vpop.permute.xlu1 %6171 }
 0x4c9   : > { %v8613_v38 = vpack.c.bf16 %v6135_v10, %v6127_v28  ;;  %v6153_v32 = vmax.f32 %v6121_v44, 0.0  ;;  %8337 = vmatmul.mubr.msk.f32.gmra.mrb[36].mxu0 %vm6184_vm11, %v12097_v24  ;;  %v6111_v36 = vadd.f32 %v12058_v48, %v5849_v26 }
 0x4ca   : > { %v8627_v45 = vpack.c.bf16 %v6152_v59, %v6144_v57  ;;  %6279 = vmatprep.mubr.f32.mxu0 %v13260_v6  ;;  %v6142_v7 = vmax.f32 %v6110_v13, 0.0 }
 0x4cb   : > { %v5853_v20 = vpop.f32.mrb[22].mxu1  ;;  %8614 = vmatprep.subr.bf16.mxu1 %v8613_v38  ;;  %v8625_v37 = vpack.c.bf16 %v6153_v32, %v6145_v31  ;;  %v6143_v11 = vmax.f32 %v6111_v36, 0.0 }
 0x4cc   : > { %v6118_v16 = vadd.f32 %v12062_v61, %v5853_v20  ;;  %v5855_v33 = vpop.f32.mrb[23].mxu1  ;;  %8616 = vmatpush1.bf16.msra.mxu1 %v8615_v34  ;;  %v12170_v13 = vpop.permute.xlu1 %6181 }
 0x4cd   : > { %v6119_v54 = vadd.f32 %v12062_v61, %v5855_v33  ;;  %8338 = vmatmul.mubr.msk.f32.gmra.mrb[38].mxu0 %vm6184_vm11, %v12107_v14  ;;  %8626 = vmatprep.subr.bf16.mxu0 %v8625_v37 }
 0x4ce   : > { %v6150_v23 = vmax.f32 %v6118_v16, 0.0  ;;  %8628 = vmatpush1.bf16.msra.mxu0 %v8627_v45  ;;  %6439 = vmatprep.mubr.f32.mxu0 %v13260_v6 }
 0x4cf   : > { %v6151_v52 = vmax.f32 %v6119_v54, 0.0  ;;  %v6013_v42 = vpop.f32.mrb[24].mxu1 }
 0x4d0   : > { %v8619_v0 = vpack.c.bf16 %v6150_v23, %v6142_v7  ;;  %v6015_v51 = vpop.f32.mrb[25].mxu1  ;;  %v6098_v30 = vadd.f32 %v12051_v41, %v6013_v42 }
 0x4d1   : > { %v8617_v19 = vpack.c.bf16 %v6151_v52, %v6143_v11  ;;  %8343 = vmatmul.mubr.msk.f32.vlgmr.msra.gmra.mrb[40].mxu0 %vm6184_vm11, %v12073_v55  ;;  %v6099_v50 = vadd.f32 %v12051_v41, %v6015_v51 }
 0x4d2   : > { %6445 = vmatprep.mubr.f32.mxu0 %v13260_v6  ;;  %v6130_v47 = vmax.f32 %v6098_v30, 0.0 }
 0x4d3   : > { %v6019_v1 = vpop.f32.mrb[26].mxu1  ;;  %8618 = vmatprep.subr.bf16.mxu1 %v8617_v19  ;;  %v6131_v39 = vmax.f32 %v6099_v50, 0.0 }
 0x4d4   : > { %v6106_v35 = vadd.f32 %v12054_v22, %v6019_v1  ;;  %v6021_v29 = vpop.f32.mrb[27].mxu1  ;;  %8620 = vmatpush1.bf16.msra.mxu1 %v8619_v0  ;;  %v12181_v1 = vld [vmem:[%s12826_s8] sm:$0xf] }
 0x4d5   : > { %v6107_v21 = vadd.f32 %v12054_v22, %v6021_v29  ;;  %8344 = vmatmul.mubr.msk.f32.gmra.mrb[42].mxu0 %vm6184_vm11, %v12083_v18 }
 0x4d6   : > { %v6138_v5 = vmax.f32 %v6106_v35, 0.0  ;;  %6451 = vmatprep.mubr.f32.mxu0 %v13260_v6 }
 0x4d7   : > { %v6139_v8 = vmax.f32 %v6107_v21, 0.0  ;;  %v6025_v60 = vpop.f32.mrb[28].mxu1  ;;  %8339 = vmatmul.mubr.msk.f32.vlgmr.msra.gmra.mrb[32].mxu1 %vm6184_vm11, %v12073_v55 }
 0x4d8   : > { %v8631_v41 = vpack.c.bf16 %v6138_v5, %v6130_v47  ;;  %v6027_v12 = vpop.f32.mrb[29].mxu1  ;;  %6356 = vmatprep.mubr.f32.mxu1 %v13260_v6  ;;  %v6114_v22 = vadd.f32 %v12058_v48, %v6025_v60 }
 0x4d9   : > { %v8629_v2 = vpack.c.bf16 %v6139_v8, %v6131_v39  ;;  %8345 = vmatmul.mubr.msk.f32.gmra.mrb[44].mxu0 %vm6184_vm11, %v12097_v24  ;;  %v6115_v27 = vadd.f32 %v12058_v48, %v6027_v12 }
 0x4da   : > { %6457 = vmatprep.mubr.f32.mxu0 %v13260_v6  ;;  %v6146_v43 = vmax.f32 %v6114_v22, 0.0 }
 0x4db   : > { %v6031_v49 = vpop.f32.mrb[30].mxu1  ;;  %8340 = vmatmul.mubr.msk.f32.gmra.mrb[34].mxu1 %vm6184_vm11, %v12083_v18  ;;  %8630 = vmatprep.subr.bf16.mxu1 %v8629_v2  ;;  %v6147_v48 = vmax.f32 %v6115_v27, 0.0 }
 0x4dc   : > { %v6122_v15 = vadd.f32 %v12062_v61, %v6031_v49  ;;  %v6033_v62 = vpop.f32.mrb[31].mxu1  ;;  %8632 = vmatpush1.bf16.msra.mxu1 %v8631_v41  ;;  %6362 = vmatprep.mubr.f32.mxu1 %v13260_v6 }
 0x4dd   : > { %v6123_v25 = vadd.f32 %v12062_v61, %v6033_v62  ;;  %8346 = vmatmul.mubr.msk.f32.gmra.mrb[46].mxu0 %vm6184_vm11, %v12107_v14 }
 0x4de   : > { %v6154_v53 = vmax.f32 %v6122_v15, 0.0  ;;  %6659 = vmatprep.mubr.f32.mxu0 %v13260_v6 }
 0x4df   : > { %v6155_v17 = vmax.f32 %v6123_v25, 0.0  ;;  %8341 = vmatmul.mubr.msk.f32.gmra.mrb[36].mxu1 %vm6184_vm11, %v12097_v24 }
 0x4e0   : > { %v8635_v56 = vpack.c.bf16 %v6154_v53, %v6146_v43  ;;  %6368 = vmatprep.mubr.f32.mxu1 %v13260_v6 }
 0x4e1   : > { %v8633_v4 = vpack.c.bf16 %v6155_v17, %v6147_v48 }
 0x4e3   : > { %8342 = vmatmul.mubr.msk.f32.gmra.mrb[38].mxu1 %vm6184_vm11, %v12107_v14  ;;  %8634 = vmatprep.subr.bf16.mxu1 %v8633_v4 }
 0x4e4   : > { %8636 = vmatpush1.bf16.msra.mxu1 %v8635_v56  ;;  %6528 = vmatprep.mubr.f32.mxu1 %v13260_v6 }
 0x4e7   : > { %8347 = vmatmul.mubr.msk.f32.vlgmr.msra.gmra.mrb[40].mxu1 %vm6184_vm11, %v12073_v55  ;;  %v12159_v55 = vpop.permute.xlu0 %6166 }
 0x4e8   : > { %6534 = vmatprep.mubr.f32.mxu1 %v13260_v6 }
 0x4eb   : > { %8348 = vmatmul.mubr.msk.f32.gmra.mrb[42].mxu1 %vm6184_vm11, %v12083_v18  ;;  %v12167_v38 = vpop.permute.xlu0 %6176 }
 0x4ec   : > { %6540 = vmatprep.mubr.f32.mxu1 %v13260_v6 }
 0x4ef   : > { %8349 = vmatmul.mubr.msk.f32.gmra.mrb[44].mxu1 %vm6184_vm11, %v12097_v24 }
 0x4f0   : > { %6546 = vmatprep.mubr.f32.mxu1 %v13260_v6 }
 0x4f3   : > { %8350 = vmatmul.mubr.msk.f32.gmra.mrb[46].mxu1 %vm6184_vm11, %v12107_v14 }
 0x4f4   : > { %6730 = vmatprep.mubr.f32.mxu1 %v13260_v6 }
 0x594   : > { %v6263_v61 = vpop.f32.mrb[32].mxu0 }
 0x595   : > { %v6265_v58 = vpop.f32.mrb[33].mxu0  ;;  %v6264_v46 = vadd.f32 %v6263_v61, %v12159_v55 }
 0x596   : > { %v6266_v18 = vadd.f32 %v6265_v58, %v12159_v55 }
 0x597   : > { %v6553_v10 = vmax.f32 %v6264_v46, 0.0 }
 0x598   : > { %v6269_v9 = vpop.f32.mrb[34].mxu0  ;;  %v6554_v44 = vmax.f32 %v6266_v18, 0.0 }
 0x599   : > { %v6270_v63 = vadd.f32 %v6269_v9, %v12162_v40  ;;  %v6271_v24 = vpop.f32.mrb[35].mxu0 }
 0x59a   : > { %v6272_v28 = vadd.f32 %v6271_v24, %v12162_v40 }
 0x59b   : > { %v6561_v3 = vmax.f32 %v6270_v63, 0.0 }
 0x59c   : > { %v6562_v34 = vmax.f32 %v6272_v28, 0.0  ;;  %v6275_v26 = vpop.f32.mrb[36].mxu0 }
 0x59d   : > { %v8639_v57 = vpack.c.bf16 %v6561_v3, %v6553_v10  ;;  %v6277_v59 = vpop.f32.mrb[37].mxu0  ;;  %v6276_v32 = vadd.f32 %v6275_v26, %v12167_v38 }
 0x59e   : > { %v8637_v31 = vpack.c.bf16 %v6562_v34, %v6554_v44  ;;  %v6278_v45 = vadd.f32 %v6277_v59, %v12167_v38 }
 0x59f   : > { %v6569_v16 = vmax.f32 %v6276_v32, 0.0 }
 0x5a0   : > { %v6281_v14 = vpop.f32.mrb[38].mxu0  ;;  %8638 = vmatprep.subr.bf16.mxu0 %v8637_v31  ;;  %v6570_v54 = vmax.f32 %v6278_v45, 0.0 }
 0x5a1   : > { %v6282_v36 = vadd.f32 %v6281_v14, %v12170_v13  ;;  %v6283_v20 = vpop.f32.mrb[39].mxu0  ;;  %8640 = vmatpush1.bf16.msra.mxu0 %v8639_v57 }
 0x5a2   : > { %v6284_v37 = vadd.f32 %v6283_v20, %v12170_v13 }
 0x5a3   : > { %v6577_v33 = vmax.f32 %v6282_v36, 0.0 }
 0x5a4   : > { %v6578_v7 = vmax.f32 %v6284_v37, 0.0  ;;  %v6441_v23 = vpop.f32.mrb[40].mxu0 }
 0x5a5   : > { %v8643_v11 = vpack.c.bf16 %v6577_v33, %v6569_v16  ;;  %v6443_v52 = vpop.f32.mrb[41].mxu0  ;;  %v6442_v0 = vadd.f32 %v6441_v23, %v12159_v55 }
 0x5a6   : > { %v8641_v42 = vpack.c.bf16 %v6578_v7, %v6570_v54  ;;  %v6444_v51 = vadd.f32 %v6443_v52, %v12159_v55 }
 0x5a7   : > { %v6557_v47 = vmax.f32 %v6442_v0, 0.0 }
 0x5a8   : > { %v6447_v19 = vpop.f32.mrb[42].mxu0  ;;  %8642 = vmatprep.subr.bf16.mxu0 %v8641_v42  ;;  %v6558_v39 = vmax.f32 %v6444_v51, 0.0 }
 0x5a9   : > { %v6448_v30 = vadd.f32 %v6447_v19, %v12162_v40  ;;  %v6449_v50 = vpop.f32.mrb[43].mxu0  ;;  %8644 = vmatpush1.bf16.msra.mxu0 %v8643_v11 }
 0x5aa   : > { %v6352_v35 = vpop.f32.mrb[32].mxu1  ;;  %v6450_v29 = vadd.f32 %v6449_v50, %v12162_v40 }
 0x5ab   : > { %v6354_v21 = vpop.f32.mrb[33].mxu1  ;;  %v6565_v5 = vmax.f32 %v6448_v30, 0.0  ;;  %v6353_v41 = vadd.f32 %v6352_v35, %v12159_v55 }
 0x5ac   : > { %v6566_v8 = vmax.f32 %v6450_v29, 0.0  ;;  %v6453_v60 = vpop.f32.mrb[44].mxu0  ;;  %8351 = vmatmul.mubr.msk.f32.vlgmr.msra.gmra.mrb[48].mxu0 %vm6184_vm11, %v12181_v1  ;;  %v6355_v22 = vadd.f32 %v6354_v21, %v12159_v55 }
 0x5ad   : > { %v8655_v12 = vpack.c.bf16 %v6565_v5, %v6557_v47  ;;  %v6455_v2 = vpop.f32.mrb[45].mxu0  ;;  %6801 = vmatprep.mubr.f32.mxu0 %v13260_v6  ;;  %v6454_v25 = vadd.f32 %v6453_v60, %v12167_v38  ;;  %v6555_v17 = vmax.f32 %v6353_v41, 0.0 }
 0x5ae   : > { %v6358_v27 = vpop.f32.mrb[34].mxu1  ;;  %v8653_v49 = vpack.c.bf16 %v6566_v8, %v6558_v39  ;;  %v6456_v53 = vadd.f32 %v6455_v2, %v12167_v38  ;;  %v6556_v58 = vmax.f32 %v6355_v22, 0.0 }
 0x5af   : > { %v6359_v15 = vadd.f32 %v6358_v27, %v12162_v40  ;;  %v6360_v62 = vpop.f32.mrb[35].mxu1  ;;  %v6573_v28 = vmax.f32 %v6454_v25, 0.0 }
 0x5b0   : > { %v6361_v43 = vadd.f32 %v6360_v62, %v12162_v40  ;;  %v6459_v48 = vpop.f32.mrb[46].mxu0  ;;  %8654 = vmatprep.subr.bf16.mxu0 %v8653_v49  ;;  %v6574_v44 = vmax.f32 %v6456_v53, 0.0 }
 0x5b1   : > { %v6563_v56 = vmax.f32 %v6359_v15, 0.0  ;;  %v6460_v4 = vadd.f32 %v6459_v48, %v12170_v13  ;;  %v6461_v61 = vpop.f32.mrb[47].mxu0  ;;  %8656 = vmatpush1.bf16.msra.mxu0 %v8655_v12 }
 0x5b2   : > { %v6564_v46 = vmax.f32 %v6361_v43, 0.0  ;;  %v6364_v18 = vpop.f32.mrb[36].mxu1  ;;  %v6462_v9 = vadd.f32 %v6461_v61, %v12170_v13 }
 0x5b3   : > { %v8647_v63 = vpack.c.bf16 %v6563_v56, %v6555_v17  ;;  %v6366_v24 = vpop.f32.mrb[37].mxu1  ;;  %v6581_v10 = vmax.f32 %v6460_v4, 0.0  ;;  %v6365_v26 = vadd.f32 %v6364_v18, %v12167_v38 }
 0x5b4   : > { %v8645_v3 = vpack.c.bf16 %v6564_v46, %v6556_v58  ;;  %v6582_v34 = vmax.f32 %v6462_v9, 0.0  ;;  %v6367_v59 = vadd.f32 %v6366_v24, %v12167_v38 }
 0x5b5   : > { %v8659_v57 = vpack.c.bf16 %v6581_v10, %v6573_v28  ;;  %v6571_v20 = vmax.f32 %v6365_v26, 0.0 }
 0x5b6   : > { %v6370_v31 = vpop.f32.mrb[38].mxu1  ;;  %8646 = vmatprep.subr.bf16.mxu1 %v8645_v3  ;;  %v8657_v32 = vpack.c.bf16 %v6582_v34, %v6574_v44  ;;  %v6572_v16 = vmax.f32 %v6367_v59, 0.0 }
 0x5b7   : > { %v6371_v45 = vadd.f32 %v6370_v31, %v12170_v13  ;;  %v6372_v14 = vpop.f32.mrb[39].mxu1  ;;  %8648 = vmatpush1.bf16.msra.mxu1 %v8647_v63 }
 0x5b8   : > { %v6373_v36 = vadd.f32 %v6372_v14, %v12170_v13  ;;  %8658 = vmatprep.subr.bf16.mxu0 %v8657_v32 }
 0x5b9   : > { %v6579_v37 = vmax.f32 %v6371_v45, 0.0  ;;  %8660 = vmatpush1.bf16.msra.mxu0 %v8659_v57 }
 0x5ba   : > { %v6580_v33 = vmax.f32 %v6373_v36, 0.0  ;;  %v6530_v54 = vpop.f32.mrb[40].mxu1 }
 0x5bb   : > { %v8651_v7 = vpack.c.bf16 %v6579_v37, %v6571_v20  ;;  %v6532_v23 = vpop.f32.mrb[41].mxu1  ;;  %v6531_v52 = vadd.f32 %v6530_v54, %v12159_v55 }
 0x5bc   : > { %v8649_v11 = vpack.c.bf16 %v6580_v33, %v6572_v16  ;;  %8353 = vmatmul.mubr.msk.f32.vlgmr.msra.gmra.mrb[50].mxu0 %vm6184_vm11, %v12181_v1  ;;  %v6533_v42 = vadd.f32 %v6532_v23, %v12159_v55 }
 0x5bd   : > { %v6559_v50 = vmax.f32 %v6531_v52, 0.0 }
 0x5be   : > { %v6536_v0 = vpop.f32.mrb[42].mxu1  ;;  %8650 = vmatprep.subr.bf16.mxu1 %v8649_v11  ;;  %v6560_v29 = vmax.f32 %v6533_v42, 0.0 }
 0x5bf   : > { %v6537_v51 = vadd.f32 %v6536_v0, %v12162_v40  ;;  %v6538_v19 = vpop.f32.mrb[43].mxu1  ;;  %8652 = vmatpush1.bf16.msra.mxu1 %v8651_v7 }
 0x5c0   : > { %v6539_v30 = vadd.f32 %v6538_v19, %v12162_v40 }
 0x5c1   : > { %v6567_v35 = vmax.f32 %v6537_v51, 0.0  ;;  %v13315_v51 = vld [vmem:[#allocation2_spill] sm:$0xff] }
 0x5c2   : > { %v6568_v21 = vmax.f32 %v6539_v30, 0.0  ;;  %v6542_v47 = vpop.f32.mrb[44].mxu1  ;;  %8352 = vmatmul.mubr.msk.f32.vlgmr.msra.gmra.mrb[48].mxu1 %vm6184_vm11, %v12181_v1  ;;  %vm7007_vm7 = vcmp.lt.s32.totalorder %v13315_v51, 1  ;;  %v13316_v30 = vld [vmem:[#allocation20_spill] sm:$0xff]  ;;  %vm7104_vm5 = vcmp.lt.s32.totalorder %v13315_v51, 2 }
 0x5c3   : > { %v8663_v5 = vpack.c.bf16 %v6567_v35, %v6559_v50  ;;  %v6544_v39 = vpop.f32.mrb[45].mxu1  ;;  %6872 = vmatprep.mubr.f32.mxu1 %v13260_v6  ;;  %v6543_v8 = vadd.f32 %v6542_v47, %v12167_v38  ;;  %v6590_v6 = vpop.permute.xlu0 %6589  ;;  %vm7017_vm14 = vcmp.ge.s32.totalorder %v13316_v30, 1  ;;  %vm7114_vm0 = vcmp.ge.s32.totalorder %v13316_v30, 2 }
 0x5c4   : > { %v8661_v55 = vpack.c.bf16 %v6568_v21, %v6560_v29  ;;  %v6545_v60 = vadd.f32 %v6544_v39, %v12167_v38  ;;  %v13317_v39 = vld [vmem:[#allocation21_spill] sm:$0xff] }
 0x5c5   : > { %v6575_v22 = vmax.f32 %v6543_v8, 0.0  ;;  %vm7018_vm4 = vcmp.ge.s32.totalorder %v13317_v39, 1  ;;  %v13318_v8 = vld [vmem:[#allocation22_spill] sm:$0xff] }
 0x5c6   : > { %v6548_v41 = vpop.f32.mrb[46].mxu1  ;;  %8662 = vmatprep.subr.bf16.mxu1 %v8661_v55  ;;  %v6576_v49 = vmax.f32 %v6545_v60, 0.0  ;;  %vm7019_vm6 = vcmp.ge.s32.totalorder %v13318_v8, 1  ;;  %vm7116_vm15 = vcmp.ge.s32.totalorder %v13318_v8, 2 }
 0x5c7   : > { %v6549_v40 = vadd.f32 %v6548_v41, %v12170_v13  ;;  %v6550_v12 = vpop.f32.mrb[47].mxu1  ;;  %8664 = vmatpush1.bf16.msra.mxu1 %v8663_v5 }
 0x5c8   : > { %v6551_v2 = vadd.f32 %v6550_v12, %v12170_v13 }
 0x5c9   : > { %v6583_v27 = vmax.f32 %v6549_v40, 0.0 }
 0x5ca   : > { %v6584_v15 = vmax.f32 %v6551_v2, 0.0 }
 0x5cb   : > { %v8667_v62 = vpack.c.bf16 %v6583_v27, %v6575_v22  ;;  %v13319_v27 = vld [vmem:[#allocation23_spill] sm:$0xff] }
 0x5cc   : > { %v8665_v25 = vpack.c.bf16 %v6584_v15, %v6576_v49  ;;  %vm7020_vm12 = vcmp.ge.s32.totalorder %v13319_v27, 1  ;;  %vm7117_vm1 = vcmp.ge.s32.totalorder %v13319_v27, 2 }
 0x5ce   : > { %8666 = vmatprep.subr.bf16.mxu1 %v8665_v25 }
 0x5cf   : > { %8668 = vmatpush1.bf16.msra.mxu1 %v8667_v62  ;;  %v13320_v62 = vld [vmem:[#allocation24_spill] sm:$0xff] }
 0x5d0   : > { %vm7021_vm8 = vcmp.ge.s32.totalorder %v13320_v62, 1  ;;  %vm7118_vm9 = vcmp.ge.s32.totalorder %v13320_v62, 2 }
 0x5d2   : > { %8354 = vmatmul.mubr.msk.f32.vlgmr.msra.gmra.mrb[50].mxu1 %vm6184_vm11, %v12181_v1  ;;  %vm7115_vm11 = vcmp.ge.s32.totalorder %v13317_v39, 2 }
 0x67f   : > { %v6661_v38 = vpop.f32.mrb[48].mxu0 }
 0x680   : > { %v12214_v43 = vadd.f32 %v6661_v38, %v6590_v6  ;;  %v6663_v53 = vpop.f32.mrb[49].mxu0 }
 0x681   : > { %v12216_v48 = vadd.f32 %v6663_v53, %v6590_v6 }
 0x682   : > { %v6927_v13 = vmax.f32 %v12214_v43, 0.0 }
 0x683   : > { %v6928_v17 = vmax.f32 %v12216_v48, 0.0 }
 0x684   : > { %v12220_v56 = vmul.f32 -0.25, %v6927_v13 }
 0x685   : > { %v12222_v4 = vmul.f32 -0.25, %v6928_v17 }
 0x686   : > { %v6975_v61 = vrot.slane %v12220_v56, 3 }
 0x687   : > { %v6976_v58 = vrot.slane %v12222_v4, 3 }
 0x688   : > { %6991 = vrot.lane.b32.xlu1 %v6975_v61, %s9008_s22 }
 0x689   : > { %6993 = vrot.lane.b32.xlu0 %v6976_v58, %s9008_s22 }
 0x68f   : > { %v6803_v1 = vpop.f32.mrb[50].mxu0 }
 0x690   : > { %v6805_v46 = vpop.f32.mrb[51].mxu0  ;;  %v12228_v18 = vadd.f32 %v6803_v1, %v6590_v6 }
 0x691   : > { %v12230_v9 = vadd.f32 %v6805_v46, %v6590_v6 }
 0x692   : > { %v6931_v10 = vmax.f32 %v12228_v18, 0.0 }
 0x693   : > { %v6932_v44 = vmax.f32 %v12230_v9, 0.0 }
 0x694   : > { %v12242_v59 = vmul.f32 -0.25, %v6931_v10 }
 0x695   : > { %v6732_v63 = vpop.f32.mrb[48].mxu1  ;;  %v12246_v32 = vmul.f32 -0.25, %v6932_v44 }
 0x696   : > { %v12232_v24 = vadd.f32 %v6732_v63, %v6590_v6  ;;  %v6734_v28 = vpop.f32.mrb[49].mxu1  ;;  %v6979_v36 = vrot.slane %v12242_v59, 3 }
 0x697   : > { %v12235_v3 = vadd.f32 %v6734_v28, %v6590_v6  ;;  %v6980_v20 = vrot.slane %v12246_v32, 3 }
 0x698   : > { %v6929_v34 = vmax.f32 %v12232_v24, 0.0 }
 0x699   : > { %v6930_v26 = vmax.f32 %v12235_v3, 0.0 }
 0x69a   : > { %v12240_v57 = vmul.f32 -0.25, %v6929_v34 }
 0x69b   : > { %v12244_v31 = vmul.f32 -0.25, %v6930_v26  ;;  %v13321_v26 = vld [vmem:[#allocation25_spill] sm:$0xff] }
 0x69c   : > { %v6977_v45 = vrot.slane %v12240_v57, 3  ;;  %vm7022_vm13 = vcmp.ge.s32.totalorder %v13321_v26, 1 }
 0x69d   : > { %v6978_v14 = vrot.slane %v12244_v31, 3 }
 0x69e   : > { %6995 = vrot.lane.b32.xlu1 %v6977_v45, %s9008_s22 }
 0x69f   : > { %6997 = vrot.lane.b32.xlu0 %v6978_v14, %s9008_s22  ;;  %v13322_v14 = vld [vmem:[#allocation19_spill] sm:$0xff] }
 0x6a0   : > { %vm7016_vm10 = vcmp.ge.s32.totalorder %v13322_v14, 1  ;;  %vm7113_vm3 = vcmp.ge.s32.totalorder %v13322_v14, 2 }
 0x6a2   : > { %6999 = vrot.lane.b32.xlu1 %v6979_v36, %s9008_s22  ;;  %v13323_v36 = vld [vmem:[#allocation26_spill] sm:$0xff] }
 0x6a3   : > { %7001 = vrot.lane.b32.xlu0 %v6980_v20, %s9008_s22  ;;  %vm7023_vm2 = vcmp.ge.s32.totalorder %v13323_v36, 1 }
 0x6a5   : > { %v6874_v37 = vpop.f32.mrb[50].mxu1 }
 0x6a6   : > { %v12256_v16 = vadd.f32 %v6874_v37, %v6590_v6  ;;  %v6876_v33 = vpop.f32.mrb[51].mxu1 }
 0x6a7   : > { %v12258_v54 = vadd.f32 %v6876_v33, %v6590_v6 }
 0x6a8   : > { %v6933_v7 = vmax.f32 %v12256_v16, 0.0 }
 0x6a9   : > { %v6934_v23 = vmax.f32 %v12258_v54, 0.0 }
 0x6aa   : > { %v12262_v11 = vmul.f32 -0.25, %v6933_v7 }
 0x6ab   : > { %v12264_v52 = vmul.f32 -0.25, %v6934_v23 }
 0x6ac   : > { %v6981_v42 = vrot.slane %v12262_v11, 3 }
 0x6ad   : > { %v6982_v0 = vrot.slane %v12264_v52, 3 }
 0x6ae   : > { %7003 = vrot.lane.b32.xlu1 %v6981_v42, %s9008_s22 }
 0x6af   : > { %7005 = vrot.lane.b32.xlu0 %v6982_v0, %s9008_s22 }
 0x6fa   : > { %v6992_v19 = vpop.permute.xlu1 %6991 }
 0x6fb   : > { %v6994_v50 = vpop.permute.xlu0 %6993 }
 0x6fc   : > { %v7014_v35 = vsel %vm7007_vm7, %v6992_v19, %v6994_v50 }
 0x6fd   : > { %v7025_v29 = vsel %vm7017_vm14, %v7014_v35, 0.0  ;;  %vm7120_vm14 = vcmp.ge.s32.totalorder %v13323_v36, 2 }
 0x6fe   : > { %v7041_v21 = vrot.slane %v7025_v29, 5 }
 0x700   : > { %v12275_v47 = vadd.f32 %v7041_v21, %v12222_v4 }
 0x702   : > { %v7073_v5 = vrot.slane %v12275_v47, 3 }
 0x704   : > { %7090 = vrot.lane.b32.xlu0 %v7073_v5, %s9009_s23 }
 0x710   : > { %v6996_v55 = vpop.permute.xlu1 %6995 }
 0x711   : > { %v7013_v60 = vsel %vm7007_vm7, %v6994_v50, %v6996_v55  ;;  %v6998_v41 = vpop.permute.xlu0 %6997 }
 0x712   : > { %v7026_v40 = vsel %vm7018_vm4, %v7013_v60, 0.0  ;;  %v7012_v12 = vsel %vm7007_vm7, %v6996_v55, %v6998_v41  ;;  %vm7201_vm4 = vcmp.lt.s32.totalorder %v13315_v51, 4 }
 0x713   : > { %v7042_v2 = vrot.slane %v7026_v40, 5  ;;  %v7027_v22 = vsel %vm7019_vm6, %v7012_v12, 0.0  ;;  %vm7214_vm6 = vcmp.ge.s32.totalorder %v13319_v27, 4 }
 0x714   : > { %v7043_v49 = vrot.slane %v7027_v22, 5  ;;  %v7000_v15 = vpop.permute.xlu1 %6999 }
 0x715   : > { %v12288_v25 = vadd.f32 %v7042_v2, %v12240_v57  ;;  %v7011_v6 = vsel %vm7007_vm7, %v6998_v41, %v7000_v15  ;;  %v7002_v38 = vpop.permute.xlu0 %7001 }
 0x716   : > { %v7059_v53 = vadd.f32 %v7043_v49, %v12244_v31  ;;  %v7028_v13 = vsel %vm7020_vm12, %v7011_v6, 0.0  ;;  %v7010_v17 = vsel %vm7007_vm7, %v7000_v15, %v7002_v38  ;;  %vm7211_vm12 = vcmp.ge.s32.totalorder %v13316_v30, 4 }
 0x717   : > { %v7074_v61 = vrot.slane %v12288_v25, 3  ;;  %v7044_v58 = vrot.slane %v7028_v13, 5  ;;  %v7029_v1 = vsel %vm7021_vm8, %v7010_v17, 0.0  ;;  %vm7210_vm8 = vcmp.ge.s32.totalorder %v13322_v14, 4 }
 0x718   : > { %v7075_v46 = vrot.slane %v7059_v53, 3  ;;  %v7045_v63 = vrot.slane %v7029_v1, 5 }
 0x719   : > { %7092 = vrot.lane.b32.xlu1 %v7074_v61, %s9009_s23  ;;  %v7060_v28 = vadd.f32 %v7044_v58, %v12242_v59 }
 0x71a   : > { %7094 = vrot.lane.b32.xlu0 %v7075_v46, %s9009_s23  ;;  %v12300_v10 = vadd.f32 %v7045_v63, %v12246_v32 }
 0x71b   : > { %v7076_v44 = vrot.slane %v7060_v28, 3 }
 0x71c   : > { %v7077_v34 = vrot.slane %v12300_v10, 3 }
 0x71d   : > { %7096 = vrot.lane.b32.xlu1 %v7076_v44, %s9009_s23 }
 0x71e   : > { %7098 = vrot.lane.b32.xlu0 %v7077_v34, %s9009_s23 }
 0x720   : > { %v7004_v45 = vpop.permute.xlu1 %7003 }
 0x721   : > { %v7009_v20 = vsel %vm7007_vm7, %v7002_v38, %v7004_v45  ;;  %v7006_v37 = vpop.permute.xlu0 %7005 }
 0x722   : > { %v7030_v33 = vsel %vm7022_vm13, %v7009_v20, 0.0  ;;  %v7008_v7 = vsel %vm7007_vm7, %v7004_v45, %v7006_v37  ;;  %v7015_v23 = vsel %vm7007_vm7, %v7006_v37, %v6992_v19  ;;  %vm7119_vm7 = vcmp.ge.s32.totalorder %v13321_v26, 2 }
 0x723   : > { %v7024_v42 = vsel %vm7016_vm10, %v7015_v23, 0.0  ;;  %v7031_v0 = vsel %vm7023_vm2, %v7008_v7, 0.0  ;;  %v7046_v50 = vrot.slane %v7030_v33, 5  ;;  %vm7215_vm13 = vcmp.ge.s32.totalorder %v13320_v62, 4 }
 0x724   : > { %v7040_v35 = vrot.slane %v7024_v42, 5  ;;  %v7047_v29 = vrot.slane %v7031_v0, 5  ;;  %vm7216_vm10 = vcmp.ge.s32.totalorder %v13321_v26, 4  ;;  %vm7217_vm2 = vcmp.ge.s32.totalorder %v13323_v36, 4 }
 0x725   : > { %v12317_v55 = vadd.f32 %v7046_v50, %v12262_v11 }
 0x726   : > { %v7056_v21 = vadd.f32 %v7040_v35, %v12220_v56  ;;  %v7063_v5 = vadd.f32 %v7047_v29, %v12264_v52 }
 0x727   : > { %v7078_v19 = vrot.slane %v12317_v55, 3 }
 0x728   : > { %v7072_v60 = vrot.slane %v7056_v21, 3  ;;  %v7079_v41 = vrot.slane %v7063_v5, 3 }
 0x72a   : > { %7088 = vrot.lane.b32.xlu1 %v7072_v60, %s9009_s23  ;;  %7102 = vrot.lane.b32.xlu0 %v7079_v41, %s9009_s23 }
 0x72e   : > { %7100 = vrot.lane.b32.xlu1 %v7078_v19, %s9009_s23 }
 0x776   : > { %v7091_v40 = vpop.permute.xlu0 %7090 }
 0x78b   : > { %v7093_v12 = vpop.permute.xlu1 %7092 }
 0x78c   : > { %v7095_v2 = vpop.permute.xlu0 %7094 }
 0x78d   : > { %v7109_v22 = vsel %vm7104_vm5, %v7093_v12, %v7095_v2 }
 0x78e   : > { %v7124_v49 = vsel %vm7116_vm15, %v7109_v22, 0.0  ;;  %vm7213_vm15 = vcmp.ge.s32.totalorder %v13318_v8, 4 }
 0x78f   : > { %v7140_v15 = vrot.slane %v7124_v49, 5  ;;  %v7097_v6 = vpop.permute.xlu1 %7096 }
 0x790   : > { %v7108_v38 = vsel %vm7104_vm5, %v7095_v2, %v7097_v6  ;;  %v7099_v46 = vpop.permute.xlu0 %7098 }
 0x791   : > { %v12330_v13 = vadd.f32 %v7140_v15, %v7059_v53  ;;  %v7125_v17 = vsel %vm7117_vm1, %v7108_v38, 0.0  ;;  %v7107_v44 = vsel %vm7104_vm5, %v7097_v6, %v7099_v46  ;;  %v7110_v53 = vsel %vm7104_vm5, %v7091_v40, %v7093_v12 }
 0x792   : > { %v7141_v61 = vrot.slane %v7125_v17, 5  ;;  %v7126_v34 = vsel %vm7118_vm9, %v7107_v44, 0.0  ;;  %v7123_v42 = vsel %vm7115_vm11, %v7110_v53, 0.0  ;;  %vm7308_vm11 = vcmp.ge.s32.totalorder %v13316_v30, 8 }
 0x793   : > { %v7172_v58 = vrot.slane %v12330_v13, 3  ;;  %v7142_v33 = vrot.slane %v7126_v34, 5 }
 0x794   : > { %v7157_v1 = vadd.f32 %v7141_v61, %v7060_v28 }
 0x795   : > { %7191 = vrot.lane.b32.xlu1 %v7172_v58, %s9010_s24  ;;  %v7158_v12 = vadd.f32 %v7142_v33, %v12300_v10 }
 0x796   : > { %v7173_v63 = vrot.slane %v7157_v1, 3 }
 0x797   : > { %v7174_v61 = vrot.slane %v7158_v12, 3 }
 0x798   : > { %7193 = vrot.lane.b32.xlu0 %v7173_v63, %s9010_s24 }
 0x79c   : > { %v7103_v28 = vpop.permute.xlu0 %7102  ;;  %v7089_v45 = vpop.permute.xlu1 %7088 }
 0x79d   : > { %v7111_v20 = vsel %vm7104_vm5, %v7089_v45, %v7091_v40  ;;  %v7112_v37 = vsel %vm7104_vm5, %v7103_v28, %v7089_v45  ;;  %v7139_v40 = vrot.slane %v7123_v42, 5 }
 0x79e   : > { %v7121_v7 = vsel %vm7113_vm3, %v7112_v37, 0.0  ;;  %v7122_v23 = vsel %vm7114_vm0, %v7111_v20, 0.0  ;;  %vm7298_vm3 = vcmp.lt.s32.totalorder %v13315_v51, 8  ;;  %vm7312_vm0 = vcmp.ge.s32.totalorder %v13320_v62, 8 }
 0x79f   : > { %v7137_v0 = vrot.slane %v7121_v7, 5  ;;  %v7138_v50 = vrot.slane %v7122_v23, 5 }
 0x7a0   : > { %v7101_v35 = vpop.permute.xlu1 %7100 }
 0x7a1   : > { %v7153_v29 = vadd.f32 %v7137_v0, %v7056_v21  ;;  %v7154_v60 = vadd.f32 %v7138_v50, %v12275_v47  ;;  %v7105_v41 = vsel %vm7104_vm5, %v7101_v35, %v7103_v28  ;;  %v7106_v19 = vsel %vm7104_vm5, %v7099_v46, %v7101_v35 }
 0x7a2   : > { %v7127_v2 = vsel %vm7119_vm7, %v7106_v19, 0.0  ;;  %v7128_v22 = vsel %vm7120_vm14, %v7105_v41, 0.0  ;;  %v12360_v47 = vadd.f32 %v7139_v40, %v12288_v25  ;;  %vm7212_vm5 = vcmp.ge.s32.totalorder %v13317_v39, 4 }
 0x7a3   : > { %v7143_v49 = vrot.slane %v7127_v2, 5  ;;  %v7144_v15 = vrot.slane %v7128_v22, 5  ;;  %v7169_v6 = vrot.slane %v7153_v29, 3  ;;  %v7170_v38 = vrot.slane %v7154_v60, 3 }
 0x7a4   : > { %vm7307_vm7 = vcmp.ge.s32.totalorder %v13322_v14, 8  ;;  %vm7311_vm14 = vcmp.ge.s32.totalorder %v13319_v27, 8 }
 0x7a5   : > { %v12355_v17 = vadd.f32 %v7144_v15, %v7063_v5  ;;  %7185 = vrot.lane.b32.xlu1 %v7169_v6, %s9010_s24  ;;  %7187 = vrot.lane.b32.xlu0 %v7170_v38, %s9010_s24  ;;  %v12363_v21 = vadd.f32 %v7143_v49, %v12317_v55  ;;  %v7171_v5 = vrot.slane %v12360_v47, 3 }
 0x7a7   : > { %v7176_v10 = vrot.slane %v12355_v17, 3  ;;  %v7175_v58 = vrot.slane %v12363_v21, 3 }
 0x7a9   : > { %7195 = vrot.lane.b32.xlu1 %v7174_v61, %s9010_s24  ;;  %7199 = vrot.lane.b32.xlu0 %v7176_v10, %s9010_s24 }
 0x7ad   : > { %7189 = vrot.lane.b32.xlu1 %v7171_v5, %s9010_s24  ;;  %7197 = vrot.lane.b32.xlu0 %v7175_v58, %s9010_s24 }
 0x807   : > { %v7192_v25 = vpop.permute.xlu1 %7191 }
 0x80a   : > { %v7194_v55 = vpop.permute.xlu0 %7193 }
 0x80b   : > { %v7205_v46 = vsel %vm7201_vm4, %v7192_v25, %v7194_v55 }
 0x80c   : > { %v7222_v63 = vsel %vm7214_vm6, %v7205_v46, 0.0  ;;  %vm7314_vm6 = vcmp.ge.s32.totalorder %v13323_v36, 8 }
 0x80d   : > { %v7238_v44 = vrot.slane %v7222_v63, 5 }
 0x80f   : > { %v12376_v34 = vadd.f32 %v7238_v44, %v7157_v1 }
 0x811   : > { %v7270_v53 = vrot.slane %v12376_v34, 3 }
 0x813   : > { %7290 = vrot.lane.b32.xlu1 %v7270_v53, %s9011_s25 }
 0x817   : > { %v7188_v28 = vpop.permute.xlu0 %7187  ;;  %v7186_v45 = vpop.permute.xlu1 %7185 }
 0x818   : > { %v7208_v20 = vsel %vm7201_vm4, %v7186_v45, %v7188_v28 }
 0x819   : > { %v7219_v37 = vsel %vm7211_vm12, %v7208_v20, 0.0  ;;  %vm7309_vm12 = vcmp.ge.s32.totalorder %v13317_v39, 8 }
 0x81a   : > { %v7235_v33 = vrot.slane %v7219_v37, 5 }
 0x81b   : > { %v7200_v1 = vpop.permute.xlu0 %7199  ;;  %v7196_v7 = vpop.permute.xlu1 %7195 }
 0x81c   : > { %v12385_v23 = vadd.f32 %v7235_v33, %v7154_v60  ;;  %v7209_v42 = vsel %vm7201_vm4, %v7200_v1, %v7186_v45  ;;  %v7204_v0 = vsel %vm7201_vm4, %v7194_v55, %v7196_v7 }
 0x81d   : > { %v7218_v50 = vsel %vm7210_vm8, %v7209_v42, 0.0  ;;  %v7223_v35 = vsel %vm7215_vm13, %v7204_v0, 0.0  ;;  %v8355_v42 = vmul.f32 -1.442695, %v12214_v43  ;;  %v8356_v0 = vmul.f32 -1.442695, %v12216_v48 }
 0x81e   : > { %v7234_v41 = vrot.slane %v7218_v50, 5  ;;  %v7239_v19 = vrot.slane %v7223_v35, 5  ;;  %v7267_v40 = vrot.slane %v12385_v23, 3  ;;  %v8360_v50 = vmul.f32 -1.442695, %v12230_v9 }
 0x81f   : > { %v7198_v2 = vpop.permute.xlu0 %7197  ;;  %v7190_v60 = vpop.permute.xlu1 %7189  ;;  %8926 = vpow2.f32 %v8355_v42  ;;  %v6951_v43 = vmul.f32 1.442695, %v12242_v59  ;;  %v6953_v48 = vmul.f32 1.442695, %v12246_v32  ;;  %v8357_v9 = vmul.f32 -1.442695, %v12232_v24 }
 0x820   : > { %v12396_v22 = vadd.f32 %v7234_v41, %v7153_v29  ;;  %v12398_v49 = vadd.f32 %v7239_v19, %v7158_v12  ;;  %v7202_v15 = vsel %vm7201_vm4, %v7198_v2, %v7200_v1  ;;  %v7203_v6 = vsel %vm7201_vm4, %v7196_v7, %v7198_v2  ;;  %7284 = vrot.lane.b32.xlu0 %v7267_v40, %s9011_s25  ;;  %v13325_v7 = vld [vmem:[#allocation3_spill] sm:$0xff] }
 0x821   : > { %v7224_v38 = vsel %vm7216_vm10, %v7203_v6, 0.0  ;;  %v7225_v61 = vsel %vm7217_vm2, %v7202_v15, 0.0  ;;  %v7206_v10 = vsel %vm7201_vm4, %v7190_v60, %v7192_v25  ;;  %v7207_v5 = vsel %vm7201_vm4, %v7188_v28, %v7190_v60 }
 0x822   : > { %v7240_v29 = vrot.slane %v7224_v38, 5  ;;  %v7241_v58 = vrot.slane %v7225_v61, 5  ;;  %v7220_v12 = vsel %vm7212_vm5, %v7207_v5, 0.0  ;;  %v7221_v55 = vsel %vm7213_vm15, %v7206_v10, 0.0 }
 0x823   : > { %v7236_v46 = vrot.slane %v7220_v12, 5  ;;  %v7237_v63 = vrot.slane %v7221_v55, 5  ;;  %v7266_v44 = vrot.slane %v12396_v22, 3  ;;  %v7271_v53 = vrot.slane %v12398_v49, 3 }
 0x824   : > { %v12412_v45 = vadd.f32 %v7241_v58, %v12355_v17  ;;  %v12421_v28 = vadd.f32 %v7240_v29, %v12363_v21  ;;  %v9012_v1 = vmov 1.0   ;;  %v13324_v21 = vld [vmem:[#allocation9_spill] sm:$0xff]  ;;  %8928 = vpow2.f32 %v8356_v0 }
 0x825   : > { %v12415_v20 = vadd.f32 %v7237_v63, %v12330_v13  ;;  %7282 = vrot.lane.b32.xlu1 %v7266_v44, %s9011_s25  ;;  %7292 = vrot.lane.b32.xlu0 %v7271_v53, %s9011_s25  ;;  %v12424_v37 = vadd.f32 %v7236_v46, %v12360_v47  ;;  %vm13326_vm1 = vcmp.eq.s32.totalorder %v13324_v21, %v13325_v7  ;;  %v13327_v47 = vld [vmem:[#allocation15_spill] sm:$0xff]  ;;  %8930 = vpow2.f32 %v8360_v50 }
 0x826   : > { %v7273_v25 = vrot.slane %v12412_v45, 3  ;;  %v7272_v13 = vrot.slane %v12421_v28, 3  ;;  %8363 = vmatprep.mubr.msk.f32.mxu1 %vm13326_vm1, %v9012_v1  ;;  %vm13328_vm9 = vcmp.eq.s32.totalorder %v13327_v47, %v13325_v7  ;;  %v6943_v19 = vmul.f32 1.442695, %v12220_v56 }
 0x827   : > { %v7269_v33 = vrot.slane %v12415_v20, 3  ;;  %v7268_v17 = vrot.slane %v12424_v37, 3  ;;  %8395 = vmatprep.mubr.msk.f32.mxu0 %vm13328_vm9, %v9012_v1  ;;  %v6945_v40 = vmul.f32 1.442695, %v12222_v4  ;;  %v8359_v15 = vmul.f32 -1.442695, %v12228_v18 }
 0x828   : > { %8932 = vpow2.f32 %v6943_v19  ;;  %v8358_v38 = vmul.f32 -1.442695, %v12235_v3  ;;  %v6947_v10 = vmul.f32 1.442695, %v12240_v57  ;;  %v8361_v29 = vmul.f32 -1.442695, %v12256_v16 }
 0x829   : > { %7296 = vrot.lane.b32.xlu0 %v7273_v25, %s9011_s25  ;;  %7288 = vrot.lane.b32.xlu1 %v7269_v33, %s9011_s25  ;;  %v8927_v35 = vpop.eup %8926  ;;  %8934 = vpow2.f32 %v6945_v40  ;;  %v8362_v24 = vmul.f32 -1.442695, %v12258_v54  ;;  %v12475_v25 = vmul.f32 1.442695, %v12244_v31  ;;  %vm7313_vm4 = vcmp.ge.s32.totalorder %v13321_v26, 8 }
 0x82a   : > { %v6903_v2 = vadd.f32 1.0, %v8927_v35  ;;  %v6955_v35 = vmul.f32 1.442695, %v12262_v11  ;;  %vm7310_vm8 = vcmp.ge.s32.totalorder %v13318_v8, 8 }
 0x82c   : > { %8936 = vrcp.f32 %v6903_v2 }
 0x82d   : > { %7294 = vrot.lane.b32.xlu0 %v7272_v13, %s9011_s25  ;;  %7286 = vrot.lane.b32.xlu1 %v7268_v17, %s9011_s25 }
 0x82e   : > { %v8929_v41 = vpop.eup %8928 }
 0x82f   : > { %v6904_v60 = vadd.f32 1.0, %v8929_v41  ;;  %v8931_v6 = vpop.eup %8930  ;;  %v6957_v41 = vmul.f32 1.442695, %v12264_v52 }
 0x830   : > { %v6908_v18 = vadd.f32 1.0, %v8931_v6 }
 0x831   : > { %8938 = vrcp.f32 %v6904_v60 }
 0x832   : > { %8940 = vpow2.f32 %v8359_v15  ;;  %v12459_v12 = vpop.eup %8932 }
 0x833   : > { %8942 = vpow2.f32 %v6951_v43  ;;  %v12466_v46 = vpop.eup %8934 }
 0x834   : > { %8944 = vpow2.f32 %v6953_v48 }
 0x835   : > { %8946 = vpow2.f32 %v8357_v9 }
 0x836   : > { %8948 = vpow2.f32 %v8358_v38  ;;  %v12468_v63 = vpop.eup %8936 }
 0x837   : > { %8950 = vpow2.f32 %v6947_v10 }
 0x838   : > { %8952 = vrcp.f32 %v6908_v18 }
 0x839   : > { %8954 = vpow2.f32 %v8361_v29 }
 0x83a   : > { %8956 = vpow2.f32 %v8362_v24 }
 0x83b   : > { %v12472_v53 = vpop.eup %8938 }
 0x83c   : > { %v8941_v17 = vpop.eup %8940 }
 0x83d   : > { %v12483_v27 = vpop.eup %8942 }
 0x83e   : > { %v12487_v2 = vpop.eup %8944 }
 0x83f   : > { %v8947_v43 = vpop.eup %8946 }
 0x840   : > { %v8949_v9 = vpop.eup %8948 }
 0x885   : > { %v7291_v5 = vpop.permute.xlu1 %7290 }
 0x892   : > { %v12451_v61 = vpop.permute.xlu0 %7284 }
 0x897   : > { %v7293_v3 = vpop.permute.xlu0 %7292  ;;  %v7283_v58 = vpop.permute.xlu1 %7282 }
 0x898   : > { %v7301_v55 = vsel %vm7298_vm3, %v7291_v5, %v7293_v3  ;;  %v7305_v16 = vsel %vm7298_vm3, %v7283_v58, %v12451_v61 }
 0x899   : > { %v7320_v62 = vsel %vm7312_vm0, %v7301_v55, 0.0  ;;  %v7316_v30 = vsel %vm7308_vm11, %v7305_v16, 0.0 }
 0x89a   : > { %v7336_v54 = vrot.slane %v7320_v62, 5  ;;  %v7332_v44 = vrot.slane %v7316_v30, 5 }
 0x89b   : > { %v7297_v33 = vpop.permute.xlu0 %7296  ;;  %v7289_v13 = vpop.permute.xlu1 %7288 }
 0x89c   : > { %v7352_v42 = vadd.f32 %v7336_v54, %v12398_v49  ;;  %v7348_v0 = vadd.f32 %v7332_v44, %v12385_v23  ;;  %v7306_v50 = vsel %vm7298_vm3, %v7297_v33, %v7283_v58  ;;  %v7302_v14 = vsel %vm7298_vm3, %v7289_v13, %v7291_v5  ;;  %v12497_v5 = vpop.eup %8950 }
 0x89d   : > { %v7315_v19 = vsel %vm7307_vm7, %v7306_v50, 0.0  ;;  %v7319_v40 = vsel %vm7311_vm14, %v7302_v14, 0.0  ;;  %v8953_v55 = vpop.eup %8952 }
 0x89e   : > { %v7360_v49 = vsub.f32 %v7352_v42, %v12246_v32  ;;  %v7356_v23 = vsub.f32 %v7348_v0, %v12222_v4  ;;  %v7331_v60 = vrot.slane %v7315_v19, 5  ;;  %v7335_v15 = vrot.slane %v7319_v40, 5  ;;  %v8955_v62 = vpop.eup %8954 }
 0x89f   : > { %v7295_v48 = vpop.permute.xlu0 %7294  ;;  %v7287_v6 = vpop.permute.xlu1 %7286  ;;  %v6907_v42 = vadd.f32 1.0, %v8941_v17  ;;  %v6964_v19 = vsub.f32 1.0, %v12487_v2 }
 0x8a0   : > { %v7373_v38 = vmul.f32 1.442695, %v7360_v49  ;;  %v7365_v10 = vmul.f32 1.442695, %v7356_v23  ;;  %v7347_v32 = vadd.f32 %v7331_v60, %v12396_v22  ;;  %v7351_v4 = vadd.f32 %v7335_v15, %v12376_v34 }
 0x8a1   : > { %v7299_v18 = vsel %vm7298_vm3, %v7295_v48, %v7297_v33  ;;  %v7300_v29 = vsel %vm7298_vm3, %v7293_v3, %v7295_v48  ;;  %v7303_v24 = vsel %vm7298_vm3, %v7287_v6, %v7289_v13  ;;  %v7304_v58 = vsel %vm7298_vm3, %v12451_v61, %v7287_v6  ;;  %v8957_v33 = vpop.eup %8956 }
 0x8a2   : > { %8958 = vpow2.f32 %v7373_v38  ;;  %v7355_v22 = vsub.f32 %v7347_v32, %v12220_v56  ;;  %v7359_v34 = vsub.f32 %v7351_v4, %v12242_v59  ;;  %v7321_v16 = vsel %vm7313_vm4, %v7300_v29, 0.0 }
 0x8a3   : > { %8960 = vpow2.f32 %v7365_v10  ;;  %v7322_v3 = vsel %vm7314_vm6, %v7299_v18, 0.0  ;;  %v7337_v30 = vrot.slane %v7321_v16, 5  ;;  %v7317_v54 = vsel %vm7309_vm12, %v7304_v58, 0.0 }
 0x8a4   : > { %v7363_v51 = vmul.f32 1.442695, %v7355_v22  ;;  %v7371_v61 = vmul.f32 1.442695, %v7359_v34  ;;  %v7338_v44 = vrot.slane %v7322_v3, 5  ;;  %v7318_v56 = vsel %vm7310_vm8, %v7303_v24, 0.0 }
 0x8a5   : > { %8962 = vpow2.f32 %v6955_v35  ;;  %v7353_v59 = vadd.f32 %v7337_v30, %v12421_v28  ;;  %v7333_v26 = vrot.slane %v7317_v54, 5  ;;  %v7334_v13 = vrot.slane %v7318_v56, 5 }
 0x8a6   : > { %8964 = vpow2.f32 %v7363_v51  ;;  %v7354_v36 = vadd.f32 %v7338_v44, %v12412_v45  ;;  %v6909_v35 = vadd.f32 1.0, %v8955_v62  ;;  %v6906_v49 = vadd.f32 1.0, %v8949_v9 }
 0x8a7   : > { %8966 = vpow2.f32 %v7371_v61  ;;  %v7361_v39 = vsub.f32 %v7353_v59, %v12262_v11  ;;  %v7349_v0 = vadd.f32 %v7333_v26, %v12424_v37  ;;  %v7350_v50 = vadd.f32 %v7334_v13, %v12415_v20  ;;  %v13329_v26 = vld [vmem:[#allocation5_spill] sm:$0xff] }
 0x8a8   : > { %8968 = vpow2.f32 %v6957_v41  ;;  %v7362_v8 = vsub.f32 %v7354_v36, %v12264_v52  ;;  %v12529_v20 = vsub.s32 3, %v13325_v7  ;;  %v6910_v52 = vadd.f32 1.0, %v8957_v33  ;;  %v13331_v36 = vld [vmem:[#allocation17_spill] sm:$0xff] }
 0x8a9   : > { %8970 = vpow2.f32 %v12475_v25  ;;  %v7375_v14 = vmul.f32 1.442695, %v7361_v39  ;;  %v7357_v28 = vsub.f32 %v7349_v0, %v12240_v57  ;;  %v7358_v17 = vsub.f32 %v7350_v50, %v12244_v31  ;;  %v13333_v50 = vld [vmem:[#allocation4_spill] sm:$0xff] }
 0x8aa   : > { %8972 = vrcp.f32 %v6907_v42  ;;  %v7377_v45 = vmul.f32 1.442695, %v7362_v8  ;;  %v6960_v25 = vsub.f32 1.0, %v12466_v46  ;;  %v6905_v57 = vadd.f32 1.0, %v8947_v43 }
 0x8ab   : > { %8974 = vpow2.f32 %v7375_v14  ;;  %v7367_v11 = vmul.f32 1.442695, %v7357_v28  ;;  %v7369_v37 = vmul.f32 1.442695, %v7358_v17  ;;  %v6959_v15 = vsub.f32 1.0, %v12459_v12  ;;  %v13338_v17 = vld [vmem:[#allocation6_spill] sm:$0xff] }
 0x8ac   : > { %v8959_v41 = vpop.eup %8958  ;;  %8976 = vpow2.f32 %v7377_v45  ;;  %v6963_v38 = vsub.f32 1.0, %v12483_v27  ;;  %v6961_v62 = vsub.f32 1.0, %v12497_v5  ;;  %vm13330_vm13 = vcmp.eq.s32.totalorder %v13329_v26, %v13325_v7  ;;  %v13348_v45 = vld [vmem:[#allocation8_spill] sm:$0xff] }
 0x8ad   : > { %v8961_v40 = vpop.eup %8960  ;;  %8978 = vpow2.f32 %v7367_v11  ;;  %v7384_v31 = vmul.f32 %v8959_v41, %v6964_v19  ;;  %vm13332_vm10 = vcmp.eq.s32.totalorder %v13331_v36, %v13325_v7  ;;  %vm13334_vm2 = vcmp.eq.s32.totalorder %v13324_v21, %v13333_v50  ;;  %v13353_v19 = vld [vmem:[#allocation12_spill] sm:$0xff]  ;;  %v13358_v11 = vld [vmem:[#allocation13_spill] sm:$0xff]  ;;  %v13374_v41 = vld [vmem:[#allocation18_spill] sm:$0xff] }
 0x8ae   : > { %8980 = vpow2.f32 %v7369_v37  ;;  %v7380_v23 = vmul.f32 %v8961_v40, %v6960_v25  ;;  %vm13335_vm5 = vcmp.eq.s32.totalorder %v13327_v47, %v13333_v50  ;;  %vm13336_vm15 = vcmp.eq.s32.totalorder %v13329_v26, %v13333_v50  ;;  %v13363_v37 = vld [vmem:[#allocation14_spill] sm:$0xff] }
 0x8af   : > { %v8963_v60 = vpop.eup %8962  ;;  %8982 = vrcp.f32 %v6909_v35  ;;  %v7410_v2 = vrot.slane %v7384_v31, %v12529_v20  ;;  %vm13337_vm1 = vcmp.eq.s32.totalorder %v13331_v36, %v13333_v50  ;;  %vm13339_vm9 = vcmp.eq.s32.totalorder %v13324_v21, %v13338_v17  ;;  %v13343_v35 = vld [vmem:[#allocation7_spill] sm:$0xff] }
 0x8b0   : > { %v8965_v48 = vpop.eup %8964  ;;  %8984 = vrcp.f32 %v6910_v52  ;;  %v7394_v6 = vrot.slane %v7380_v23, %v12529_v20  ;;  %v6965_v58 = vsub.f32 1.0, %v8963_v60  ;;  %vm13340_vm3 = vcmp.eq.s32.totalorder %v13327_v47, %v13338_v17 }
 0x8b1   : > { %v8967_v46 = vpop.eup %8966  ;;  %8986 = vrcp.f32 %v6905_v57  ;;  %v7424_v43 = vmul.f32 %v8953_v55, %v7410_v2  ;;  %v7379_v10 = vmul.f32 %v8965_v48, %v6959_v15  ;;  %vm13341_vm0 = vcmp.eq.s32.totalorder %v13329_v26, %v13338_v17 }
 0x8b2   : > { %v8969_v32 = vpop.eup %8968  ;;  %8988 = vrcp.f32 %v6906_v49  ;;  %v7420_v9 = vmul.f32 %v12472_v53, %v7394_v6  ;;  %v7383_v4 = vmul.f32 %v8967_v46, %v6963_v38  ;;  %vm13342_vm11 = vcmp.eq.s32.totalorder %v13331_v36, %v13338_v17 }
 0x8b3   : > { %v8971_v18 = vpop.eup %8970  ;;  %7637 = vmatprep.subr.mxu0 %v7424_v43  ;;  %v7390_v29 = vrot.slane %v7379_v10, %v12529_v20  ;;  %v6966_v34 = vsub.f32 1.0, %v8969_v32  ;;  %vm13344_vm7 = vcmp.eq.s32.totalorder %v13324_v21, %v13343_v35  ;;  %vm13345_vm14 = vcmp.eq.s32.totalorder %v13327_v47, %v13343_v35 }
 0x8b4   : > { %v8973_v12 = vpop.eup %8972  ;;  %7427 = vmatprep.subr.mxu1 %v7420_v9  ;;  %v7406_v24 = vrot.slane %v7383_v4, %v12529_v20  ;;  %v6962_v30 = vsub.f32 1.0, %v8971_v18  ;;  %vm13346_vm4 = vcmp.eq.s32.totalorder %v13329_v26, %v13343_v35  ;;  %vm13347_vm6 = vcmp.eq.s32.totalorder %v13331_v36, %v13343_v35 }
 0x8b5   : > { %v8975_v22 = vpop.eup %8974  ;;  %v7419_v27 = vmul.f32 %v12468_v63, %v7390_v29  ;;  %vm13349_vm12 = vcmp.eq.s32.totalorder %v13324_v21, %v13348_v45  ;;  %vm13350_vm8 = vcmp.eq.s32.totalorder %v13327_v47, %v13348_v45 }
 0x8b6   : > { %v8977_v55 = vpop.eup %8976  ;;  %v7423_v16 = vmul.f32 %v8973_v12, %v7406_v24  ;;  %v7385_v3 = vmul.f32 %v8975_v22, %v6965_v58 }
 0x8b7   : > { %v8979_v53 = vpop.eup %8978  ;;  %7428 = vmatpush1.xpose.msra.mxu1 %v7419_v27  ;;  %v7386_v54 = vmul.f32 %v8977_v55, %v6966_v34 }
 0x8b8   : > { %v8981_v51 = vpop.eup %8980  ;;  %7638 = vmatpush1.xpose.msra.mxu0 %v7423_v16  ;;  %v7381_v61 = vmul.f32 %v8979_v53, %v6961_v62  ;;  %v7414_v44 = vrot.slane %v7385_v3, %v12529_v20 }
 0x8b9   : > { %v8983_v56 = vpop.eup %8982  ;;  %v7382_v33 = vmul.f32 %v8981_v51, %v6962_v30  ;;  %v7418_v59 = vrot.slane %v7386_v54, %v12529_v20 }
 0x8ba   : > { %v8985_v63 = vpop.eup %8984  ;;  %8364 = vmatmul.mubr.msk.f32.vlgmr.msra.gmra.mrb[52].mxu1 %vm13330_vm13, %v9012_v1  ;;  %v7398_v5 = vrot.slane %v7381_v61, %v12529_v20  ;;  %v7425_v13 = vmul.f32 %v8983_v56, %v7414_v44  ;;  %vm13351_vm13 = vcmp.eq.s32.totalorder %v13329_v26, %v13348_v45 }
 0x8bb   : > { %v8987_v42 = vpop.eup %8986  ;;  %8396 = vmatmul.mubr.msk.f32.vlgmr.msra.gmra.mrb[52].mxu0 %vm13332_vm10, %v9012_v1  ;;  %v7402_v39 = vrot.slane %v7382_v33, %v12529_v20  ;;  %v7426_v0 = vmul.f32 %v8985_v63, %v7418_v59  ;;  %8365 = vmatprep.mubr.msk.f32.mxu1 %vm13334_vm2, %v9012_v1  ;;  %vm13352_vm10 = vcmp.eq.s32.totalorder %v13331_v36, %v13348_v45  ;;  %v13368_v20 = vld [vmem:[#allocation10_spill] sm:$0xff] }
 0x8bc   : > { %v8989_v8 = vpop.eup %8988  ;;  %v7421_v14 = vmul.f32 %v8987_v42, %v7398_v5  ;;  %8397 = vmatprep.mubr.msk.f32.mxu0 %vm13335_vm5, %v9012_v1  ;;  %vm13354_vm2 = vcmp.eq.s32.totalorder %v13324_v21, %v13353_v19  ;;  %vm13355_vm5 = vcmp.eq.s32.totalorder %v13327_v47, %v13353_v19 }
 0x8bd   : > { %v7422_v28 = vmul.f32 %v8989_v8, %v7402_v39  ;;  %7742 = vmatprep.subr.mxu0 %v7426_v0 }
 0x8be   : > { %7743 = vmatpush1.xpose.msra.mxu0 %v7425_v13  ;;  %8366 = vmatmul.mubr.msk.f32.gmra.mrb[54].mxu1 %vm13336_vm15, %v9012_v1  ;;  %vm13356_vm15 = vcmp.eq.s32.totalorder %v13329_v26, %v13353_v19 }
 0x8bf   : > { %7532 = vmatprep.subr.mxu1 %v7422_v28  ;;  %8398 = vmatmul.mubr.msk.f32.gmra.mrb[54].mxu0 %vm13337_vm1, %v9012_v1  ;;  %vm13357_vm1 = vcmp.eq.s32.totalorder %v13331_v36, %v13353_v19 }
 0x8c0   : > { %7533 = vmatpush1.xpose.msra.mxu1 %v7421_v14  ;;  %8367 = vmatprep.mubr.msk.f32.mxu1 %vm13339_vm9, %v9012_v1  ;;  %vm13359_vm9 = vcmp.eq.s32.totalorder %v13324_v21, %v13358_v11 }
 0x8c1   : > { %8399 = vmatprep.mubr.msk.f32.mxu0 %vm13340_vm3, %v9012_v1  ;;  %vm13360_vm3 = vcmp.eq.s32.totalorder %v13327_v47, %v13358_v11 }
 0x8c2   : > { %8368 = vmatmul.mubr.msk.f32.gmra.mrb[56].mxu1 %vm13341_vm0, %v9012_v1  ;;  %vm13361_vm0 = vcmp.eq.s32.totalorder %v13329_v26, %v13358_v11 }
 0x8c3   : > { %8400 = vmatmul.mubr.msk.f32.gmra.mrb[56].mxu0 %vm13342_vm11, %v9012_v1  ;;  %8369 = vmatprep.mubr.msk.f32.mxu1 %vm13344_vm7, %v9012_v1  ;;  %vm13362_vm11 = vcmp.eq.s32.totalorder %v13331_v36, %v13358_v11  ;;  %vm13364_vm7 = vcmp.eq.s32.totalorder %v13324_v21, %v13363_v37  ;;  %v13370_v21 = vld [vmem:[#allocation16_spill] sm:$0xff] }
 0x8c4   : > { %8401 = vmatprep.mubr.msk.f32.mxu0 %vm13345_vm14, %v9012_v1  ;;  %vm13365_vm14 = vcmp.eq.s32.totalorder %v13327_v47, %v13363_v37  ;;  %v13372_v47 = vld [vmem:[#allocation11_spill] sm:$0xff] }
 0x8c6   : > { %8370 = vmatmul.mubr.msk.f32.gmra.mrb[58].mxu1 %vm13346_vm4, %v9012_v1  ;;  %vm13366_vm4 = vcmp.eq.s32.totalorder %v13329_v26, %v13363_v37 }
 0x8c7   : > { %8402 = vmatmul.mubr.msk.f32.gmra.mrb[58].mxu0 %vm13347_vm6, %v9012_v1  ;;  %8371 = vmatprep.mubr.msk.f32.mxu1 %vm13349_vm12, %v9012_v1  ;;  %vm13367_vm6 = vcmp.eq.s32.totalorder %v13331_v36, %v13363_v37  ;;  %vm13369_vm12 = vcmp.eq.s32.totalorder %v13368_v20, %v13325_v7 }
 0x8c8   : > { %8403 = vmatprep.mubr.msk.f32.mxu0 %vm13350_vm8, %v9012_v1  ;;  %vm13371_vm8 = vcmp.eq.s32.totalorder %v13370_v21, %v13325_v7 }
 0x8ca   : > { %8372 = vmatmul.mubr.msk.f32.gmra.mrb[60].mxu1 %vm13351_vm13, %v9012_v1  ;;  %vm13373_vm13 = vcmp.eq.s32.totalorder %v13372_v47, %v13325_v7 }
 0x8cb   : > { %8404 = vmatmul.mubr.msk.f32.gmra.mrb[60].mxu0 %vm13352_vm10, %v9012_v1  ;;  %8373 = vmatprep.mubr.msk.f32.mxu1 %vm13354_vm2, %v9012_v1  ;;  %vm13375_vm10 = vcmp.eq.s32.totalorder %v13374_v41, %v13325_v7  ;;  %vm13376_vm2 = vcmp.eq.s32.totalorder %v13368_v20, %v13333_v50 }
 0x8cc   : > { %8405 = vmatprep.mubr.msk.f32.mxu0 %vm13355_vm5, %v9012_v1  ;;  %vm13377_vm5 = vcmp.eq.s32.totalorder %v13370_v21, %v13333_v50 }
 0x8ce   : > { %8374 = vmatmul.mubr.msk.f32.gmra.mrb[62].mxu1 %vm13356_vm15, %v9012_v1  ;;  %vm13378_vm15 = vcmp.eq.s32.totalorder %v13372_v47, %v13333_v50 }
 0x8cf   : > { %8406 = vmatmul.mubr.msk.f32.gmra.mrb[62].mxu0 %vm13357_vm1, %v9012_v1  ;;  %8375 = vmatprep.mubr.msk.f32.mxu1 %vm13359_vm9, %v9012_v1  ;;  %vm13379_vm1 = vcmp.eq.s32.totalorder %v13374_v41, %v13333_v50  ;;  %vm13380_vm9 = vcmp.eq.s32.totalorder %v13368_v20, %v13338_v17 }
 0x8d0   : > { %8407 = vmatprep.mubr.msk.f32.mxu0 %vm13360_vm3, %v9012_v1  ;;  %vm13381_vm3 = vcmp.eq.s32.totalorder %v13370_v21, %v13338_v17 }
 0x8d2   : > { %8376 = vmatmul.mubr.msk.f32.gmra.mrb[64].mxu1 %vm13361_vm0, %v9012_v1  ;;  %vm13382_vm0 = vcmp.eq.s32.totalorder %v13372_v47, %v13338_v17 }
 0x8d3   : > { %8408 = vmatmul.mubr.msk.f32.gmra.mrb[64].mxu0 %vm13362_vm11, %v9012_v1  ;;  %8377 = vmatprep.mubr.msk.f32.mxu1 %vm13364_vm7, %v9012_v1  ;;  %vm13383_vm11 = vcmp.eq.s32.totalorder %v13374_v41, %v13338_v17  ;;  %vm13384_vm7 = vcmp.eq.s32.totalorder %v13368_v20, %v13343_v35 }
 0x8d4   : > { %8409 = vmatprep.mubr.msk.f32.mxu0 %vm13365_vm14, %v9012_v1  ;;  %vm13385_vm14 = vcmp.eq.s32.totalorder %v13370_v21, %v13343_v35 }
 0x8d6   : > { %8378 = vmatmul.mubr.msk.f32.gmra.mrb[66].mxu1 %vm13366_vm4, %v9012_v1  ;;  %vm13386_vm4 = vcmp.eq.s32.totalorder %v13372_v47, %v13343_v35 }
 0x8d7   : > { %8410 = vmatmul.mubr.msk.f32.gmra.mrb[66].mxu0 %vm13367_vm6, %v9012_v1  ;;  %8379 = vmatprep.mubr.msk.f32.mxu1 %vm13369_vm12, %v9012_v1  ;;  %vm13387_vm6 = vcmp.eq.s32.totalorder %v13374_v41, %v13343_v35  ;;  %vm13388_vm12 = vcmp.eq.s32.totalorder %v13368_v20, %v13348_v45 }
 0x8d8   : > { %8411 = vmatprep.mubr.msk.f32.mxu0 %vm13371_vm8, %v9012_v1  ;;  %vm13389_vm8 = vcmp.eq.s32.totalorder %v13370_v21, %v13348_v45 }
 0x8da   : > { %8380 = vmatmul.mubr.msk.f32.vlgmr.msra.gmra.mrb[52].mxu1 %vm13373_vm13, %v9012_v1  ;;  %vm13390_vm13 = vcmp.eq.s32.totalorder %v13372_v47, %v13348_v45 }
 0x8db   : > { %8412 = vmatmul.mubr.msk.f32.vlgmr.msra.gmra.mrb[52].mxu0 %vm13375_vm10, %v9012_v1  ;;  %8381 = vmatprep.mubr.msk.f32.mxu1 %vm13376_vm2, %v9012_v1  ;;  %vm13391_vm10 = vcmp.eq.s32.totalorder %v13374_v41, %v13348_v45  ;;  %vm13392_vm2 = vcmp.eq.s32.totalorder %v13368_v20, %v13353_v19 }
 0x8dc   : > { %8413 = vmatprep.mubr.msk.f32.mxu0 %vm13377_vm5, %v9012_v1  ;;  %vm13393_vm5 = vcmp.eq.s32.totalorder %v13370_v21, %v13353_v19 }
 0x8de   : > { %8382 = vmatmul.mubr.msk.f32.gmra.mrb[54].mxu1 %vm13378_vm15, %v9012_v1  ;;  %vm13394_vm15 = vcmp.eq.s32.totalorder %v13372_v47, %v13353_v19 }
 0x8df   : > { %8414 = vmatmul.mubr.msk.f32.gmra.mrb[54].mxu0 %vm13379_vm1, %v9012_v1  ;;  %8383 = vmatprep.mubr.msk.f32.mxu1 %vm13380_vm9, %v9012_v1  ;;  %vm13395_vm1 = vcmp.eq.s32.totalorder %v13374_v41, %v13353_v19  ;;  %vm13396_vm9 = vcmp.eq.s32.totalorder %v13368_v20, %v13358_v11 }
 0x8e0   : > { %8415 = vmatprep.mubr.msk.f32.mxu0 %vm13381_vm3, %v9012_v1  ;;  %vm13397_vm3 = vcmp.eq.s32.totalorder %v13370_v21, %v13358_v11 }
 0x8e2   : > { %8384 = vmatmul.mubr.msk.f32.gmra.mrb[56].mxu1 %vm13382_vm0, %v9012_v1  ;;  %vm13398_vm0 = vcmp.eq.s32.totalorder %v13372_v47, %v13358_v11 }
 0x8e3   : > { %8416 = vmatmul.mubr.msk.f32.gmra.mrb[56].mxu0 %vm13383_vm11, %v9012_v1  ;;  %8385 = vmatprep.mubr.msk.f32.mxu1 %vm13384_vm7, %v9012_v1  ;;  %vm13399_vm11 = vcmp.eq.s32.totalorder %v13374_v41, %v13358_v11  ;;  %vm13400_vm7 = vcmp.eq.s32.totalorder %v13368_v20, %v13363_v37 }
 0x8e4   : > { %8417 = vmatprep.mubr.msk.f32.mxu0 %vm13385_vm14, %v9012_v1  ;;  %vm13401_vm14 = vcmp.eq.s32.totalorder %v13370_v21, %v13363_v37 }
 0x8e6   : > { %8386 = vmatmul.mubr.msk.f32.gmra.mrb[58].mxu1 %vm13386_vm4, %v9012_v1  ;;  %vm13402_vm4 = vcmp.eq.s32.totalorder %v13372_v47, %v13363_v37 }
 0x8e7   : > { %8418 = vmatmul.mubr.msk.f32.gmra.mrb[58].mxu0 %vm13387_vm6, %v9012_v1  ;;  %8387 = vmatprep.mubr.msk.f32.mxu1 %vm13388_vm12, %v9012_v1  ;;  %vm13403_vm6 = vcmp.eq.s32.totalorder %v13374_v41, %v13363_v37  ;;  %vm13404_vm12 = vcmask 23552  }
 0x8e8   : > { %8419 = vmatprep.mubr.msk.f32.mxu0 %vm13389_vm8, %v9012_v1  ;;  %vm13405_vm8 = vmmov %vm13404_vm12 }
 0x8ea   : > { %8388 = vmatmul.mubr.msk.f32.gmra.mrb[60].mxu1 %vm13390_vm13, %v9012_v1  ;;  %vm13406_vm13 = vmmov %vm13405_vm8 }
 0x8eb   : > { %8420 = vmatmul.mubr.msk.f32.gmra.mrb[60].mxu0 %vm13391_vm10, %v9012_v1  ;;  %8389 = vmatprep.mubr.msk.f32.mxu1 %vm13392_vm2, %v9012_v1  ;;  %vm13407_vm10 = vmmov %vm13405_vm8 }
 0x8ec   : > { %8421 = vmatprep.mubr.msk.f32.mxu0 %vm13393_vm5, %v9012_v1  ;;  %vm13408_vm2 = vmmov %vm13405_vm8 }
 0x8ed   : > { %vm13409_vm5 = vmmov %vm13408_vm2 }
 0x8ee   : > { %8390 = vmatmul.mubr.msk.f32.gmra.mrb[62].mxu1 %vm13394_vm15, %v9012_v1  ;;  %vm13410_vm15 = vmmov %vm13408_vm2 }
 0x8ef   : > { %8422 = vmatmul.mubr.msk.f32.gmra.mrb[62].mxu0 %vm13395_vm1, %v9012_v1  ;;  %8391 = vmatprep.mubr.msk.f32.mxu1 %vm13396_vm9, %v9012_v1  ;;  %vm13411_vm1 = vmmov %vm13408_vm2 }
 0x8f0   : > { %8423 = vmatprep.mubr.msk.f32.mxu0 %vm13397_vm3, %v9012_v1 }
 0x8f2   : > { %8392 = vmatmul.mubr.msk.f32.gmra.mrb[64].mxu1 %vm13398_vm0, %v9012_v1 }
 0x8f3   : > { %8424 = vmatmul.mubr.msk.f32.gmra.mrb[64].mxu0 %vm13399_vm11, %v9012_v1  ;;  %8393 = vmatprep.mubr.msk.f32.mxu1 %vm13400_vm7, %v9012_v1 }
 0x8f4   : > { %8425 = vmatprep.mubr.msk.f32.mxu0 %vm13401_vm14, %v9012_v1 }
 0x8f6   : > { %8394 = vmatmul.mubr.msk.f32.gmra.mrb[66].mxu1 %vm13402_vm4, %v9012_v1 }
 0x8f7   : > { %8426 = vmatmul.mubr.msk.f32.gmra.mrb[66].mxu0 %vm13403_vm6, %v9012_v1 }
 0x9ad   : > { %v7598_v7 = vpop.f32.mrb[52].mxu1 }
 0x9ae   : > { %v7808_v52 = vpop.f32.mrb[52].mxu0  ;;  %v7600_v25 = vpop.f32.mrb[53].mxu1 }
 0x9af   : > { %v8669_v40 = vadd.f32 %v7808_v52, %v7598_v7  ;;  %v7810_v57 = vpop.f32.mrb[53].mxu0 }
 0x9b1   : > { %7847 = vst.msk [vmem:[%s12797_s30] sm:$0xff] %vm13404_vm12, %v8669_v40  ;;  %v7603_v1 = vpop.f32.mrb[54].mxu1 }
 0x9b2   : > { %v7813_v31 = vpop.f32.mrb[54].mxu0  ;;  %v7605_v49 = vpop.f32.mrb[55].mxu1 }
 0x9b3   : > { %v8670_v23 = vadd.f32 %v7813_v31, %v7603_v1  ;;  %v7815_v60 = vpop.f32.mrb[55].mxu0 }
 0x9b5   : > { %7848 = vst.msk [vmem:[%s12797_s30 + $0x8] sm:$0xff] %vm13405_vm8, %v8670_v23  ;;  %v7608_v2 = vpop.f32.mrb[56].mxu1 }
 0x9b6   : > { %v7818_v15 = vpop.f32.mrb[56].mxu0  ;;  %v7610_v48 = vpop.f32.mrb[57].mxu1 }
 0x9b7   : > { %v8671_v6 = vadd.f32 %v7818_v15, %v7608_v2  ;;  %v7820_v38 = vpop.f32.mrb[57].mxu0 }
 0x9b9   : > { %7849 = vst.msk [vmem:[%s12797_s30 + $0x10] sm:$0xff] %vm13406_vm13, %v8671_v6  ;;  %v7613_v46 = vpop.f32.mrb[58].mxu1 }
 0x9ba   : > { %v7823_v43 = vpop.f32.mrb[58].mxu0  ;;  %v7615_v10 = vpop.f32.mrb[59].mxu1 }
 0x9bb   : > { %v8672_v32 = vadd.f32 %v7823_v43, %v7613_v46  ;;  %v7825_v9 = vpop.f32.mrb[59].mxu0 }
 0x9bd   : > { %7850 = vst.msk [vmem:[%s12797_s30 + $0x18] sm:$0xff] %vm13407_vm10, %v8672_v32  ;;  %v7618_v4 = vpop.f32.mrb[60].mxu1 }
 0x9be   : > { %v7828_v18 = vpop.f32.mrb[60].mxu0  ;;  %v7620_v29 = vpop.f32.mrb[61].mxu1 }
 0x9bf   : > { %v8673_v12 = vadd.f32 %v7828_v18, %v7618_v4  ;;  %v7830_v24 = vpop.f32.mrb[61].mxu0 }
 0x9c1   : > { %7851 = vst.msk [vmem:[%s12797_s30 + $0x20] sm:$0xff] %vm13408_vm2, %v8673_v12  ;;  %v7623_v58 = vpop.f32.mrb[62].mxu1 }
 0x9c2   : > { %v7833_v22 = vpop.f32.mrb[62].mxu0  ;;  %v7625_v27 = vpop.f32.mrb[63].mxu1 }
 0x9c3   : > { %v8674_v34 = vadd.f32 %v7833_v22, %v7623_v58  ;;  %v7835_v55 = vpop.f32.mrb[63].mxu0 }
 0x9c5   : > { %7852 = vst.msk [vmem:[%s12797_s30 + $0x28] sm:$0xff] %vm13409_vm5, %v8674_v34  ;;  %v7628_v16 = vpop.f32.mrb[64].mxu1 }
 0x9c6   : > { %v7838_v62 = vpop.f32.mrb[64].mxu0  ;;  %v7630_v3 = vpop.f32.mrb[65].mxu1 }
 0x9c7   : > { %v8675_v53 = vadd.f32 %v7838_v62, %v7628_v16  ;;  %v7840_v30 = vpop.f32.mrb[65].mxu0 }
 0x9c9   : > { %7853 = vst.msk [vmem:[%s12797_s30 + $0x30] sm:$0xff] %vm13410_vm15, %v8675_v53  ;;  %v7633_v54 = vpop.f32.mrb[66].mxu1 }
 0x9ca   : > { %v7843_v51 = vpop.f32.mrb[66].mxu0  ;;  %v7635_v61 = vpop.f32.mrb[67].mxu1 }
 0x9cb   : > { %v8676_v44 = vadd.f32 %v7843_v51, %v7633_v54  ;;  %v7845_v56 = vpop.f32.mrb[67].mxu0 }
 0x9cd   : > { %7854 = vst.msk [vmem:[%s12797_s30 + $0x38] sm:$0xff] %vm13411_vm1, %v8676_v44 }
 0x9ce PF: > { %s20_s13 = sadd.s32 1, %s8996_s13  }
 0x9cf   : > { %p17_p5 = scmp.ge.s32.totalorder %s20_s13, 4  }
 0x9d1   :  { %19 = sbr.rel (!%p17_p5) target bundleno = 1 (0x1), region = 90 }

</bundles_post_ra>
